<compile_context>
chip_gen: v7x
topology: tpu7x:2x2x1
jax: 0.10.0
libtpu: 0.0.40
codegen_flags: <defaults>
</compile_context>

<pallas_src>
import jax
import jax.numpy as jnp
from jax import lax
from jax.experimental import pallas as pl
from jax.experimental.pallas import tpu as pltpu

# ----- scaled-down hyper-parameters (ratios match the real module) -----
B = 2            # batch
S = 8            # sequence length
BS = B * S
H = 64           # hidden size          (768 in CodeBERT)
NH = 4           # attention heads      (12 in CodeBERT)
DH = H // NH     # head dim
FF = 128         # FFN intermediate     (3072 in CodeBERT)
NL = 2           # encoder layers       (12 in CodeBERT)
VOCAB = 128      # vocab size           (synthetic)
HG = H // 2      # GRU hidden           (384 in real model; bidirectional -> 2*HG == H)
C1 = 32          # classifier hidden    (512 in real model)
NC = 2           # n_classes
LN_EPS = 1e-12
BN_EPS = 1e-5

DOT_DT = jnp.bfloat16      # MXU input dtype (accumulation stays f32)

# ----- bf16 weight-slab row layout (width = 3*H = 192; all offsets multiples of 16) -----
WROWS_PER_LAYER = 3 * H + FF            # wqkv(64) + wo(64) + wi(64) + wo2(128) = 320
WR_WIH  = NL * WROWS_PER_LAYER          # (H, 6*HG)
WR_WHHF = WR_WIH + H
WR_WHHB = WR_WHHF + HG
WR_W1   = WR_WHHB + HG
WR_W2   = WR_W1 + H
W_ROWS  = WR_W2 + C1                    # 864
W_COLS  = 3 * H                         # 192

# ----- f32 vector-slab row layout (width = 192) -----
VR_EMB_G = 0
VR_EMB_B = 1
VR_POS   = 2                            # S rows
VR_LAYER0 = VR_POS + S                  # 10
V_PER_LAYER = 8                         # bqkv, bo, ln1g, ln1b, bi, bo2, ln2g, ln2b
VR_BIH  = VR_LAYER0 + NL * V_PER_LAYER  # 26
VR_BHHF = VR_BIH + 1
VR_BHHB = VR_BHHF + 1
VR_BN_G = VR_BHHB + 1
VR_BN_B = VR_BN_G + 1
VR_BN_M = VR_BN_B + 1
VR_BN_V = VR_BN_M + 1
VR_B1   = VR_BN_V + 1
VR_B2   = VR_B1 + 1
V_ROWS  = VR_B2 + 1                     # 35
V_COLS  = 3 * H                         # 192


def _layernorm(x, g, b, eps=LN_EPS):
    mu = jnp.mean(x, axis=-1, keepdims=True)
    var = jnp.mean((x - mu) ** 2, axis=-1, keepdims=True)
    return (x - mu) * lax.rsqrt(var + eps) * g + b


def _gru_cell(gi, h, whh, bhh):
    """PyTorch GRU cell (gate order r, z, n); input projection `gi` precomputed."""
    gh = jnp.dot(h.astype(DOT_DT), whh, preferred_element_type=jnp.float32) + bhh
    r = jax.nn.sigmoid(gi[:, 0 * HG:1 * HG] + gh[:, 0 * HG:1 * HG])
    z = jax.nn.sigmoid(gi[:, 1 * HG:2 * HG] + gh[:, 1 * HG:2 * HG])
    n = jnp.tanh(gi[:, 2 * HG:3 * HG] + r * gh[:, 2 * HG:3 * HG])
    return (1.0 - z) * n + z * h


def _encoder_layer(x, attn_bias, w_ref, v_ref, l):
    """One BERT encoder layer.  x: (BS, H) f32.  attn_bias: (B, 1, S) additive mask."""
    wb = l * WROWS_PER_LAYER
    vb = VR_LAYER0 + l * V_PER_LAYER

    # fused QKV projection; 1/sqrt(DH) is already folded into the Q columns at pack time
    qkv = (jnp.dot(x.astype(DOT_DT), w_ref[wb:wb + H, :],
                   preferred_element_type=jnp.float32)
           + v_ref[vb + 0:vb + 1, 0:3 * H])                          # (BS, 3H) f32

    wo = w_ref[wb + H:wb + 2 * H, 0:H]                               # (H, H) bf16
    attn = jnp.zeros((BS, H), jnp.float32)
    for h in range(NH):                                              # static unroll over heads
        qh = qkv[:, h * DH:(h + 1) * DH].reshape(B, S, DH).astype(DOT_DT)
        kh = qkv[:, H + h * DH:H + (h + 1) * DH].reshape(B, S, DH).astype(DOT_DT)
        vh = qkv[:, 2 * H + h * DH:2 * H + (h + 1) * DH].reshape(B, S, DH).astype(DOT_DT)
        s = jnp.einsum('bqd,bkd->bqk', qh, kh,
                       preferred_element_type=jnp.float32) + attn_bias
        s = s - jnp.max(s, axis=-1, keepdims=True)                   # softmax stats in f32
        p = jnp.exp(s)
        p = p * pl.reciprocal(jnp.sum(p, axis=-1, keepdims=True), approx=True)
        ctx = jnp.einsum('bqk,bkd->bqd', p.astype(DOT_DT), vh,
                         preferred_element_type=jnp.float32).reshape(BS, DH)
        # accumulate this head's contribution to the output projection (no concat / scratch)
        attn = attn + jnp.dot(ctx.astype(DOT_DT), wo[h * DH:(h + 1) * DH, :],
                              preferred_element_type=jnp.float32)
    attn = attn + v_ref[vb + 1:vb + 2, 0:H]                          # bo

    x1 = _layernorm(x + attn, v_ref[vb + 2:vb + 3, 0:H], v_ref[vb + 3:vb + 4, 0:H])

    # TODO(synk): HF "gelu" is the exact erf GELU; tanh approximation used for TPU lowering.
    hmid = jax.nn.gelu(
        jnp.dot(x1.astype(DOT_DT), w_ref[wb + 2 * H:wb + 3 * H, 0:FF],
                preferred_element_type=jnp.float32) + v_ref[vb + 4:vb + 5, 0:FF],
        approximate=True)
    ffn = (jnp.dot(hmid.astype(DOT_DT), w_ref[wb + 3 * H:wb + 3 * H + FF, 0:H],
                   preferred_element_type=jnp.float32) + v_ref[vb + 5:vb + 6, 0:H])
    return _layernorm(x1 + ffn, v_ref[vb + 6:vb + 7, 0:H], v_ref[vb + 7:vb + 8, 0:H])


def fused_forward_kernel(ids_ref, mask_ref, wemb_ref, w_ref, v_ref, o_ref):
    # ----- embeddings: in-kernel gather (one-hot MXU matmul) + positions + LayerNorm -----
    ids = ids_ref[...]                                               # (BS, 1) int32
    onehot = (lax.broadcasted_iota(jnp.int32, (BS, VOCAB), 1) == ids).astype(jnp.float32)
    word = jnp.dot(onehot, wemb_ref[...], preferred_element_type=jnp.float32)   # (BS, H)
    pos = v_ref[VR_POS:VR_POS + S, 0:H]                              # (S, H)
    emb = (word.reshape(B, S, H) + pos[None, :, :]).reshape(BS, H)
    x = _layernorm(emb, v_ref[VR_EMB_G:VR_EMB_G + 1, 0:H], v_ref[VR_EMB_B:VR_EMB_B + 1, 0:H])

    # additive attention key-mask, broadcast over query positions: (B, 1, S)
    attn_bias = ((1.0 - mask_ref[...]) * (-1e9))[:, None, :]

    # ----- transformer encoder layers -----
    for l in range(NL):
        x = _encoder_layer(x, attn_bias, w_ref, v_ref, l)

    # ----- bidirectional GRU; only gru_output[:, 0, :] is needed downstream -----
    # combined fwd/bwd input projection: one (BS,H) @ (H,6*HG) matmul
    gi_all = (jnp.dot(x.astype(DOT_DT), w_ref[WR_WIH:WR_WIH + H, :],
                      preferred_element_type=jnp.float32)
              + v_ref[VR_BIH:VR_BIH + 1, 0:6 * HG])                  # (BS, 6*HG)
    gi3 = gi_all.reshape(B, S, 6 * HG)

    h0 = jnp.zeros((B, HG), jnp.float32)

    # forward direction at t=0 depends only on x[:, 0, :] with zero initial state
    whhf = w_ref[WR_WHHF:WR_WHHF + HG, 0:3 * HG]
    bhhf = v_ref[VR_BHHF:VR_BHHF + 1, 0:3 * HG]
    h_fwd0 = _gru_cell(gi3[:, 0, 0:3 * HG], h0, whhf, bhhf)

    # backward direction at t=0 = final state of the reverse scan over the whole sequence
    whhb = w_ref[WR_WHHB:WR_WHHB + HG, 0:3 * HG]
    bhhb = v_ref[VR_BHHB:VR_BHHB + 1, 0:3 * HG]
    # TODO(synk): could hold W_hh resident in MXU weight regs (matmul_push_rhs/acc_lhs)
    #             across the 8 serial steps; plain dots kept for robustness.
    h = h0
    for t in range(S - 1, -1, -1):                                   # static, fully unrolled
        h = _gru_cell(gi3[:, t, 3 * HG:], h, whhb, bhhb)
    h_bwd0 = h

    # ----- dropout(identity, eval) -> BatchNorm1d (running stats) -> Linear->ReLU->Linear -----
    bn_g = v_ref[VR_BN_G:VR_BN_G + 1, 0:H]
    bn_b = v_ref[VR_BN_B:VR_BN_B + 1, 0:H]
    bn_m = v_ref[VR_BN_M:VR_BN_M + 1, 0:H]
    inv_std = lax.rsqrt(v_ref[VR_BN_V:VR_BN_V + 1, 0:H] + BN_EPS)
    # split BN + first Linear into fwd/bwd halves -> no lane-axis concatenate needed
    xn_f = (h_fwd0 - bn_m[:, :HG]) * inv_std[:, :HG] * bn_g[:, :HG] + bn_b[:, :HG]
    xn_b = (h_bwd0 - bn_m[:, HG:]) * inv_std[:, HG:] * bn_g[:, HG:] + bn_b[:, HG:]

    w1 = w_ref[WR_W1:WR_W1 + H, 0:C1]                                # (H, C1) bf16
    h1 = jnp.maximum(
        jnp.dot(xn_f.astype(DOT_DT), w1[:HG, :], preferred_element_type=jnp.float32)
        + jnp.dot(xn_b.astype(DOT_DT), w1[HG:, :], preferred_element_type=jnp.float32)
        + v_ref[VR_B1:VR_B1 + 1, 0:C1], 0.0)
    # dropout -> identity (eval mode)
    w2 = w_ref[WR_W2:WR_W2 + C1, 0:NC]
    o_ref[...] = (jnp.dot(h1.astype(DOT_DT), w2, preferred_element_type=jnp.float32)
                  + v_ref[VR_B2:VR_B2 + 1, 0:NC])


# ------------------------------------------------------------------ wrapper

def codebert_classifier_forward(packed, input_ids, attention_mask):
    ids = input_ids.reshape(BS, 1).astype(jnp.int32)
    mask = attention_mask.astype(jnp.float32)                        # (B, S)
    vmem = lambda: pl.BlockSpec(memory_space=pltpu.MemorySpace.VMEM)
    return pl.pallas_call(
        fused_forward_kernel,
        out_shape=jax.ShapeDtypeStruct((B, NC), jnp.float32),
        in_specs=[vmem() for _ in range(5)],
        out_specs=vmem(),
    )(ids, mask, packed["word_emb"], packed["w_slab"], packed["v_slab"])


# ------------------------------------------------------------------ params

def init_params(key):
    keys = iter(jax.random.split(key, 64))

    def nrm(shape, scale=0.02):
        return scale * jax.random.normal(next(keys), shape, jnp.float32)

    p = {
        "word_emb": nrm((VOCAB, H)),
        "pos_emb": nrm((S, H)),
        "emb_ln_g": jnp.ones((H,), jnp.float32),
        "emb_ln_b": jnp.zeros((H,), jnp.float32),
        "layers": [],
    }
    for _ in range(NL):
        p["layers"].append(dict(
            wq=nrm((H, H)), bq=jnp.zeros((H,), jnp.float32),
            wk=nrm((H, H)), bk=jnp.zeros((H,), jnp.float32),
            wv=nrm((H, H)), bv=jnp.zeros((H,), jnp.float32),
            wo=nrm((H, H)), bo=jnp.zeros((H,), jnp.float32),
            ln1_g=jnp.ones((H,), jnp.float32), ln1_b=jnp.zeros((H,), jnp.float32),
            wi=nrm((H, FF)), bi=jnp.zeros((FF,), jnp.float32),
            wo2=nrm((FF, H)), bo2=jnp.zeros((H,), jnp.float32),
            ln2_g=jnp.ones((H,), jnp.float32), ln2_b=jnp.zeros((H,), jnp.float32),
        ))
    p["gru"] = dict(
        wihf=nrm((H, 3 * HG), 0.05), whhf=nrm((HG, 3 * HG), 0.05),
        bihf=jnp.zeros((3 * HG,), jnp.float32), bhhf=jnp.zeros((3 * HG,), jnp.float32),
        wihb=nrm((H, 3 * HG), 0.05), whhb=nrm((HG, 3 * HG), 0.05),
        bihb=jnp.zeros((3 * HG,), jnp.float32), bhhb=jnp.zeros((3 * HG,), jnp.float32),
    )
    p["head"] = dict(
        bn_g=jnp.ones((H,), jnp.float32), bn_b=jnp.zeros((H,), jnp.float32),
        bn_m=jnp.zeros((H,), jnp.float32), bn_v=jnp.ones((H,), jnp.float32),
        w1=nrm((H, C1), 0.05), b1=jnp.zeros((C1,), jnp.float32),
        w2=nrm((C1, NC), 0.05), b2=jnp.zeros((NC,), jnp.float32),
    )
    return p


def pack_params(p):
    """One-time packing of all weights into two VMEM-friendly slabs (runs at init, not per call)."""
    scale = 1.0 / (float(DH) ** 0.5)
    w = jnp.zeros((W_ROWS, W_COLS), jnp.float32)
    v = jnp.zeros((V_ROWS, V_COLS), jnp.float32)

    def put_w(slab, row, mat):
        r, c = mat.shape
        return slab.at[row:row + r, 0:c].set(mat)

    def put_v(slab, row, vec):
        vec2 = jnp.atleast_2d(vec)
        r, c = vec2.shape
        return slab.at[row:row + r, 0:c].set(vec2)

    for l, L in enumerate(p["layers"]):
        wb = l * WROWS_PER_LAYER
        vb = VR_LAYER0 + l * V_PER_LAYER
        # fold 1/sqrt(DH) into the Q projection (weights + bias)
        wqkv = jnp.concatenate([L["wq"] * scale, L["wk"], L["wv"]], axis=1)   # (H, 3H)
        bqkv = jnp.concatenate([L["bq"] * scale, L["bk"], L["bv"]])
        w = put_w(w, wb + 0 * H, wqkv)
        w = put_w(w, wb + 1 * H, L["wo"])
        w = put_w(w, wb + 2 * H, L["wi"])
        w = put_w(w, wb + 3 * H, L["wo2"])
        v = put_v(v, vb + 0, bqkv)
        v = put_v(v, vb + 1, L["bo"])
        v = put_v(v, vb + 2, L["ln1_g"])
        v = put_v(v, vb + 3, L["ln1_b"])
        v = put_v(v, vb + 4, L["bi"])
        v = put_v(v, vb + 5, L["bo2"])
        v = put_v(v, vb + 6, L["ln2_g"])
        v = put_v(v, vb + 7, L["ln2_b"])

    g = p["gru"]
    w = put_w(w, WR_WIH, jnp.concatenate([g["wihf"], g["wihb"]], axis=1))     # (H, 6*HG)
    w = put_w(w, WR_WHHF, g["whhf"])
    w = put_w(w, WR_WHHB, g["whhb"])
    hd = p["head"]
    w = put_w(w, WR_W1, hd["w1"])
    w = put_w(w, WR_W2, hd["w2"])

    v = put_v(v, VR_EMB_G, p["emb_ln_g"])
    v = put_v(v, VR_EMB_B, p["emb_ln_b"])
    v = put_v(v, VR_POS, p["pos_emb"])
    v = put_v(v, VR_BIH, jnp.concatenate([g["bihf"], g["bihb"]]))
    v = put_v(v, VR_BHHF, g["bhhf"])
    v = put_v(v, VR_BHHB, g["bhhb"])
    v = put_v(v, VR_BN_G, hd["bn_g"])
    v = put_v(v, VR_BN_B, hd["bn_b"])
    v = put_v(v, VR_BN_M, hd["bn_m"])
    v = put_v(v, VR_BN_V, hd["bn_v"])
    v = put_v(v, VR_B1, hd["b1"])
    v = put_v(v, VR_B2, hd["b2"])

    return {"word_emb": p["word_emb"],
            "w_slab": w.astype(DOT_DT),     # all matmul weights, bf16
            "v_slab": v}                    # all bias / LN / BN vectors + pos_emb, f32


if __name__ == "__main__":
    key = jax.random.PRNGKey(0)
    k_params, k_ids = jax.random.split(key)
    params = init_params(k_params)
    packed = pack_params(params)

    input_ids = jax.random.randint(k_ids, (B, S), 0, VOCAB, dtype=jnp.int32)
    attention_mask = jnp.ones((B, S), dtype=jnp.int32)
    attention_mask = attention_mask.at[1, S - 2:].set(0)   # exercise padding mask

    forward = jax.jit(codebert_classifier_forward)
    logits = forward(packed, input_ids, attention_mask)
    jax.block_until_ready(logits)
    assert logits.shape == (B, NC) and logits.dtype == jnp.float32
    assert bool(jnp.all(jnp.isfinite(logits)))
    print("KERNEL_OK")
</pallas_src>

<mosaic_0001>
module attributes {stable_mosaic.version = 11 : i64} {
  func.func @fused_forward_kernel(%arg0: memref<16x1xi32, #tpu.memory_space<vmem>>, %arg1: memref<2x8xf32, #tpu.memory_space<vmem>>, %arg2: memref<128x64xf32, #tpu.memory_space<vmem>>, %arg3: memref<864x192xbf16, #tpu.memory_space<vmem>>, %arg4: memref<35x192xf32, #tpu.memory_space<vmem>>, %arg5: memref<2x2xf32, #tpu.memory_space<vmem>>) attributes {dimension_semantics = [], scalar_prefetch = 0 : i64, scratch_operands = 0 : i64, tpu.core_type = #tpu.core_type<tc>} {
    %c0 = arith.constant 0 : index
    %c0_0 = arith.constant 0 : index
    %0 = vector.load %arg0[%c0, %c0_0] : memref<16x1xi32, #tpu.memory_space<vmem>>, vector<16x1xi32>
    %1 = tpu.iota {dimensions = array<i32: 1>} : vector<16x128xi32>
    %2 = vector.broadcast %0 : vector<16x1xi32> to vector<16x128xi32>
    %3 = arith.cmpi eq, %1, %2 : vector<16x128xi32>
    %4 = arith.extui %3 : vector<16x128xi1> to vector<16x128xi32>
    %5 = arith.sitofp %4 : vector<16x128xi32> to vector<16x128xf32>
    %c0_1 = arith.constant 0 : index
    %c0_2 = arith.constant 0 : index
    %6 = vector.load %arg2[%c0_1, %c0_2] : memref<128x64xf32, #tpu.memory_space<vmem>>, vector<128x64xf32>
    %cst = arith.constant dense<0.000000e+00> : vector<16x64xf32>
    %7 = tpu.matmul %5, %6, %cst {dimension_numbers = #tpu.dot_dimension_numbers<[1], [0], [0], [1], [0, 0, 1, 1], [], []>} : vector<16x128xf32>, vector<128x64xf32>, vector<16x64xf32> -> vector<16x64xf32>
    %c2 = arith.constant 2 : index
    %c0_3 = arith.constant 0 : index
    %8 = vector.load %arg4[%c2, %c0_3] : memref<35x192xf32, #tpu.memory_space<vmem>>, vector<8x64xf32>
    %9 = vector.shape_cast %7 : vector<16x64xf32> to vector<2x8x64xf32>
    %10 = vector.shape_cast %8 : vector<8x64xf32> to vector<1x8x64xf32>
    %11 = vector.broadcast %10 : vector<1x8x64xf32> to vector<2x8x64xf32>
    %12 = arith.addf %9, %11 : vector<2x8x64xf32>
    %13 = vector.shape_cast %12 : vector<2x8x64xf32> to vector<16x64xf32>
    %c0_4 = arith.constant 0 : index
    %c0_5 = arith.constant 0 : index
    %14 = vector.load %arg4[%c0_4, %c0_5] : memref<35x192xf32, #tpu.memory_space<vmem>>, vector<1x64xf32>
    %c1 = arith.constant 1 : index
    %c0_6 = arith.constant 0 : index
    %15 = vector.load %arg4[%c1, %c0_6] : memref<35x192xf32, #tpu.memory_space<vmem>>, vector<1x64xf32>
    %cst_7 = arith.constant dense<0.000000e+00> : vector<16xf32>
    %16 = vector.multi_reduction <add>, %13, %cst_7 [1] : vector<16x64xf32> to vector<16xf32>
    %17 = vector.shape_cast %16 : vector<16xf32> to vector<16x1xf32>
    %cst_8 = arith.constant 6.400000e+01 : f32
    %18 = vector.broadcast %cst_8 : f32 to vector<16x1xf32>
    %19 = arith.divf %17, %18 : vector<16x1xf32>
    %20 = vector.broadcast %19 : vector<16x1xf32> to vector<16x64xf32>
    %21 = arith.subf %13, %20 : vector<16x64xf32>
    %22 = arith.mulf %21, %21 : vector<16x64xf32>
    %cst_9 = arith.constant dense<0.000000e+00> : vector<16xf32>
    %23 = vector.multi_reduction <add>, %22, %cst_9 [1] : vector<16x64xf32> to vector<16xf32>
    %24 = vector.shape_cast %23 : vector<16xf32> to vector<16x1xf32>
    %cst_10 = arith.constant 6.400000e+01 : f32
    %25 = vector.broadcast %cst_10 : f32 to vector<16x1xf32>
    %26 = arith.divf %24, %25 : vector<16x1xf32>
    %27 = vector.broadcast %19 : vector<16x1xf32> to vector<16x64xf32>
    %28 = arith.subf %13, %27 : vector<16x64xf32>
    %cst_11 = arith.constant 9.99999996E-13 : f32
    %29 = vector.broadcast %cst_11 : f32 to vector<16x1xf32>
    %30 = arith.addf %26, %29 : vector<16x1xf32>
    %31 = math.rsqrt %30 : vector<16x1xf32>
    %32 = vector.broadcast %31 : vector<16x1xf32> to vector<16x64xf32>
    %33 = arith.mulf %28, %32 : vector<16x64xf32>
    %34 = vector.broadcast %14 : vector<1x64xf32> to vector<16x64xf32>
    %35 = arith.mulf %33, %34 : vector<16x64xf32>
    %36 = vector.broadcast %15 : vector<1x64xf32> to vector<16x64xf32>
    %37 = arith.addf %35, %36 : vector<16x64xf32>
    %c0_12 = arith.constant 0 : index
    %c0_13 = arith.constant 0 : index
    %38 = vector.load %arg1[%c0_12, %c0_13] : memref<2x8xf32, #tpu.memory_space<vmem>>, vector<2x8xf32>
    %cst_14 = arith.constant 1.000000e+00 : f32
    %39 = vector.broadcast %cst_14 : f32 to vector<2x8xf32>
    %40 = arith.subf %39, %38 : vector<2x8xf32>
    %cst_15 = arith.constant -1.000000e+09 : f32
    %41 = vector.broadcast %cst_15 : f32 to vector<2x8xf32>
    %42 = arith.mulf %40, %41 : vector<2x8xf32>
    %43 = vector.shape_cast %42 : vector<2x8xf32> to vector<2x1x8xf32>
    %44 = arith.truncf %37 : vector<16x64xf32> to vector<16x64xbf16>
    %c0_16 = arith.constant 0 : index
    %c0_17 = arith.constant 0 : index
    %45 = vector.load %arg3[%c0_16, %c0_17] : memref<864x192xbf16, #tpu.memory_space<vmem>>, vector<64x192xbf16>
    %cst_18 = arith.constant dense<0.000000e+00> : vector<16x192xf32>
    %46 = tpu.matmul %44, %45, %cst_18 {dimension_numbers = #tpu.dot_dimension_numbers<[1], [0], [0], [1], [0, 0, 1, 1], [], []>} : vector<16x64xbf16>, vector<64x192xbf16>, vector<16x192xf32> -> vector<16x192xf32>
    %c10 = arith.constant 10 : index
    %c0_19 = arith.constant 0 : index
    %47 = vector.load %arg4[%c10, %c0_19] : memref<35x192xf32, #tpu.memory_space<vmem>>, vector<1x192xf32>
    %48 = vector.broadcast %47 : vector<1x192xf32> to vector<16x192xf32>
    %49 = arith.addf %46, %48 : vector<16x192xf32>
    %c64 = arith.constant 64 : index
    %c0_20 = arith.constant 0 : index
    %50 = vector.load %arg3[%c64, %c0_20] : memref<864x192xbf16, #tpu.memory_space<vmem>>, vector<64x64xbf16>
    %cst_21 = arith.constant 0.000000e+00 : f32
    %51 = vector.broadcast %cst_21 : f32 to vector<16x64xf32>
    %52 = vector.extract_strided_slice %49 {offsets = [0, 0], sizes = [16, 16], strides = [1, 1]} : vector<16x192xf32> to vector<16x16xf32>
    %53 = vector.shape_cast %52 : vector<16x16xf32> to vector<2x8x16xf32>
    %54 = arith.truncf %53 : vector<2x8x16xf32> to vector<2x8x16xbf16>
    %55 = vector.extract_strided_slice %49 {offsets = [0, 64], sizes = [16, 16], strides = [1, 1]} : vector<16x192xf32> to vector<16x16xf32>
    %56 = vector.shape_cast %55 : vector<16x16xf32> to vector<2x8x16xf32>
    %57 = arith.truncf %56 : vector<2x8x16xf32> to vector<2x8x16xbf16>
    %58 = vector.extract_strided_slice %49 {offsets = [0, 128], sizes = [16, 16], strides = [1, 1]} : vector<16x192xf32> to vector<16x16xf32>
    %59 = vector.shape_cast %58 : vector<16x16xf32> to vector<2x8x16xf32>
    %60 = arith.truncf %59 : vector<2x8x16xf32> to vector<2x8x16xbf16>
    "tpu.trace_start"() <{level = 10 : i32, message = "bqd,bkd->bqk"}> : () -> ()
    %cst_22 = arith.constant dense<0.000000e+00> : vector<2x8x8xf32>
    %61 = tpu.matmul %54, %57, %cst_22 {dimension_numbers = #tpu.dot_dimension_numbers<[2], [2], [1], [1], [0, 0, 0, 1, 1, 1], [0], [0]>} : vector<2x8x16xbf16>, vector<2x8x16xbf16>, vector<2x8x8xf32> -> vector<2x8x8xf32>
    "tpu.trace_stop"() : () -> ()
    %62 = vector.broadcast %43 : vector<2x1x8xf32> to vector<2x8x8xf32>
    %63 = arith.addf %61, %62 : vector<2x8x8xf32>
    %cst_23 = arith.constant dense<0xFF800000> : vector<2x8xf32>
    %64 = vector.multi_reduction <maximumf>, %63, %cst_23 [2] : vector<2x8x8xf32> to vector<2x8xf32>
    %65 = vector.shape_cast %64 : vector<2x8xf32> to vector<2x8x1xf32>
    %66 = vector.broadcast %65 : vector<2x8x1xf32> to vector<2x8x8xf32>
    %67 = arith.subf %63, %66 : vector<2x8x8xf32>
    %68 = math.exp %67 : vector<2x8x8xf32>
    %cst_24 = arith.constant dense<0.000000e+00> : vector<2x8xf32>
    %69 = vector.multi_reduction <add>, %68, %cst_24 [2] : vector<2x8x8xf32> to vector<2x8xf32>
    %70 = vector.shape_cast %69 : vector<2x8xf32> to vector<2x8x1xf32>
    %71 = tpu.reciprocal %70 {approx = true} : vector<2x8x1xf32> -> vector<2x8x1xf32>
    %72 = vector.broadcast %71 : vector<2x8x1xf32> to vector<2x8x8xf32>
    %73 = arith.mulf %68, %72 : vector<2x8x8xf32>
    %74 = arith.truncf %73 : vector<2x8x8xf32> to vector<2x8x8xbf16>
    "tpu.trace_start"() <{level = 10 : i32, message = "bqk,bkd->bqd"}> : () -> ()
    %cst_25 = arith.constant dense<0.000000e+00> : vector<2x8x16xf32>
    %75 = tpu.matmul %74, %60, %cst_25 {dimension_numbers = #tpu.dot_dimension_numbers<[2], [1], [1], [2], [0, 0, 0, 1, 1, 2], [0], [0]>} : vector<2x8x8xbf16>, vector<2x8x16xbf16>, vector<2x8x16xf32> -> vector<2x8x16xf32>
    "tpu.trace_stop"() : () -> ()
    %76 = vector.shape_cast %75 : vector<2x8x16xf32> to vector<16x16xf32>
    %77 = arith.truncf %76 : vector<16x16xf32> to vector<16x16xbf16>
    %78 = vector.extract_strided_slice %50 {offsets = [0, 0], sizes = [16, 64], strides = [1, 1]} : vector<64x64xbf16> to vector<16x64xbf16>
    %cst_26 = arith.constant dense<0.000000e+00> : vector<16x64xf32>
    %79 = tpu.matmul %77, %78, %cst_26 {dimension_numbers = #tpu.dot_dimension_numbers<[1], [0], [0], [1], [0, 0, 1, 1], [], []>} : vector<16x16xbf16>, vector<16x64xbf16>, vector<16x64xf32> -> vector<16x64xf32>
    %80 = arith.addf %51, %79 : vector<16x64xf32>
    %81 = vector.extract_strided_slice %49 {offsets = [0, 16], sizes = [16, 16], strides = [1, 1]} : vector<16x192xf32> to vector<16x16xf32>
    %82 = vector.shape_cast %81 : vector<16x16xf32> to vector<2x8x16xf32>
    %83 = arith.truncf %82 : vector<2x8x16xf32> to vector<2x8x16xbf16>
    %84 = vector.extract_strided_slice %49 {offsets = [0, 80], sizes = [16, 16], strides = [1, 1]} : vector<16x192xf32> to vector<16x16xf32>
    %85 = vector.shape_cast %84 : vector<16x16xf32> to vector<2x8x16xf32>
    %86 = arith.truncf %85 : vector<2x8x16xf32> to vector<2x8x16xbf16>
    %87 = vector.extract_strided_slice %49 {offsets = [0, 144], sizes = [16, 16], strides = [1, 1]} : vector<16x192xf32> to vector<16x16xf32>
    %88 = vector.shape_cast %87 : vector<16x16xf32> to vector<2x8x16xf32>
    %89 = arith.truncf %88 : vector<2x8x16xf32> to vector<2x8x16xbf16>
    "tpu.trace_start"() <{level = 10 : i32, message = "bqd,bkd->bqk"}> : () -> ()
    %cst_27 = arith.constant dense<0.000000e+00> : vector<2x8x8xf32>
    %90 = tpu.matmul %83, %86, %cst_27 {dimension_numbers = #tpu.dot_dimension_numbers<[2], [2], [1], [1], [0, 0, 0, 1, 1, 1], [0], [0]>} : vector<2x8x16xbf16>, vector<2x8x16xbf16>, vector<2x8x8xf32> -> vector<2x8x8xf32>
    "tpu.trace_stop"() : () -> ()
    %91 = vector.broadcast %43 : vector<2x1x8xf32> to vector<2x8x8xf32>
    %92 = arith.addf %90, %91 : vector<2x8x8xf32>
    %cst_28 = arith.constant dense<0xFF800000> : vector<2x8xf32>
    %93 = vector.multi_reduction <maximumf>, %92, %cst_28 [2] : vector<2x8x8xf32> to vector<2x8xf32>
    %94 = vector.shape_cast %93 : vector<2x8xf32> to vector<2x8x1xf32>
    %95 = vector.broadcast %94 : vector<2x8x1xf32> to vector<2x8x8xf32>
    %96 = arith.subf %92, %95 : vector<2x8x8xf32>
    %97 = math.exp %96 : vector<2x8x8xf32>
    %cst_29 = arith.constant dense<0.000000e+00> : vector<2x8xf32>
    %98 = vector.multi_reduction <add>, %97, %cst_29 [2] : vector<2x8x8xf32> to vector<2x8xf32>
    %99 = vector.shape_cast %98 : vector<2x8xf32> to vector<2x8x1xf32>
    %100 = tpu.reciprocal %99 {approx = true} : vector<2x8x1xf32> -> vector<2x8x1xf32>
    %101 = vector.broadcast %100 : vector<2x8x1xf32> to vector<2x8x8xf32>
    %102 = arith.mulf %97, %101 : vector<2x8x8xf32>
    %103 = arith.truncf %102 : vector<2x8x8xf32> to vector<2x8x8xbf16>
    "tpu.trace_start"() <{level = 10 : i32, message = "bqk,bkd->bqd"}> : () -> ()
    %cst_30 = arith.constant dense<0.000000e+00> : vector<2x8x16xf32>
    %104 = tpu.matmul %103, %89, %cst_30 {dimension_numbers = #tpu.dot_dimension_numbers<[2], [1], [1], [2], [0, 0, 0, 1, 1, 2], [0], [0]>} : vector<2x8x8xbf16>, vector<2x8x16xbf16>, vector<2x8x16xf32> -> vector<2x8x16xf32>
    "tpu.trace_stop"() : () -> ()
    %105 = vector.shape_cast %104 : vector<2x8x16xf32> to vector<16x16xf32>
    %106 = arith.truncf %105 : vector<16x16xf32> to vector<16x16xbf16>
    %107 = vector.extract_strided_slice %50 {offsets = [16, 0], sizes = [16, 64], strides = [1, 1]} : vector<64x64xbf16> to vector<16x64xbf16>
    %cst_31 = arith.constant dense<0.000000e+00> : vector<16x64xf32>
    %108 = tpu.matmul %106, %107, %cst_31 {dimension_numbers = #tpu.dot_dimension_numbers<[1], [0], [0], [1], [0, 0, 1, 1], [], []>} : vector<16x16xbf16>, vector<16x64xbf16>, vector<16x64xf32> -> vector<16x64xf32>
    %109 = arith.addf %80, %108 : vector<16x64xf32>
    %110 = vector.extract_strided_slice %49 {offsets = [0, 32], sizes = [16, 16], strides = [1, 1]} : vector<16x192xf32> to vector<16x16xf32>
    %111 = vector.shape_cast %110 : vector<16x16xf32> to vector<2x8x16xf32>
    %112 = arith.truncf %111 : vector<2x8x16xf32> to vector<2x8x16xbf16>
    %113 = vector.extract_strided_slice %49 {offsets = [0, 96], sizes = [16, 16], strides = [1, 1]} : vector<16x192xf32> to vector<16x16xf32>
    %114 = vector.shape_cast %113 : vector<16x16xf32> to vector<2x8x16xf32>
    %115 = arith.truncf %114 : vector<2x8x16xf32> to vector<2x8x16xbf16>
    %116 = vector.extract_strided_slice %49 {offsets = [0, 160], sizes = [16, 16], strides = [1, 1]} : vector<16x192xf32> to vector<16x16xf32>
    %117 = vector.shape_cast %116 : vector<16x16xf32> to vector<2x8x16xf32>
    %118 = arith.truncf %117 : vector<2x8x16xf32> to vector<2x8x16xbf16>
    "tpu.trace_start"() <{level = 10 : i32, message = "bqd,bkd->bqk"}> : () -> ()
    %cst_32 = arith.constant dense<0.000000e+00> : vector<2x8x8xf32>
    %119 = tpu.matmul %112, %115, %cst_32 {dimension_numbers = #tpu.dot_dimension_numbers<[2], [2], [1], [1], [0, 0, 0, 1, 1, 1], [0], [0]>} : vector<2x8x16xbf16>, vector<2x8x16xbf16>, vector<2x8x8xf32> -> vector<2x8x8xf32>
    "tpu.trace_stop"() : () -> ()
    %120 = vector.broadcast %43 : vector<2x1x8xf32> to vector<2x8x8xf32>
    %121 = arith.addf %119, %120 : vector<2x8x8xf32>
    %cst_33 = arith.constant dense<0xFF800000> : vector<2x8xf32>
    %122 = vector.multi_reduction <maximumf>, %121, %cst_33 [2] : vector<2x8x8xf32> to vector<2x8xf32>
    %123 = vector.shape_cast %122 : vector<2x8xf32> to vector<2x8x1xf32>
    %124 = vector.broadcast %123 : vector<2x8x1xf32> to vector<2x8x8xf32>
    %125 = arith.subf %121, %124 : vector<2x8x8xf32>
    %126 = math.exp %125 : vector<2x8x8xf32>
    %cst_34 = arith.constant dense<0.000000e+00> : vector<2x8xf32>
    %127 = vector.multi_reduction <add>, %126, %cst_34 [2] : vector<2x8x8xf32> to vector<2x8xf32>
    %128 = vector.shape_cast %127 : vector<2x8xf32> to vector<2x8x1xf32>
    %129 = tpu.reciprocal %128 {approx = true} : vector<2x8x1xf32> -> vector<2x8x1xf32>
    %130 = vector.broadcast %129 : vector<2x8x1xf32> to vector<2x8x8xf32>
    %131 = arith.mulf %126, %130 : vector<2x8x8xf32>
    %132 = arith.truncf %131 : vector<2x8x8xf32> to vector<2x8x8xbf16>
    "tpu.trace_start"() <{level = 10 : i32, message = "bqk,bkd->bqd"}> : () -> ()
    %cst_35 = arith.constant dense<0.000000e+00> : vector<2x8x16xf32>
    %133 = tpu.matmul %132, %118, %cst_35 {dimension_numbers = #tpu.dot_dimension_numbers<[2], [1], [1], [2], [0, 0, 0, 1, 1, 2], [0], [0]>} : vector<2x8x8xbf16>, vector<2x8x16xbf16>, vector<2x8x16xf32> -> vector<2x8x16xf32>
    "tpu.trace_stop"() : () -> ()
    %134 = vector.shape_cast %133 : vector<2x8x16xf32> to vector<16x16xf32>
    %135 = arith.truncf %134 : vector<16x16xf32> to vector<16x16xbf16>
    %136 = vector.extract_strided_slice %50 {offsets = [32, 0], sizes = [16, 64], strides = [1, 1]} : vector<64x64xbf16> to vector<16x64xbf16>
    %cst_36 = arith.constant dense<0.000000e+00> : vector<16x64xf32>
    %137 = tpu.matmul %135, %136, %cst_36 {dimension_numbers = #tpu.dot_dimension_numbers<[1], [0], [0], [1], [0, 0, 1, 1], [], []>} : vector<16x16xbf16>, vector<16x64xbf16>, vector<16x64xf32> -> vector<16x64xf32>
    %138 = arith.addf %109, %137 : vector<16x64xf32>
    %139 = vector.extract_strided_slice %49 {offsets = [0, 48], sizes = [16, 16], strides = [1, 1]} : vector<16x192xf32> to vector<16x16xf32>
    %140 = vector.shape_cast %139 : vector<16x16xf32> to vector<2x8x16xf32>
    %141 = arith.truncf %140 : vector<2x8x16xf32> to vector<2x8x16xbf16>
    %142 = vector.extract_strided_slice %49 {offsets = [0, 112], sizes = [16, 16], strides = [1, 1]} : vector<16x192xf32> to vector<16x16xf32>
    %143 = vector.shape_cast %142 : vector<16x16xf32> to vector<2x8x16xf32>
    %144 = arith.truncf %143 : vector<2x8x16xf32> to vector<2x8x16xbf16>
    %145 = vector.extract_strided_slice %49 {offsets = [0, 176], sizes = [16, 16], strides = [1, 1]} : vector<16x192xf32> to vector<16x16xf32>
    %146 = vector.shape_cast %145 : vector<16x16xf32> to vector<2x8x16xf32>
    %147 = arith.truncf %146 : vector<2x8x16xf32> to vector<2x8x16xbf16>
    "tpu.trace_start"() <{level = 10 : i32, message = "bqd,bkd->bqk"}> : () -> ()
    %cst_37 = arith.constant dense<0.000000e+00> : vector<2x8x8xf32>
    %148 = tpu.matmul %141, %144, %cst_37 {dimension_numbers = #tpu.dot_dimension_numbers<[2], [2], [1], [1], [0, 0, 0, 1, 1, 1], [0], [0]>} : vector<2x8x16xbf16>, vector<2x8x16xbf16>, vector<2x8x8xf32> -> vector<2x8x8xf32>
    "tpu.trace_stop"() : () -> ()
    %149 = vector.broadcast %43 : vector<2x1x8xf32> to vector<2x8x8xf32>
    %150 = arith.addf %148, %149 : vector<2x8x8xf32>
    %cst_38 = arith.constant dense<0xFF800000> : vector<2x8xf32>
    %151 = vector.multi_reduction <maximumf>, %150, %cst_38 [2] : vector<2x8x8xf32> to vector<2x8xf32>
    %152 = vector.shape_cast %151 : vector<2x8xf32> to vector<2x8x1xf32>
    %153 = vector.broadcast %152 : vector<2x8x1xf32> to vector<2x8x8xf32>
    %154 = arith.subf %150, %153 : vector<2x8x8xf32>
    %155 = math.exp %154 : vector<2x8x8xf32>
    %cst_39 = arith.constant dense<0.000000e+00> : vector<2x8xf32>
    %156 = vector.multi_reduction <add>, %155, %cst_39 [2] : vector<2x8x8xf32> to vector<2x8xf32>
    %157 = vector.shape_cast %156 : vector<2x8xf32> to vector<2x8x1xf32>
    %158 = tpu.reciprocal %157 {approx = true} : vector<2x8x1xf32> -> vector<2x8x1xf32>
    %159 = vector.broadcast %158 : vector<2x8x1xf32> to vector<2x8x8xf32>
    %160 = arith.mulf %155, %159 : vector<2x8x8xf32>
    %161 = arith.truncf %160 : vector<2x8x8xf32> to vector<2x8x8xbf16>
    "tpu.trace_start"() <{level = 10 : i32, message = "bqk,bkd->bqd"}> : () -> ()
    %cst_40 = arith.constant dense<0.000000e+00> : vector<2x8x16xf32>
    %162 = tpu.matmul %161, %147, %cst_40 {dimension_numbers = #tpu.dot_dimension_numbers<[2], [1], [1], [2], [0, 0, 0, 1, 1, 2], [0], [0]>} : vector<2x8x8xbf16>, vector<2x8x16xbf16>, vector<2x8x16xf32> -> vector<2x8x16xf32>
    "tpu.trace_stop"() : () -> ()
    %163 = vector.shape_cast %162 : vector<2x8x16xf32> to vector<16x16xf32>
    %164 = arith.truncf %163 : vector<16x16xf32> to vector<16x16xbf16>
    %165 = vector.extract_strided_slice %50 {offsets = [48, 0], sizes = [16, 64], strides = [1, 1]} : vector<64x64xbf16> to vector<16x64xbf16>
    %cst_41 = arith.constant dense<0.000000e+00> : vector<16x64xf32>
    %166 = tpu.matmul %164, %165, %cst_41 {dimension_numbers = #tpu.dot_dimension_numbers<[1], [0], [0], [1], [0, 0, 1, 1], [], []>} : vector<16x16xbf16>, vector<16x64xbf16>, vector<16x64xf32> -> vector<16x64xf32>
    %167 = arith.addf %138, %166 : vector<16x64xf32>
    %c11 = arith.constant 11 : index
    %c0_42 = arith.constant 0 : index
    %168 = vector.load %arg4[%c11, %c0_42] : memref<35x192xf32, #tpu.memory_space<vmem>>, vector<1x64xf32>
    %169 = vector.broadcast %168 : vector<1x64xf32> to vector<16x64xf32>
    %170 = arith.addf %167, %169 : vector<16x64xf32>
    %171 = arith.addf %37, %170 : vector<16x64xf32>
    %c12 = arith.constant 12 : index
    %c0_43 = arith.constant 0 : index
    %172 = vector.load %arg4[%c12, %c0_43] : memref<35x192xf32, #tpu.memory_space<vmem>>, vector<1x64xf32>
    %c13 = arith.constant 13 : index
    %c0_44 = arith.constant 0 : index
    %173 = vector.load %arg4[%c13, %c0_44] : memref<35x192xf32, #tpu.memory_space<vmem>>, vector<1x64xf32>
    %cst_45 = arith.constant dense<0.000000e+00> : vector<16xf32>
    %174 = vector.multi_reduction <add>, %171, %cst_45 [1] : vector<16x64xf32> to vector<16xf32>
    %175 = vector.shape_cast %174 : vector<16xf32> to vector<16x1xf32>
    %cst_46 = arith.constant 6.400000e+01 : f32
    %176 = vector.broadcast %cst_46 : f32 to vector<16x1xf32>
    %177 = arith.divf %175, %176 : vector<16x1xf32>
    %178 = vector.broadcast %177 : vector<16x1xf32> to vector<16x64xf32>
    %179 = arith.subf %171, %178 : vector<16x64xf32>
    %180 = arith.mulf %179, %179 : vector<16x64xf32>
    %cst_47 = arith.constant dense<0.000000e+00> : vector<16xf32>
    %181 = vector.multi_reduction <add>, %180, %cst_47 [1] : vector<16x64xf32> to vector<16xf32>
    %182 = vector.shape_cast %181 : vector<16xf32> to vector<16x1xf32>
    %cst_48 = arith.constant 6.400000e+01 : f32
    %183 = vector.broadcast %cst_48 : f32 to vector<16x1xf32>
    %184 = arith.divf %182, %183 : vector<16x1xf32>
    %185 = vector.broadcast %177 : vector<16x1xf32> to vector<16x64xf32>
    %186 = arith.subf %171, %185 : vector<16x64xf32>
    %cst_49 = arith.constant 9.99999996E-13 : f32
    %187 = vector.broadcast %cst_49 : f32 to vector<16x1xf32>
    %188 = arith.addf %184, %187 : vector<16x1xf32>
    %189 = math.rsqrt %188 : vector<16x1xf32>
    %190 = vector.broadcast %189 : vector<16x1xf32> to vector<16x64xf32>
    %191 = arith.mulf %186, %190 : vector<16x64xf32>
    %192 = vector.broadcast %172 : vector<1x64xf32> to vector<16x64xf32>
    %193 = arith.mulf %191, %192 : vector<16x64xf32>
    %194 = vector.broadcast %173 : vector<1x64xf32> to vector<16x64xf32>
    %195 = arith.addf %193, %194 : vector<16x64xf32>
    %196 = arith.truncf %195 : vector<16x64xf32> to vector<16x64xbf16>
    %c128 = arith.constant 128 : index
    %c0_50 = arith.constant 0 : index
    %197 = vector.load %arg3[%c128, %c0_50] : memref<864x192xbf16, #tpu.memory_space<vmem>>, vector<64x128xbf16>
    %cst_51 = arith.constant dense<0.000000e+00> : vector<16x128xf32>
    %198 = tpu.matmul %196, %197, %cst_51 {dimension_numbers = #tpu.dot_dimension_numbers<[1], [0], [0], [1], [0, 0, 1, 1], [], []>} : vector<16x64xbf16>, vector<64x128xbf16>, vector<16x128xf32> -> vector<16x128xf32>
    %c14 = arith.constant 14 : index
    %c0_52 = arith.constant 0 : index
    %199 = vector.load %arg4[%c14, %c0_52] : memref<35x192xf32, #tpu.memory_space<vmem>>, vector<1x128xf32>
    %200 = vector.broadcast %199 : vector<1x128xf32> to vector<16x128xf32>
    %201 = arith.addf %198, %200 : vector<16x128xf32>
    %202 = arith.mulf %201, %201 : vector<16x128xf32>
    %203 = arith.mulf %201, %202 : vector<16x128xf32>
    %cst_53 = arith.constant 4.471500e-02 : f32
    %204 = vector.broadcast %cst_53 : f32 to vector<16x128xf32>
    %205 = arith.mulf %204, %203 : vector<16x128xf32>
    %206 = arith.addf %201, %205 : vector<16x128xf32>
    %cst_54 = arith.constant 0.797884583 : f32
    %207 = vector.broadcast %cst_54 : f32 to vector<16x128xf32>
    %208 = arith.mulf %207, %206 : vector<16x128xf32>
    %209 = math.tanh %208 : vector<16x128xf32>
    %cst_55 = arith.constant 1.000000e+00 : f32
    %210 = vector.broadcast %cst_55 : f32 to vector<16x128xf32>
    %211 = arith.addf %210, %209 : vector<16x128xf32>
    %cst_56 = arith.constant 5.000000e-01 : f32
    %212 = vector.broadcast %cst_56 : f32 to vector<16x128xf32>
    %213 = arith.mulf %212, %211 : vector<16x128xf32>
    %214 = arith.mulf %201, %213 : vector<16x128xf32>
    %215 = arith.truncf %214 : vector<16x128xf32> to vector<16x128xbf16>
    %c192 = arith.constant 192 : index
    %c0_57 = arith.constant 0 : index
    %216 = vector.load %arg3[%c192, %c0_57] : memref<864x192xbf16, #tpu.memory_space<vmem>>, vector<128x64xbf16>
    %cst_58 = arith.constant dense<0.000000e+00> : vector<16x64xf32>
    %217 = tpu.matmul %215, %216, %cst_58 {dimension_numbers = #tpu.dot_dimension_numbers<[1], [0], [0], [1], [0, 0, 1, 1], [], []>} : vector<16x128xbf16>, vector<128x64xbf16>, vector<16x64xf32> -> vector<16x64xf32>
    %c15 = arith.constant 15 : index
    %c0_59 = arith.constant 0 : index
    %218 = vector.load %arg4[%c15, %c0_59] : memref<35x192xf32, #tpu.memory_space<vmem>>, vector<1x64xf32>
    %219 = vector.broadcast %218 : vector<1x64xf32> to vector<16x64xf32>
    %220 = arith.addf %217, %219 : vector<16x64xf32>
    %221 = arith.addf %195, %220 : vector<16x64xf32>
    %c16 = arith.constant 16 : index
    %c0_60 = arith.constant 0 : index
    %222 = vector.load %arg4[%c16, %c0_60] : memref<35x192xf32, #tpu.memory_space<vmem>>, vector<1x64xf32>
    %c17 = arith.constant 17 : index
    %c0_61 = arith.constant 0 : index
    %223 = vector.load %arg4[%c17, %c0_61] : memref<35x192xf32, #tpu.memory_space<vmem>>, vector<1x64xf32>
    %cst_62 = arith.constant dense<0.000000e+00> : vector<16xf32>
    %224 = vector.multi_reduction <add>, %221, %cst_62 [1] : vector<16x64xf32> to vector<16xf32>
    %225 = vector.shape_cast %224 : vector<16xf32> to vector<16x1xf32>
    %cst_63 = arith.constant 6.400000e+01 : f32
    %226 = vector.broadcast %cst_63 : f32 to vector<16x1xf32>
    %227 = arith.divf %225, %226 : vector<16x1xf32>
    %228 = vector.broadcast %227 : vector<16x1xf32> to vector<16x64xf32>
    %229 = arith.subf %221, %228 : vector<16x64xf32>
    %230 = arith.mulf %229, %229 : vector<16x64xf32>
    %cst_64 = arith.constant dense<0.000000e+00> : vector<16xf32>
    %231 = vector.multi_reduction <add>, %230, %cst_64 [1] : vector<16x64xf32> to vector<16xf32>
    %232 = vector.shape_cast %231 : vector<16xf32> to vector<16x1xf32>
    %cst_65 = arith.constant 6.400000e+01 : f32
    %233 = vector.broadcast %cst_65 : f32 to vector<16x1xf32>
    %234 = arith.divf %232, %233 : vector<16x1xf32>
    %235 = vector.broadcast %227 : vector<16x1xf32> to vector<16x64xf32>
    %236 = arith.subf %221, %235 : vector<16x64xf32>
    %cst_66 = arith.constant 9.99999996E-13 : f32
    %237 = vector.broadcast %cst_66 : f32 to vector<16x1xf32>
    %238 = arith.addf %234, %237 : vector<16x1xf32>
    %239 = math.rsqrt %238 : vector<16x1xf32>
    %240 = vector.broadcast %239 : vector<16x1xf32> to vector<16x64xf32>
    %241 = arith.mulf %236, %240 : vector<16x64xf32>
    %242 = vector.broadcast %222 : vector<1x64xf32> to vector<16x64xf32>
    %243 = arith.mulf %241, %242 : vector<16x64xf32>
    %244 = vector.broadcast %223 : vector<1x64xf32> to vector<16x64xf32>
    %245 = arith.addf %243, %244 : vector<16x64xf32>
    %246 = arith.truncf %245 : vector<16x64xf32> to vector<16x64xbf16>
    %c320 = arith.constant 320 : index
    %c0_67 = arith.constant 0 : index
    %247 = vector.load %arg3[%c320, %c0_67] : memref<864x192xbf16, #tpu.memory_space<vmem>>, vector<64x192xbf16>
    %cst_68 = arith.constant dense<0.000000e+00> : vector<16x192xf32>
    %248 = tpu.matmul %246, %247, %cst_68 {dimension_numbers = #tpu.dot_dimension_numbers<[1], [0], [0], [1], [0, 0, 1, 1], [], []>} : vector<16x64xbf16>, vector<64x192xbf16>, vector<16x192xf32> -> vector<16x192xf32>
    %c18 = arith.constant 18 : index
    %c0_69 = arith.constant 0 : index
    %249 = vector.load %arg4[%c18, %c0_69] : memref<35x192xf32, #tpu.memory_space<vmem>>, vector<1x192xf32>
    %250 = vector.broadcast %249 : vector<1x192xf32> to vector<16x192xf32>
    %251 = arith.addf %248, %250 : vector<16x192xf32>
    %c384 = arith.constant 384 : index
    %c0_70 = arith.constant 0 : index
    %252 = vector.load %arg3[%c384, %c0_70] : memref<864x192xbf16, #tpu.memory_space<vmem>>, vector<64x64xbf16>
    %cst_71 = arith.constant 0.000000e+00 : f32
    %253 = vector.broadcast %cst_71 : f32 to vector<16x64xf32>
    %254 = vector.extract_strided_slice %251 {offsets = [0, 0], sizes = [16, 16], strides = [1, 1]} : vector<16x192xf32> to vector<16x16xf32>
    %255 = vector.shape_cast %254 : vector<16x16xf32> to vector<2x8x16xf32>
    %256 = arith.truncf %255 : vector<2x8x16xf32> to vector<2x8x16xbf16>
    %257 = vector.extract_strided_slice %251 {offsets = [0, 64], sizes = [16, 16], strides = [1, 1]} : vector<16x192xf32> to vector<16x16xf32>
    %258 = vector.shape_cast %257 : vector<16x16xf32> to vector<2x8x16xf32>
    %259 = arith.truncf %258 : vector<2x8x16xf32> to vector<2x8x16xbf16>
    %260 = vector.extract_strided_slice %251 {offsets = [0, 128], sizes = [16, 16], strides = [1, 1]} : vector<16x192xf32> to vector<16x16xf32>
    %261 = vector.shape_cast %260 : vector<16x16xf32> to vector<2x8x16xf32>
    %262 = arith.truncf %261 : vector<2x8x16xf32> to vector<2x8x16xbf16>
    "tpu.trace_start"() <{level = 10 : i32, message = "bqd,bkd->bqk"}> : () -> ()
    %cst_72 = arith.constant dense<0.000000e+00> : vector<2x8x8xf32>
    %263 = tpu.matmul %256, %259, %cst_72 {dimension_numbers = #tpu.dot_dimension_numbers<[2], [2], [1], [1], [0, 0, 0, 1, 1, 1], [0], [0]>} : vector<2x8x16xbf16>, vector<2x8x16xbf16>, vector<2x8x8xf32> -> vector<2x8x8xf32>
    "tpu.trace_stop"() : () -> ()
    %264 = vector.broadcast %43 : vector<2x1x8xf32> to vector<2x8x8xf32>
    %265 = arith.addf %263, %264 : vector<2x8x8xf32>
    %cst_73 = arith.constant dense<0xFF800000> : vector<2x8xf32>
    %266 = vector.multi_reduction <maximumf>, %265, %cst_73 [2] : vector<2x8x8xf32> to vector<2x8xf32>
    %267 = vector.shape_cast %266 : vector<2x8xf32> to vector<2x8x1xf32>
    %268 = vector.broadcast %267 : vector<2x8x1xf32> to vector<2x8x8xf32>
    %269 = arith.subf %265, %268 : vector<2x8x8xf32>
    %270 = math.exp %269 : vector<2x8x8xf32>
    %cst_74 = arith.constant dense<0.000000e+00> : vector<2x8xf32>
    %271 = vector.multi_reduction <add>, %270, %cst_74 [2] : vector<2x8x8xf32> to vector<2x8xf32>
    %272 = vector.shape_cast %271 : vector<2x8xf32> to vector<2x8x1xf32>
    %273 = tpu.reciprocal %272 {approx = true} : vector<2x8x1xf32> -> vector<2x8x1xf32>
    %274 = vector.broadcast %273 : vector<2x8x1xf32> to vector<2x8x8xf32>
    %275 = arith.mulf %270, %274 : vector<2x8x8xf32>
    %276 = arith.truncf %275 : vector<2x8x8xf32> to vector<2x8x8xbf16>
    "tpu.trace_start"() <{level = 10 : i32, message = "bqk,bkd->bqd"}> : () -> ()
    %cst_75 = arith.constant dense<0.000000e+00> : vector<2x8x16xf32>
    %277 = tpu.matmul %276, %262, %cst_75 {dimension_numbers = #tpu.dot_dimension_numbers<[2], [1], [1], [2], [0, 0, 0, 1, 1, 2], [0], [0]>} : vector<2x8x8xbf16>, vector<2x8x16xbf16>, vector<2x8x16xf32> -> vector<2x8x16xf32>
    "tpu.trace_stop"() : () -> ()
    %278 = vector.shape_cast %277 : vector<2x8x16xf32> to vector<16x16xf32>
    %279 = arith.truncf %278 : vector<16x16xf32> to vector<16x16xbf16>
    %280 = vector.extract_strided_slice %252 {offsets = [0, 0], sizes = [16, 64], strides = [1, 1]} : vector<64x64xbf16> to vector<16x64xbf16>
    %cst_76 = arith.constant dense<0.000000e+00> : vector<16x64xf32>
    %281 = tpu.matmul %279, %280, %cst_76 {dimension_numbers = #tpu.dot_dimension_numbers<[1], [0], [0], [1], [0, 0, 1, 1], [], []>} : vector<16x16xbf16>, vector<16x64xbf16>, vector<16x64xf32> -> vector<16x64xf32>
    %282 = arith.addf %253, %281 : vector<16x64xf32>
    %283 = vector.extract_strided_slice %251 {offsets = [0, 16], sizes = [16, 16], strides = [1, 1]} : vector<16x192xf32> to vector<16x16xf32>
    %284 = vector.shape_cast %283 : vector<16x16xf32> to vector<2x8x16xf32>
    %285 = arith.truncf %284 : vector<2x8x16xf32> to vector<2x8x16xbf16>
    %286 = vector.extract_strided_slice %251 {offsets = [0, 80], sizes = [16, 16], strides = [1, 1]} : vector<16x192xf32> to vector<16x16xf32>
    %287 = vector.shape_cast %286 : vector<16x16xf32> to vector<2x8x16xf32>
    %288 = arith.truncf %287 : vector<2x8x16xf32> to vector<2x8x16xbf16>
    %289 = vector.extract_strided_slice %251 {offsets = [0, 144], sizes = [16, 16], strides = [1, 1]} : vector<16x192xf32> to vector<16x16xf32>
    %290 = vector.shape_cast %289 : vector<16x16xf32> to vector<2x8x16xf32>
    %291 = arith.truncf %290 : vector<2x8x16xf32> to vector<2x8x16xbf16>
    "tpu.trace_start"() <{level = 10 : i32, message = "bqd,bkd->bqk"}> : () -> ()
    %cst_77 = arith.constant dense<0.000000e+00> : vector<2x8x8xf32>
    %292 = tpu.matmul %285, %288, %cst_77 {dimension_numbers = #tpu.dot_dimension_numbers<[2], [2], [1], [1], [0, 0, 0, 1, 1, 1], [0], [0]>} : vector<2x8x16xbf16>, vector<2x8x16xbf16>, vector<2x8x8xf32> -> vector<2x8x8xf32>
    "tpu.trace_stop"() : () -> ()
    %293 = vector.broadcast %43 : vector<2x1x8xf32> to vector<2x8x8xf32>
    %294 = arith.addf %292, %293 : vector<2x8x8xf32>
    %cst_78 = arith.constant dense<0xFF800000> : vector<2x8xf32>
    %295 = vector.multi_reduction <maximumf>, %294, %cst_78 [2] : vector<2x8x8xf32> to vector<2x8xf32>
    %296 = vector.shape_cast %295 : vector<2x8xf32> to vector<2x8x1xf32>
    %297 = vector.broadcast %296 : vector<2x8x1xf32> to vector<2x8x8xf32>
    %298 = arith.subf %294, %297 : vector<2x8x8xf32>
    %299 = math.exp %298 : vector<2x8x8xf32>
    %cst_79 = arith.constant dense<0.000000e+00> : vector<2x8xf32>
    %300 = vector.multi_reduction <add>, %299, %cst_79 [2] : vector<2x8x8xf32> to vector<2x8xf32>
    %301 = vector.shape_cast %300 : vector<2x8xf32> to vector<2x8x1xf32>
    %302 = tpu.reciprocal %301 {approx = true} : vector<2x8x1xf32> -> vector<2x8x1xf32>
    %303 = vector.broadcast %302 : vector<2x8x1xf32> to vector<2x8x8xf32>
    %304 = arith.mulf %299, %303 : vector<2x8x8xf32>
    %305 = arith.truncf %304 : vector<2x8x8xf32> to vector<2x8x8xbf16>
    "tpu.trace_start"() <{level = 10 : i32, message = "bqk,bkd->bqd"}> : () -> ()
    %cst_80 = arith.constant dense<0.000000e+00> : vector<2x8x16xf32>
    %306 = tpu.matmul %305, %291, %cst_80 {dimension_numbers = #tpu.dot_dimension_numbers<[2], [1], [1], [2], [0, 0, 0, 1, 1, 2], [0], [0]>} : vector<2x8x8xbf16>, vector<2x8x16xbf16>, vector<2x8x16xf32> -> vector<2x8x16xf32>
    "tpu.trace_stop"() : () -> ()
    %307 = vector.shape_cast %306 : vector<2x8x16xf32> to vector<16x16xf32>
    %308 = arith.truncf %307 : vector<16x16xf32> to vector<16x16xbf16>
    %309 = vector.extract_strided_slice %252 {offsets = [16, 0], sizes = [16, 64], strides = [1, 1]} : vector<64x64xbf16> to vector<16x64xbf16>
    %cst_81 = arith.constant dense<0.000000e+00> : vector<16x64xf32>
    %310 = tpu.matmul %308, %309, %cst_81 {dimension_numbers = #tpu.dot_dimension_numbers<[1], [0], [0], [1], [0, 0, 1, 1], [], []>} : vector<16x16xbf16>, vector<16x64xbf16>, vector<16x64xf32> -> vector<16x64xf32>
    %311 = arith.addf %282, %310 : vector<16x64xf32>
    %312 = vector.extract_strided_slice %251 {offsets = [0, 32], sizes = [16, 16], strides = [1, 1]} : vector<16x192xf32> to vector<16x16xf32>
    %313 = vector.shape_cast %312 : vector<16x16xf32> to vector<2x8x16xf32>
    %314 = arith.truncf %313 : vector<2x8x16xf32> to vector<2x8x16xbf16>
    %315 = vector.extract_strided_slice %251 {offsets = [0, 96], sizes = [16, 16], strides = [1, 1]} : vector<16x192xf32> to vector<16x16xf32>
    %316 = vector.shape_cast %315 : vector<16x16xf32> to vector<2x8x16xf32>
    %317 = arith.truncf %316 : vector<2x8x16xf32> to vector<2x8x16xbf16>
    %318 = vector.extract_strided_slice %251 {offsets = [0, 160], sizes = [16, 16], strides = [1, 1]} : vector<16x192xf32> to vector<16x16xf32>
    %319 = vector.shape_cast %318 : vector<16x16xf32> to vector<2x8x16xf32>
    %320 = arith.truncf %319 : vector<2x8x16xf32> to vector<2x8x16xbf16>
    "tpu.trace_start"() <{level = 10 : i32, message = "bqd,bkd->bqk"}> : () -> ()
    %cst_82 = arith.constant dense<0.000000e+00> : vector<2x8x8xf32>
    %321 = tpu.matmul %314, %317, %cst_82 {dimension_numbers = #tpu.dot_dimension_numbers<[2], [2], [1], [1], [0, 0, 0, 1, 1, 1], [0], [0]>} : vector<2x8x16xbf16>, vector<2x8x16xbf16>, vector<2x8x8xf32> -> vector<2x8x8xf32>
    "tpu.trace_stop"() : () -> ()
    %322 = vector.broadcast %43 : vector<2x1x8xf32> to vector<2x8x8xf32>
    %323 = arith.addf %321, %322 : vector<2x8x8xf32>
    %cst_83 = arith.constant dense<0xFF800000> : vector<2x8xf32>
    %324 = vector.multi_reduction <maximumf>, %323, %cst_83 [2] : vector<2x8x8xf32> to vector<2x8xf32>
    %325 = vector.shape_cast %324 : vector<2x8xf32> to vector<2x8x1xf32>
    %326 = vector.broadcast %325 : vector<2x8x1xf32> to vector<2x8x8xf32>
    %327 = arith.subf %323, %326 : vector<2x8x8xf32>
    %328 = math.exp %327 : vector<2x8x8xf32>
    %cst_84 = arith.constant dense<0.000000e+00> : vector<2x8xf32>
    %329 = vector.multi_reduction <add>, %328, %cst_84 [2] : vector<2x8x8xf32> to vector<2x8xf32>
    %330 = vector.shape_cast %329 : vector<2x8xf32> to vector<2x8x1xf32>
    %331 = tpu.reciprocal %330 {approx = true} : vector<2x8x1xf32> -> vector<2x8x1xf32>
    %332 = vector.broadcast %331 : vector<2x8x1xf32> to vector<2x8x8xf32>
    %333 = arith.mulf %328, %332 : vector<2x8x8xf32>
    %334 = arith.truncf %333 : vector<2x8x8xf32> to vector<2x8x8xbf16>
    "tpu.trace_start"() <{level = 10 : i32, message = "bqk,bkd->bqd"}> : () -> ()
    %cst_85 = arith.constant dense<0.000000e+00> : vector<2x8x16xf32>
    %335 = tpu.matmul %334, %320, %cst_85 {dimension_numbers = #tpu.dot_dimension_numbers<[2], [1], [1], [2], [0, 0, 0, 1, 1, 2], [0], [0]>} : vector<2x8x8xbf16>, vector<2x8x16xbf16>, vector<2x8x16xf32> -> vector<2x8x16xf32>
    "tpu.trace_stop"() : () -> ()
    %336 = vector.shape_cast %335 : vector<2x8x16xf32> to vector<16x16xf32>
    %337 = arith.truncf %336 : vector<16x16xf32> to vector<16x16xbf16>
    %338 = vector.extract_strided_slice %252 {offsets = [32, 0], sizes = [16, 64], strides = [1, 1]} : vector<64x64xbf16> to vector<16x64xbf16>
    %cst_86 = arith.constant dense<0.000000e+00> : vector<16x64xf32>
    %339 = tpu.matmul %337, %338, %cst_86 {dimension_numbers = #tpu.dot_dimension_numbers<[1], [0], [0], [1], [0, 0, 1, 1], [], []>} : vector<16x16xbf16>, vector<16x64xbf16>, vector<16x64xf32> -> vector<16x64xf32>
    %340 = arith.addf %311, %339 : vector<16x64xf32>
    %341 = vector.extract_strided_slice %251 {offsets = [0, 48], sizes = [16, 16], strides = [1, 1]} : vector<16x192xf32> to vector<16x16xf32>
    %342 = vector.shape_cast %341 : vector<16x16xf32> to vector<2x8x16xf32>
    %343 = arith.truncf %342 : vector<2x8x16xf32> to vector<2x8x16xbf16>
    %344 = vector.extract_strided_slice %251 {offsets = [0, 112], sizes = [16, 16], strides = [1, 1]} : vector<16x192xf32> to vector<16x16xf32>
    %345 = vector.shape_cast %344 : vector<16x16xf32> to vector<2x8x16xf32>
    %346 = arith.truncf %345 : vector<2x8x16xf32> to vector<2x8x16xbf16>
    %347 = vector.extract_strided_slice %251 {offsets = [0, 176], sizes = [16, 16], strides = [1, 1]} : vector<16x192xf32> to vector<16x16xf32>
    %348 = vector.shape_cast %347 : vector<16x16xf32> to vector<2x8x16xf32>
    %349 = arith.truncf %348 : vector<2x8x16xf32> to vector<2x8x16xbf16>
    "tpu.trace_start"() <{level = 10 : i32, message = "bqd,bkd->bqk"}> : () -> ()
    %cst_87 = arith.constant dense<0.000000e+00> : vector<2x8x8xf32>
    %350 = tpu.matmul %343, %346, %cst_87 {dimension_numbers = #tpu.dot_dimension_numbers<[2], [2], [1], [1], [0, 0, 0, 1, 1, 1], [0], [0]>} : vector<2x8x16xbf16>, vector<2x8x16xbf16>, vector<2x8x8xf32> -> vector<2x8x8xf32>
    "tpu.trace_stop"() : () -> ()
    %351 = vector.broadcast %43 : vector<2x1x8xf32> to vector<2x8x8xf32>
    %352 = arith.addf %350, %351 : vector<2x8x8xf32>
    %cst_88 = arith.constant dense<0xFF800000> : vector<2x8xf32>
    %353 = vector.multi_reduction <maximumf>, %352, %cst_88 [2] : vector<2x8x8xf32> to vector<2x8xf32>
    %354 = vector.shape_cast %353 : vector<2x8xf32> to vector<2x8x1xf32>
    %355 = vector.broadcast %354 : vector<2x8x1xf32> to vector<2x8x8xf32>
    %356 = arith.subf %352, %355 : vector<2x8x8xf32>
    %357 = math.exp %356 : vector<2x8x8xf32>
    %cst_89 = arith.constant dense<0.000000e+00> : vector<2x8xf32>
    %358 = vector.multi_reduction <add>, %357, %cst_89 [2] : vector<2x8x8xf32> to vector<2x8xf32>
    %359 = vector.shape_cast %358 : vector<2x8xf32> to vector<2x8x1xf32>
    %360 = tpu.reciprocal %359 {approx = true} : vector<2x8x1xf32> -> vector<2x8x1xf32>
    %361 = vector.broadcast %360 : vector<2x8x1xf32> to vector<2x8x8xf32>
    %362 = arith.mulf %357, %361 : vector<2x8x8xf32>
    %363 = arith.truncf %362 : vector<2x8x8xf32> to vector<2x8x8xbf16>
    "tpu.trace_start"() <{level = 10 : i32, message = "bqk,bkd->bqd"}> : () -> ()
    %cst_90 = arith.constant dense<0.000000e+00> : vector<2x8x16xf32>
    %364 = tpu.matmul %363, %349, %cst_90 {dimension_numbers = #tpu.dot_dimension_numbers<[2], [1], [1], [2], [0, 0, 0, 1, 1, 2], [0], [0]>} : vector<2x8x8xbf16>, vector<2x8x16xbf16>, vector<2x8x16xf32> -> vector<2x8x16xf32>
    "tpu.trace_stop"() : () -> ()
    %365 = vector.shape_cast %364 : vector<2x8x16xf32> to vector<16x16xf32>
    %366 = arith.truncf %365 : vector<16x16xf32> to vector<16x16xbf16>
    %367 = vector.extract_strided_slice %252 {offsets = [48, 0], sizes = [16, 64], strides = [1, 1]} : vector<64x64xbf16> to vector<16x64xbf16>
    %cst_91 = arith.constant dense<0.000000e+00> : vector<16x64xf32>
    %368 = tpu.matmul %366, %367, %cst_91 {dimension_numbers = #tpu.dot_dimension_numbers<[1], [0], [0], [1], [0, 0, 1, 1], [], []>} : vector<16x16xbf16>, vector<16x64xbf16>, vector<16x64xf32> -> vector<16x64xf32>
    %369 = arith.addf %340, %368 : vector<16x64xf32>
    %c19 = arith.constant 19 : index
    %c0_92 = arith.constant 0 : index
    %370 = vector.load %arg4[%c19, %c0_92] : memref<35x192xf32, #tpu.memory_space<vmem>>, vector<1x64xf32>
    %371 = vector.broadcast %370 : vector<1x64xf32> to vector<16x64xf32>
    %372 = arith.addf %369, %371 : vector<16x64xf32>
    %373 = arith.addf %245, %372 : vector<16x64xf32>
    %c20 = arith.constant 20 : index
    %c0_93 = arith.constant 0 : index
    %374 = vector.load %arg4[%c20, %c0_93] : memref<35x192xf32, #tpu.memory_space<vmem>>, vector<1x64xf32>
    %c21 = arith.constant 21 : index
    %c0_94 = arith.constant 0 : index
    %375 = vector.load %arg4[%c21, %c0_94] : memref<35x192xf32, #tpu.memory_space<vmem>>, vector<1x64xf32>
    %cst_95 = arith.constant dense<0.000000e+00> : vector<16xf32>
    %376 = vector.multi_reduction <add>, %373, %cst_95 [1] : vector<16x64xf32> to vector<16xf32>
    %377 = vector.shape_cast %376 : vector<16xf32> to vector<16x1xf32>
    %cst_96 = arith.constant 6.400000e+01 : f32
    %378 = vector.broadcast %cst_96 : f32 to vector<16x1xf32>
    %379 = arith.divf %377, %378 : vector<16x1xf32>
    %380 = vector.broadcast %379 : vector<16x1xf32> to vector<16x64xf32>
    %381 = arith.subf %373, %380 : vector<16x64xf32>
    %382 = arith.mulf %381, %381 : vector<16x64xf32>
    %cst_97 = arith.constant dense<0.000000e+00> : vector<16xf32>
    %383 = vector.multi_reduction <add>, %382, %cst_97 [1] : vector<16x64xf32> to vector<16xf32>
    %384 = vector.shape_cast %383 : vector<16xf32> to vector<16x1xf32>
    %cst_98 = arith.constant 6.400000e+01 : f32
    %385 = vector.broadcast %cst_98 : f32 to vector<16x1xf32>
    %386 = arith.divf %384, %385 : vector<16x1xf32>
    %387 = vector.broadcast %379 : vector<16x1xf32> to vector<16x64xf32>
    %388 = arith.subf %373, %387 : vector<16x64xf32>
    %cst_99 = arith.constant 9.99999996E-13 : f32
    %389 = vector.broadcast %cst_99 : f32 to vector<16x1xf32>
    %390 = arith.addf %386, %389 : vector<16x1xf32>
    %391 = math.rsqrt %390 : vector<16x1xf32>
    %392 = vector.broadcast %391 : vector<16x1xf32> to vector<16x64xf32>
    %393 = arith.mulf %388, %392 : vector<16x64xf32>
    %394 = vector.broadcast %374 : vector<1x64xf32> to vector<16x64xf32>
    %395 = arith.mulf %393, %394 : vector<16x64xf32>
    %396 = vector.broadcast %375 : vector<1x64xf32> to vector<16x64xf32>
    %397 = arith.addf %395, %396 : vector<16x64xf32>
    %398 = arith.truncf %397 : vector<16x64xf32> to vector<16x64xbf16>
    %c448 = arith.constant 448 : index
    %c0_100 = arith.constant 0 : index
    %399 = vector.load %arg3[%c448, %c0_100] : memref<864x192xbf16, #tpu.memory_space<vmem>>, vector<64x128xbf16>
    %cst_101 = arith.constant dense<0.000000e+00> : vector<16x128xf32>
    %400 = tpu.matmul %398, %399, %cst_101 {dimension_numbers = #tpu.dot_dimension_numbers<[1], [0], [0], [1], [0, 0, 1, 1], [], []>} : vector<16x64xbf16>, vector<64x128xbf16>, vector<16x128xf32> -> vector<16x128xf32>
    %c22 = arith.constant 22 : index
    %c0_102 = arith.constant 0 : index
    %401 = vector.load %arg4[%c22, %c0_102] : memref<35x192xf32, #tpu.memory_space<vmem>>, vector<1x128xf32>
    %402 = vector.broadcast %401 : vector<1x128xf32> to vector<16x128xf32>
    %403 = arith.addf %400, %402 : vector<16x128xf32>
    %404 = arith.mulf %403, %403 : vector<16x128xf32>
    %405 = arith.mulf %403, %404 : vector<16x128xf32>
    %cst_103 = arith.constant 4.471500e-02 : f32
    %406 = vector.broadcast %cst_103 : f32 to vector<16x128xf32>
    %407 = arith.mulf %406, %405 : vector<16x128xf32>
    %408 = arith.addf %403, %407 : vector<16x128xf32>
    %cst_104 = arith.constant 0.797884583 : f32
    %409 = vector.broadcast %cst_104 : f32 to vector<16x128xf32>
    %410 = arith.mulf %409, %408 : vector<16x128xf32>
    %411 = math.tanh %410 : vector<16x128xf32>
    %cst_105 = arith.constant 1.000000e+00 : f32
    %412 = vector.broadcast %cst_105 : f32 to vector<16x128xf32>
    %413 = arith.addf %412, %411 : vector<16x128xf32>
    %cst_106 = arith.constant 5.000000e-01 : f32
    %414 = vector.broadcast %cst_106 : f32 to vector<16x128xf32>
    %415 = arith.mulf %414, %413 : vector<16x128xf32>
    %416 = arith.mulf %403, %415 : vector<16x128xf32>
    %417 = arith.truncf %416 : vector<16x128xf32> to vector<16x128xbf16>
    %c512 = arith.constant 512 : index
    %c0_107 = arith.constant 0 : index
    %418 = vector.load %arg3[%c512, %c0_107] : memref<864x192xbf16, #tpu.memory_space<vmem>>, vector<128x64xbf16>
    %cst_108 = arith.constant dense<0.000000e+00> : vector<16x64xf32>
    %419 = tpu.matmul %417, %418, %cst_108 {dimension_numbers = #tpu.dot_dimension_numbers<[1], [0], [0], [1], [0, 0, 1, 1], [], []>} : vector<16x128xbf16>, vector<128x64xbf16>, vector<16x64xf32> -> vector<16x64xf32>
    %c23 = arith.constant 23 : index
    %c0_109 = arith.constant 0 : index
    %420 = vector.load %arg4[%c23, %c0_109] : memref<35x192xf32, #tpu.memory_space<vmem>>, vector<1x64xf32>
    %421 = vector.broadcast %420 : vector<1x64xf32> to vector<16x64xf32>
    %422 = arith.addf %419, %421 : vector<16x64xf32>
    %423 = arith.addf %397, %422 : vector<16x64xf32>
    %c24 = arith.constant 24 : index
    %c0_110 = arith.constant 0 : index
    %424 = vector.load %arg4[%c24, %c0_110] : memref<35x192xf32, #tpu.memory_space<vmem>>, vector<1x64xf32>
    %c25 = arith.constant 25 : index
    %c0_111 = arith.constant 0 : index
    %425 = vector.load %arg4[%c25, %c0_111] : memref<35x192xf32, #tpu.memory_space<vmem>>, vector<1x64xf32>
    %cst_112 = arith.constant dense<0.000000e+00> : vector<16xf32>
    %426 = vector.multi_reduction <add>, %423, %cst_112 [1] : vector<16x64xf32> to vector<16xf32>
    %427 = vector.shape_cast %426 : vector<16xf32> to vector<16x1xf32>
    %cst_113 = arith.constant 6.400000e+01 : f32
    %428 = vector.broadcast %cst_113 : f32 to vector<16x1xf32>
    %429 = arith.divf %427, %428 : vector<16x1xf32>
    %430 = vector.broadcast %429 : vector<16x1xf32> to vector<16x64xf32>
    %431 = arith.subf %423, %430 : vector<16x64xf32>
    %432 = arith.mulf %431, %431 : vector<16x64xf32>
    %cst_114 = arith.constant dense<0.000000e+00> : vector<16xf32>
    %433 = vector.multi_reduction <add>, %432, %cst_114 [1] : vector<16x64xf32> to vector<16xf32>
    %434 = vector.shape_cast %433 : vector<16xf32> to vector<16x1xf32>
    %cst_115 = arith.constant 6.400000e+01 : f32
    %435 = vector.broadcast %cst_115 : f32 to vector<16x1xf32>
    %436 = arith.divf %434, %435 : vector<16x1xf32>
    %437 = vector.broadcast %429 : vector<16x1xf32> to vector<16x64xf32>
    %438 = arith.subf %423, %437 : vector<16x64xf32>
    %cst_116 = arith.constant 9.99999996E-13 : f32
    %439 = vector.broadcast %cst_116 : f32 to vector<16x1xf32>
    %440 = arith.addf %436, %439 : vector<16x1xf32>
    %441 = math.rsqrt %440 : vector<16x1xf32>
    %442 = vector.broadcast %441 : vector<16x1xf32> to vector<16x64xf32>
    %443 = arith.mulf %438, %442 : vector<16x64xf32>
    %444 = vector.broadcast %424 : vector<1x64xf32> to vector<16x64xf32>
    %445 = arith.mulf %443, %444 : vector<16x64xf32>
    %446 = vector.broadcast %425 : vector<1x64xf32> to vector<16x64xf32>
    %447 = arith.addf %445, %446 : vector<16x64xf32>
    %448 = arith.truncf %447 : vector<16x64xf32> to vector<16x64xbf16>
    %c640 = arith.constant 640 : index
    %c0_117 = arith.constant 0 : index
    %449 = vector.load %arg3[%c640, %c0_117] : memref<864x192xbf16, #tpu.memory_space<vmem>>, vector<64x192xbf16>
    %cst_118 = arith.constant dense<0.000000e+00> : vector<16x192xf32>
    %450 = tpu.matmul %448, %449, %cst_118 {dimension_numbers = #tpu.dot_dimension_numbers<[1], [0], [0], [1], [0, 0, 1, 1], [], []>} : vector<16x64xbf16>, vector<64x192xbf16>, vector<16x192xf32> -> vector<16x192xf32>
    %c26 = arith.constant 26 : index
    %c0_119 = arith.constant 0 : index
    %451 = vector.load %arg4[%c26, %c0_119] : memref<35x192xf32, #tpu.memory_space<vmem>>, vector<1x192xf32>
    %452 = vector.broadcast %451 : vector<1x192xf32> to vector<16x192xf32>
    %453 = arith.addf %450, %452 : vector<16x192xf32>
    %454 = vector.shape_cast %453 : vector<16x192xf32> to vector<2x8x192xf32>
    %cst_120 = arith.constant 0.000000e+00 : f32
    %455 = vector.broadcast %cst_120 : f32 to vector<2x32xf32>
    %c704 = arith.constant 704 : index
    %c0_121 = arith.constant 0 : index
    %456 = vector.load %arg3[%c704, %c0_121] : memref<864x192xbf16, #tpu.memory_space<vmem>>, vector<32x96xbf16>
    %c27 = arith.constant 27 : index
    %c0_122 = arith.constant 0 : index
    %457 = vector.load %arg4[%c27, %c0_122] : memref<35x192xf32, #tpu.memory_space<vmem>>, vector<1x96xf32>
    %458 = vector.extract_strided_slice %454 {offsets = [0, 0, 0], sizes = [2, 1, 96], strides = [1, 1, 1]} : vector<2x8x192xf32> to vector<2x1x96xf32>
    %459 = vector.shape_cast %458 : vector<2x1x96xf32> to vector<2x96xf32>
    %460 = arith.truncf %455 : vector<2x32xf32> to vector<2x32xbf16>
    %cst_123 = arith.constant dense<0.000000e+00> : vector<2x96xf32>
    %461 = tpu.matmul %460, %456, %cst_123 {dimension_numbers = #tpu.dot_dimension_numbers<[1], [0], [0], [1], [0, 0, 1, 1], [], []>} : vector<2x32xbf16>, vector<32x96xbf16>, vector<2x96xf32> -> vector<2x96xf32>
    %462 = vector.broadcast %457 : vector<1x96xf32> to vector<2x96xf32>
    %463 = arith.addf %461, %462 : vector<2x96xf32>
    %464 = vector.extract_strided_slice %459 {offsets = [0, 0], sizes = [2, 32], strides = [1, 1]} : vector<2x96xf32> to vector<2x32xf32>
    %465 = vector.extract_strided_slice %463 {offsets = [0, 0], sizes = [2, 32], strides = [1, 1]} : vector<2x96xf32> to vector<2x32xf32>
    %466 = arith.addf %464, %465 : vector<2x32xf32>
    %467 = arith.negf %466 : vector<2x32xf32>
    %468 = math.exp %467 : vector<2x32xf32>
    %cst_124 = arith.constant 1.000000e+00 : f32
    %469 = vector.broadcast %cst_124 : f32 to vector<2x32xf32>
    %470 = arith.addf %469, %468 : vector<2x32xf32>
    %471 = arith.divf %469, %470 : vector<2x32xf32>
    %472 = vector.extract_strided_slice %459 {offsets = [0, 32], sizes = [2, 32], strides = [1, 1]} : vector<2x96xf32> to vector<2x32xf32>
    %473 = vector.extract_strided_slice %463 {offsets = [0, 32], sizes = [2, 32], strides = [1, 1]} : vector<2x96xf32> to vector<2x32xf32>
    %474 = arith.addf %472, %473 : vector<2x32xf32>
    %475 = arith.negf %474 : vector<2x32xf32>
    %476 = math.exp %475 : vector<2x32xf32>
    %cst_125 = arith.constant 1.000000e+00 : f32
    %477 = vector.broadcast %cst_125 : f32 to vector<2x32xf32>
    %478 = arith.addf %477, %476 : vector<2x32xf32>
    %479 = arith.divf %477, %478 : vector<2x32xf32>
    %480 = vector.extract_strided_slice %459 {offsets = [0, 64], sizes = [2, 32], strides = [1, 1]} : vector<2x96xf32> to vector<2x32xf32>
    %481 = vector.extract_strided_slice %463 {offsets = [0, 64], sizes = [2, 32], strides = [1, 1]} : vector<2x96xf32> to vector<2x32xf32>
    %482 = arith.mulf %471, %481 : vector<2x32xf32>
    %483 = arith.addf %480, %482 : vector<2x32xf32>
    %484 = math.tanh %483 : vector<2x32xf32>
    %cst_126 = arith.constant 1.000000e+00 : f32
    %485 = vector.broadcast %cst_126 : f32 to vector<2x32xf32>
    %486 = arith.subf %485, %479 : vector<2x32xf32>
    %487 = arith.mulf %486, %484 : vector<2x32xf32>
    %488 = arith.mulf %479, %455 : vector<2x32xf32>
    %489 = arith.addf %487, %488 : vector<2x32xf32>
    %c736 = arith.constant 736 : index
    %c0_127 = arith.constant 0 : index
    %490 = vector.load %arg3[%c736, %c0_127] : memref<864x192xbf16, #tpu.memory_space<vmem>>, vector<32x96xbf16>
    %c28 = arith.constant 28 : index
    %c0_128 = arith.constant 0 : index
    %491 = vector.load %arg4[%c28, %c0_128] : memref<35x192xf32, #tpu.memory_space<vmem>>, vector<1x96xf32>
    %492 = vector.extract_strided_slice %454 {offsets = [0, 7, 96], sizes = [2, 1, 96], strides = [1, 1, 1]} : vector<2x8x192xf32> to vector<2x1x96xf32>
    %493 = vector.shape_cast %492 : vector<2x1x96xf32> to vector<2x96xf32>
    %494 = arith.truncf %455 : vector<2x32xf32> to vector<2x32xbf16>
    %cst_129 = arith.constant dense<0.000000e+00> : vector<2x96xf32>
    %495 = tpu.matmul %494, %490, %cst_129 {dimension_numbers = #tpu.dot_dimension_numbers<[1], [0], [0], [1], [0, 0, 1, 1], [], []>} : vector<2x32xbf16>, vector<32x96xbf16>, vector<2x96xf32> -> vector<2x96xf32>
    %496 = vector.broadcast %491 : vector<1x96xf32> to vector<2x96xf32>
    %497 = arith.addf %495, %496 : vector<2x96xf32>
    %498 = vector.extract_strided_slice %493 {offsets = [0, 0], sizes = [2, 32], strides = [1, 1]} : vector<2x96xf32> to vector<2x32xf32>
    %499 = vector.extract_strided_slice %497 {offsets = [0, 0], sizes = [2, 32], strides = [1, 1]} : vector<2x96xf32> to vector<2x32xf32>
    %500 = arith.addf %498, %499 : vector<2x32xf32>
    %501 = arith.negf %500 : vector<2x32xf32>
    %502 = math.exp %501 : vector<2x32xf32>
    %cst_130 = arith.constant 1.000000e+00 : f32
    %503 = vector.broadcast %cst_130 : f32 to vector<2x32xf32>
    %504 = arith.addf %503, %502 : vector<2x32xf32>
    %505 = arith.divf %503, %504 : vector<2x32xf32>
    %506 = vector.extract_strided_slice %493 {offsets = [0, 32], sizes = [2, 32], strides = [1, 1]} : vector<2x96xf32> to vector<2x32xf32>
    %507 = vector.extract_strided_slice %497 {offsets = [0, 32], sizes = [2, 32], strides = [1, 1]} : vector<2x96xf32> to vector<2x32xf32>
    %508 = arith.addf %506, %507 : vector<2x32xf32>
    %509 = arith.negf %508 : vector<2x32xf32>
    %510 = math.exp %509 : vector<2x32xf32>
    %cst_131 = arith.constant 1.000000e+00 : f32
    %511 = vector.broadcast %cst_131 : f32 to vector<2x32xf32>
    %512 = arith.addf %511, %510 : vector<2x32xf32>
    %513 = arith.divf %511, %512 : vector<2x32xf32>
    %514 = vector.extract_strided_slice %493 {offsets = [0, 64], sizes = [2, 32], strides = [1, 1]} : vector<2x96xf32> to vector<2x32xf32>
    %515 = vector.extract_strided_slice %497 {offsets = [0, 64], sizes = [2, 32], strides = [1, 1]} : vector<2x96xf32> to vector<2x32xf32>
    %516 = arith.mulf %505, %515 : vector<2x32xf32>
    %517 = arith.addf %514, %516 : vector<2x32xf32>
    %518 = math.tanh %517 : vector<2x32xf32>
    %cst_132 = arith.constant 1.000000e+00 : f32
    %519 = vector.broadcast %cst_132 : f32 to vector<2x32xf32>
    %520 = arith.subf %519, %513 : vector<2x32xf32>
    %521 = arith.mulf %520, %518 : vector<2x32xf32>
    %522 = arith.mulf %513, %455 : vector<2x32xf32>
    %523 = arith.addf %521, %522 : vector<2x32xf32>
    %524 = vector.extract_strided_slice %454 {offsets = [0, 6, 96], sizes = [2, 1, 96], strides = [1, 1, 1]} : vector<2x8x192xf32> to vector<2x1x96xf32>
    %525 = vector.shape_cast %524 : vector<2x1x96xf32> to vector<2x96xf32>
    %526 = arith.truncf %523 : vector<2x32xf32> to vector<2x32xbf16>
    %cst_133 = arith.constant dense<0.000000e+00> : vector<2x96xf32>
    %527 = tpu.matmul %526, %490, %cst_133 {dimension_numbers = #tpu.dot_dimension_numbers<[1], [0], [0], [1], [0, 0, 1, 1], [], []>} : vector<2x32xbf16>, vector<32x96xbf16>, vector<2x96xf32> -> vector<2x96xf32>
    %528 = vector.broadcast %491 : vector<1x96xf32> to vector<2x96xf32>
    %529 = arith.addf %527, %528 : vector<2x96xf32>
    %530 = vector.extract_strided_slice %525 {offsets = [0, 0], sizes = [2, 32], strides = [1, 1]} : vector<2x96xf32> to vector<2x32xf32>
    %531 = vector.extract_strided_slice %529 {offsets = [0, 0], sizes = [2, 32], strides = [1, 1]} : vector<2x96xf32> to vector<2x32xf32>
    %532 = arith.addf %530, %531 : vector<2x32xf32>
    %533 = arith.negf %532 : vector<2x32xf32>
    %534 = math.exp %533 : vector<2x32xf32>
    %cst_134 = arith.constant 1.000000e+00 : f32
    %535 = vector.broadcast %cst_134 : f32 to vector<2x32xf32>
    %536 = arith.addf %535, %534 : vector<2x32xf32>
    %537 = arith.divf %535, %536 : vector<2x32xf32>
    %538 = vector.extract_strided_slice %525 {offsets = [0, 32], sizes = [2, 32], strides = [1, 1]} : vector<2x96xf32> to vector<2x32xf32>
    %539 = vector.extract_strided_slice %529 {offsets = [0, 32], sizes = [2, 32], strides = [1, 1]} : vector<2x96xf32> to vector<2x32xf32>
    %540 = arith.addf %538, %539 : vector<2x32xf32>
    %541 = arith.negf %540 : vector<2x32xf32>
    %542 = math.exp %541 : vector<2x32xf32>
    %cst_135 = arith.constant 1.000000e+00 : f32
    %543 = vector.broadcast %cst_135 : f32 to vector<2x32xf32>
    %544 = arith.addf %543, %542 : vector<2x32xf32>
    %545 = arith.divf %543, %544 : vector<2x32xf32>
    %546 = vector.extract_strided_slice %525 {offsets = [0, 64], sizes = [2, 32], strides = [1, 1]} : vector<2x96xf32> to vector<2x32xf32>
    %547 = vector.extract_strided_slice %529 {offsets = [0, 64], sizes = [2, 32], strides = [1, 1]} : vector<2x96xf32> to vector<2x32xf32>
    %548 = arith.mulf %537, %547 : vector<2x32xf32>
    %549 = arith.addf %546, %548 : vector<2x32xf32>
    %550 = math.tanh %549 : vector<2x32xf32>
    %cst_136 = arith.constant 1.000000e+00 : f32
    %551 = vector.broadcast %cst_136 : f32 to vector<2x32xf32>
    %552 = arith.subf %551, %545 : vector<2x32xf32>
    %553 = arith.mulf %552, %550 : vector<2x32xf32>
    %554 = arith.mulf %545, %523 : vector<2x32xf32>
    %555 = arith.addf %553, %554 : vector<2x32xf32>
    %556 = vector.extract_strided_slice %454 {offsets = [0, 5, 96], sizes = [2, 1, 96], strides = [1, 1, 1]} : vector<2x8x192xf32> to vector<2x1x96xf32>
    %557 = vector.shape_cast %556 : vector<2x1x96xf32> to vector<2x96xf32>
    %558 = arith.truncf %555 : vector<2x32xf32> to vector<2x32xbf16>
    %cst_137 = arith.constant dense<0.000000e+00> : vector<2x96xf32>
    %559 = tpu.matmul %558, %490, %cst_137 {dimension_numbers = #tpu.dot_dimension_numbers<[1], [0], [0], [1], [0, 0, 1, 1], [], []>} : vector<2x32xbf16>, vector<32x96xbf16>, vector<2x96xf32> -> vector<2x96xf32>
    %560 = vector.broadcast %491 : vector<1x96xf32> to vector<2x96xf32>
    %561 = arith.addf %559, %560 : vector<2x96xf32>
    %562 = vector.extract_strided_slice %557 {offsets = [0, 0], sizes = [2, 32], strides = [1, 1]} : vector<2x96xf32> to vector<2x32xf32>
    %563 = vector.extract_strided_slice %561 {offsets = [0, 0], sizes = [2, 32], strides = [1, 1]} : vector<2x96xf32> to vector<2x32xf32>
    %564 = arith.addf %562, %563 : vector<2x32xf32>
    %565 = arith.negf %564 : vector<2x32xf32>
    %566 = math.exp %565 : vector<2x32xf32>
    %cst_138 = arith.constant 1.000000e+00 : f32
    %567 = vector.broadcast %cst_138 : f32 to vector<2x32xf32>
    %568 = arith.addf %567, %566 : vector<2x32xf32>
    %569 = arith.divf %567, %568 : vector<2x32xf32>
    %570 = vector.extract_strided_slice %557 {offsets = [0, 32], sizes = [2, 32], strides = [1, 1]} : vector<2x96xf32> to vector<2x32xf32>
    %571 = vector.extract_strided_slice %561 {offsets = [0, 32], sizes = [2, 32], strides = [1, 1]} : vector<2x96xf32> to vector<2x32xf32>
    %572 = arith.addf %570, %571 : vector<2x32xf32>
    %573 = arith.negf %572 : vector<2x32xf32>
    %574 = math.exp %573 : vector<2x32xf32>
    %cst_139 = arith.constant 1.000000e+00 : f32
    %575 = vector.broadcast %cst_139 : f32 to vector<2x32xf32>
    %576 = arith.addf %575, %574 : vector<2x32xf32>
    %577 = arith.divf %575, %576 : vector<2x32xf32>
    %578 = vector.extract_strided_slice %557 {offsets = [0, 64], sizes = [2, 32], strides = [1, 1]} : vector<2x96xf32> to vector<2x32xf32>
    %579 = vector.extract_strided_slice %561 {offsets = [0, 64], sizes = [2, 32], strides = [1, 1]} : vector<2x96xf32> to vector<2x32xf32>
    %580 = arith.mulf %569, %579 : vector<2x32xf32>
    %581 = arith.addf %578, %580 : vector<2x32xf32>
    %582 = math.tanh %581 : vector<2x32xf32>
    %cst_140 = arith.constant 1.000000e+00 : f32
    %583 = vector.broadcast %cst_140 : f32 to vector<2x32xf32>
    %584 = arith.subf %583, %577 : vector<2x32xf32>
    %585 = arith.mulf %584, %582 : vector<2x32xf32>
    %586 = arith.mulf %577, %555 : vector<2x32xf32>
    %587 = arith.addf %585, %586 : vector<2x32xf32>
    %588 = vector.extract_strided_slice %454 {offsets = [0, 4, 96], sizes = [2, 1, 96], strides = [1, 1, 1]} : vector<2x8x192xf32> to vector<2x1x96xf32>
    %589 = vector.shape_cast %588 : vector<2x1x96xf32> to vector<2x96xf32>
    %590 = arith.truncf %587 : vector<2x32xf32> to vector<2x32xbf16>
    %cst_141 = arith.constant dense<0.000000e+00> : vector<2x96xf32>
    %591 = tpu.matmul %590, %490, %cst_141 {dimension_numbers = #tpu.dot_dimension_numbers<[1], [0], [0], [1], [0, 0, 1, 1], [], []>} : vector<2x32xbf16>, vector<32x96xbf16>, vector<2x96xf32> -> vector<2x96xf32>
    %592 = vector.broadcast %491 : vector<1x96xf32> to vector<2x96xf32>
    %593 = arith.addf %591, %592 : vector<2x96xf32>
    %594 = vector.extract_strided_slice %589 {offsets = [0, 0], sizes = [2, 32], strides = [1, 1]} : vector<2x96xf32> to vector<2x32xf32>
    %595 = vector.extract_strided_slice %593 {offsets = [0, 0], sizes = [2, 32], strides = [1, 1]} : vector<2x96xf32> to vector<2x32xf32>
    %596 = arith.addf %594, %595 : vector<2x32xf32>
    %597 = arith.negf %596 : vector<2x32xf32>
    %598 = math.exp %597 : vector<2x32xf32>
    %cst_142 = arith.constant 1.000000e+00 : f32
    %599 = vector.broadcast %cst_142 : f32 to vector<2x32xf32>
    %600 = arith.addf %599, %598 : vector<2x32xf32>
    %601 = arith.divf %599, %600 : vector<2x32xf32>
    %602 = vector.extract_strided_slice %589 {offsets = [0, 32], sizes = [2, 32], strides = [1, 1]} : vector<2x96xf32> to vector<2x32xf32>
    %603 = vector.extract_strided_slice %593 {offsets = [0, 32], sizes = [2, 32], strides = [1, 1]} : vector<2x96xf32> to vector<2x32xf32>
    %604 = arith.addf %602, %603 : vector<2x32xf32>
    %605 = arith.negf %604 : vector<2x32xf32>
    %606 = math.exp %605 : vector<2x32xf32>
    %cst_143 = arith.constant 1.000000e+00 : f32
    %607 = vector.broadcast %cst_143 : f32 to vector<2x32xf32>
    %608 = arith.addf %607, %606 : vector<2x32xf32>
    %609 = arith.divf %607, %608 : vector<2x32xf32>
    %610 = vector.extract_strided_slice %589 {offsets = [0, 64], sizes = [2, 32], strides = [1, 1]} : vector<2x96xf32> to vector<2x32xf32>
    %611 = vector.extract_strided_slice %593 {offsets = [0, 64], sizes = [2, 32], strides = [1, 1]} : vector<2x96xf32> to vector<2x32xf32>
    %612 = arith.mulf %601, %611 : vector<2x32xf32>
    %613 = arith.addf %610, %612 : vector<2x32xf32>
    %614 = math.tanh %613 : vector<2x32xf32>
    %cst_144 = arith.constant 1.000000e+00 : f32
    %615 = vector.broadcast %cst_144 : f32 to vector<2x32xf32>
    %616 = arith.subf %615, %609 : vector<2x32xf32>
    %617 = arith.mulf %616, %614 : vector<2x32xf32>
    %618 = arith.mulf %609, %587 : vector<2x32xf32>
    %619 = arith.addf %617, %618 : vector<2x32xf32>
    %620 = vector.extract_strided_slice %454 {offsets = [0, 3, 96], sizes = [2, 1, 96], strides = [1, 1, 1]} : vector<2x8x192xf32> to vector<2x1x96xf32>
    %621 = vector.shape_cast %620 : vector<2x1x96xf32> to vector<2x96xf32>
    %622 = arith.truncf %619 : vector<2x32xf32> to vector<2x32xbf16>
    %cst_145 = arith.constant dense<0.000000e+00> : vector<2x96xf32>
    %623 = tpu.matmul %622, %490, %cst_145 {dimension_numbers = #tpu.dot_dimension_numbers<[1], [0], [0], [1], [0, 0, 1, 1], [], []>} : vector<2x32xbf16>, vector<32x96xbf16>, vector<2x96xf32> -> vector<2x96xf32>
    %624 = vector.broadcast %491 : vector<1x96xf32> to vector<2x96xf32>
    %625 = arith.addf %623, %624 : vector<2x96xf32>
    %626 = vector.extract_strided_slice %621 {offsets = [0, 0], sizes = [2, 32], strides = [1, 1]} : vector<2x96xf32> to vector<2x32xf32>
    %627 = vector.extract_strided_slice %625 {offsets = [0, 0], sizes = [2, 32], strides = [1, 1]} : vector<2x96xf32> to vector<2x32xf32>
    %628 = arith.addf %626, %627 : vector<2x32xf32>
    %629 = arith.negf %628 : vector<2x32xf32>
    %630 = math.exp %629 : vector<2x32xf32>
    %cst_146 = arith.constant 1.000000e+00 : f32
    %631 = vector.broadcast %cst_146 : f32 to vector<2x32xf32>
    %632 = arith.addf %631, %630 : vector<2x32xf32>
    %633 = arith.divf %631, %632 : vector<2x32xf32>
    %634 = vector.extract_strided_slice %621 {offsets = [0, 32], sizes = [2, 32], strides = [1, 1]} : vector<2x96xf32> to vector<2x32xf32>
    %635 = vector.extract_strided_slice %625 {offsets = [0, 32], sizes = [2, 32], strides = [1, 1]} : vector<2x96xf32> to vector<2x32xf32>
    %636 = arith.addf %634, %635 : vector<2x32xf32>
    %637 = arith.negf %636 : vector<2x32xf32>
    %638 = math.exp %637 : vector<2x32xf32>
    %cst_147 = arith.constant 1.000000e+00 : f32
    %639 = vector.broadcast %cst_147 : f32 to vector<2x32xf32>
    %640 = arith.addf %639, %638 : vector<2x32xf32>
    %641 = arith.divf %639, %640 : vector<2x32xf32>
    %642 = vector.extract_strided_slice %621 {offsets = [0, 64], sizes = [2, 32], strides = [1, 1]} : vector<2x96xf32> to vector<2x32xf32>
    %643 = vector.extract_strided_slice %625 {offsets = [0, 64], sizes = [2, 32], strides = [1, 1]} : vector<2x96xf32> to vector<2x32xf32>
    %644 = arith.mulf %633, %643 : vector<2x32xf32>
    %645 = arith.addf %642, %644 : vector<2x32xf32>
    %646 = math.tanh %645 : vector<2x32xf32>
    %cst_148 = arith.constant 1.000000e+00 : f32
    %647 = vector.broadcast %cst_148 : f32 to vector<2x32xf32>
    %648 = arith.subf %647, %641 : vector<2x32xf32>
    %649 = arith.mulf %648, %646 : vector<2x32xf32>
    %650 = arith.mulf %641, %619 : vector<2x32xf32>
    %651 = arith.addf %649, %650 : vector<2x32xf32>
    %652 = vector.extract_strided_slice %454 {offsets = [0, 2, 96], sizes = [2, 1, 96], strides = [1, 1, 1]} : vector<2x8x192xf32> to vector<2x1x96xf32>
    %653 = vector.shape_cast %652 : vector<2x1x96xf32> to vector<2x96xf32>
    %654 = arith.truncf %651 : vector<2x32xf32> to vector<2x32xbf16>
    %cst_149 = arith.constant dense<0.000000e+00> : vector<2x96xf32>
    %655 = tpu.matmul %654, %490, %cst_149 {dimension_numbers = #tpu.dot_dimension_numbers<[1], [0], [0], [1], [0, 0, 1, 1], [], []>} : vector<2x32xbf16>, vector<32x96xbf16>, vector<2x96xf32> -> vector<2x96xf32>
    %656 = vector.broadcast %491 : vector<1x96xf32> to vector<2x96xf32>
    %657 = arith.addf %655, %656 : vector<2x96xf32>
    %658 = vector.extract_strided_slice %653 {offsets = [0, 0], sizes = [2, 32], strides = [1, 1]} : vector<2x96xf32> to vector<2x32xf32>
    %659 = vector.extract_strided_slice %657 {offsets = [0, 0], sizes = [2, 32], strides = [1, 1]} : vector<2x96xf32> to vector<2x32xf32>
    %660 = arith.addf %658, %659 : vector<2x32xf32>
    %661 = arith.negf %660 : vector<2x32xf32>
    %662 = math.exp %661 : vector<2x32xf32>
    %cst_150 = arith.constant 1.000000e+00 : f32
    %663 = vector.broadcast %cst_150 : f32 to vector<2x32xf32>
    %664 = arith.addf %663, %662 : vector<2x32xf32>
    %665 = arith.divf %663, %664 : vector<2x32xf32>
    %666 = vector.extract_strided_slice %653 {offsets = [0, 32], sizes = [2, 32], strides = [1, 1]} : vector<2x96xf32> to vector<2x32xf32>
    %667 = vector.extract_strided_slice %657 {offsets = [0, 32], sizes = [2, 32], strides = [1, 1]} : vector<2x96xf32> to vector<2x32xf32>
    %668 = arith.addf %666, %667 : vector<2x32xf32>
    %669 = arith.negf %668 : vector<2x32xf32>
    %670 = math.exp %669 : vector<2x32xf32>
    %cst_151 = arith.constant 1.000000e+00 : f32
    %671 = vector.broadcast %cst_151 : f32 to vector<2x32xf32>
    %672 = arith.addf %671, %670 : vector<2x32xf32>
    %673 = arith.divf %671, %672 : vector<2x32xf32>
    %674 = vector.extract_strided_slice %653 {offsets = [0, 64], sizes = [2, 32], strides = [1, 1]} : vector<2x96xf32> to vector<2x32xf32>
    %675 = vector.extract_strided_slice %657 {offsets = [0, 64], sizes = [2, 32], strides = [1, 1]} : vector<2x96xf32> to vector<2x32xf32>
    %676 = arith.mulf %665, %675 : vector<2x32xf32>
    %677 = arith.addf %674, %676 : vector<2x32xf32>
    %678 = math.tanh %677 : vector<2x32xf32>
    %cst_152 = arith.constant 1.000000e+00 : f32
    %679 = vector.broadcast %cst_152 : f32 to vector<2x32xf32>
    %680 = arith.subf %679, %673 : vector<2x32xf32>
    %681 = arith.mulf %680, %678 : vector<2x32xf32>
    %682 = arith.mulf %673, %651 : vector<2x32xf32>
    %683 = arith.addf %681, %682 : vector<2x32xf32>
    %684 = vector.extract_strided_slice %454 {offsets = [0, 1, 96], sizes = [2, 1, 96], strides = [1, 1, 1]} : vector<2x8x192xf32> to vector<2x1x96xf32>
    %685 = vector.shape_cast %684 : vector<2x1x96xf32> to vector<2x96xf32>
    %686 = arith.truncf %683 : vector<2x32xf32> to vector<2x32xbf16>
    %cst_153 = arith.constant dense<0.000000e+00> : vector<2x96xf32>
    %687 = tpu.matmul %686, %490, %cst_153 {dimension_numbers = #tpu.dot_dimension_numbers<[1], [0], [0], [1], [0, 0, 1, 1], [], []>} : vector<2x32xbf16>, vector<32x96xbf16>, vector<2x96xf32> -> vector<2x96xf32>
    %688 = vector.broadcast %491 : vector<1x96xf32> to vector<2x96xf32>
    %689 = arith.addf %687, %688 : vector<2x96xf32>
    %690 = vector.extract_strided_slice %685 {offsets = [0, 0], sizes = [2, 32], strides = [1, 1]} : vector<2x96xf32> to vector<2x32xf32>
    %691 = vector.extract_strided_slice %689 {offsets = [0, 0], sizes = [2, 32], strides = [1, 1]} : vector<2x96xf32> to vector<2x32xf32>
    %692 = arith.addf %690, %691 : vector<2x32xf32>
    %693 = arith.negf %692 : vector<2x32xf32>
    %694 = math.exp %693 : vector<2x32xf32>
    %cst_154 = arith.constant 1.000000e+00 : f32
    %695 = vector.broadcast %cst_154 : f32 to vector<2x32xf32>
    %696 = arith.addf %695, %694 : vector<2x32xf32>
    %697 = arith.divf %695, %696 : vector<2x32xf32>
    %698 = vector.extract_strided_slice %685 {offsets = [0, 32], sizes = [2, 32], strides = [1, 1]} : vector<2x96xf32> to vector<2x32xf32>
    %699 = vector.extract_strided_slice %689 {offsets = [0, 32], sizes = [2, 32], strides = [1, 1]} : vector<2x96xf32> to vector<2x32xf32>
    %700 = arith.addf %698, %699 : vector<2x32xf32>
    %701 = arith.negf %700 : vector<2x32xf32>
    %702 = math.exp %701 : vector<2x32xf32>
    %cst_155 = arith.constant 1.000000e+00 : f32
    %703 = vector.broadcast %cst_155 : f32 to vector<2x32xf32>
    %704 = arith.addf %703, %702 : vector<2x32xf32>
    %705 = arith.divf %703, %704 : vector<2x32xf32>
    %706 = vector.extract_strided_slice %685 {offsets = [0, 64], sizes = [2, 32], strides = [1, 1]} : vector<2x96xf32> to vector<2x32xf32>
    %707 = vector.extract_strided_slice %689 {offsets = [0, 64], sizes = [2, 32], strides = [1, 1]} : vector<2x96xf32> to vector<2x32xf32>
    %708 = arith.mulf %697, %707 : vector<2x32xf32>
    %709 = arith.addf %706, %708 : vector<2x32xf32>
    %710 = math.tanh %709 : vector<2x32xf32>
    %cst_156 = arith.constant 1.000000e+00 : f32
    %711 = vector.broadcast %cst_156 : f32 to vector<2x32xf32>
    %712 = arith.subf %711, %705 : vector<2x32xf32>
    %713 = arith.mulf %712, %710 : vector<2x32xf32>
    %714 = arith.mulf %705, %683 : vector<2x32xf32>
    %715 = arith.addf %713, %714 : vector<2x32xf32>
    %716 = vector.extract_strided_slice %454 {offsets = [0, 0, 96], sizes = [2, 1, 96], strides = [1, 1, 1]} : vector<2x8x192xf32> to vector<2x1x96xf32>
    %717 = vector.shape_cast %716 : vector<2x1x96xf32> to vector<2x96xf32>
    %718 = arith.truncf %715 : vector<2x32xf32> to vector<2x32xbf16>
    %cst_157 = arith.constant dense<0.000000e+00> : vector<2x96xf32>
    %719 = tpu.matmul %718, %490, %cst_157 {dimension_numbers = #tpu.dot_dimension_numbers<[1], [0], [0], [1], [0, 0, 1, 1], [], []>} : vector<2x32xbf16>, vector<32x96xbf16>, vector<2x96xf32> -> vector<2x96xf32>
    %720 = vector.broadcast %491 : vector<1x96xf32> to vector<2x96xf32>
    %721 = arith.addf %719, %720 : vector<2x96xf32>
    %722 = vector.extract_strided_slice %717 {offsets = [0, 0], sizes = [2, 32], strides = [1, 1]} : vector<2x96xf32> to vector<2x32xf32>
    %723 = vector.extract_strided_slice %721 {offsets = [0, 0], sizes = [2, 32], strides = [1, 1]} : vector<2x96xf32> to vector<2x32xf32>
    %724 = arith.addf %722, %723 : vector<2x32xf32>
    %725 = arith.negf %724 : vector<2x32xf32>
    %726 = math.exp %725 : vector<2x32xf32>
    %cst_158 = arith.constant 1.000000e+00 : f32
    %727 = vector.broadcast %cst_158 : f32 to vector<2x32xf32>
    %728 = arith.addf %727, %726 : vector<2x32xf32>
    %729 = arith.divf %727, %728 : vector<2x32xf32>
    %730 = vector.extract_strided_slice %717 {offsets = [0, 32], sizes = [2, 32], strides = [1, 1]} : vector<2x96xf32> to vector<2x32xf32>
    %731 = vector.extract_strided_slice %721 {offsets = [0, 32], sizes = [2, 32], strides = [1, 1]} : vector<2x96xf32> to vector<2x32xf32>
    %732 = arith.addf %730, %731 : vector<2x32xf32>
    %733 = arith.negf %732 : vector<2x32xf32>
    %734 = math.exp %733 : vector<2x32xf32>
    %cst_159 = arith.constant 1.000000e+00 : f32
    %735 = vector.broadcast %cst_159 : f32 to vector<2x32xf32>
    %736 = arith.addf %735, %734 : vector<2x32xf32>
    %737 = arith.divf %735, %736 : vector<2x32xf32>
    %738 = vector.extract_strided_slice %717 {offsets = [0, 64], sizes = [2, 32], strides = [1, 1]} : vector<2x96xf32> to vector<2x32xf32>
    %739 = vector.extract_strided_slice %721 {offsets = [0, 64], sizes = [2, 32], strides = [1, 1]} : vector<2x96xf32> to vector<2x32xf32>
    %740 = arith.mulf %729, %739 : vector<2x32xf32>
    %741 = arith.addf %738, %740 : vector<2x32xf32>
    %742 = math.tanh %741 : vector<2x32xf32>
    %cst_160 = arith.constant 1.000000e+00 : f32
    %743 = vector.broadcast %cst_160 : f32 to vector<2x32xf32>
    %744 = arith.subf %743, %737 : vector<2x32xf32>
    %745 = arith.mulf %744, %742 : vector<2x32xf32>
    %746 = arith.mulf %737, %715 : vector<2x32xf32>
    %747 = arith.addf %745, %746 : vector<2x32xf32>
    %c29 = arith.constant 29 : index
    %c0_161 = arith.constant 0 : index
    %748 = vector.load %arg4[%c29, %c0_161] : memref<35x192xf32, #tpu.memory_space<vmem>>, vector<1x64xf32>
    %c30 = arith.constant 30 : index
    %c0_162 = arith.constant 0 : index
    %749 = vector.load %arg4[%c30, %c0_162] : memref<35x192xf32, #tpu.memory_space<vmem>>, vector<1x64xf32>
    %c31 = arith.constant 31 : index
    %c0_163 = arith.constant 0 : index
    %750 = vector.load %arg4[%c31, %c0_163] : memref<35x192xf32, #tpu.memory_space<vmem>>, vector<1x64xf32>
    %c32 = arith.constant 32 : index
    %c0_164 = arith.constant 0 : index
    %751 = vector.load %arg4[%c32, %c0_164] : memref<35x192xf32, #tpu.memory_space<vmem>>, vector<1x64xf32>
    %cst_165 = arith.constant 9.99999974E-6 : f32
    %752 = vector.broadcast %cst_165 : f32 to vector<1x64xf32>
    %753 = arith.addf %751, %752 : vector<1x64xf32>
    %754 = math.rsqrt %753 : vector<1x64xf32>
    %755 = vector.extract_strided_slice %750 {offsets = [0, 0], sizes = [1, 32], strides = [1, 1]} : vector<1x64xf32> to vector<1x32xf32>
    %756 = vector.broadcast %755 : vector<1x32xf32> to vector<2x32xf32>
    %757 = arith.subf %489, %756 : vector<2x32xf32>
    %758 = vector.extract_strided_slice %754 {offsets = [0, 0], sizes = [1, 32], strides = [1, 1]} : vector<1x64xf32> to vector<1x32xf32>
    %759 = vector.broadcast %758 : vector<1x32xf32> to vector<2x32xf32>
    %760 = arith.mulf %757, %759 : vector<2x32xf32>
    %761 = vector.extract_strided_slice %748 {offsets = [0, 0], sizes = [1, 32], strides = [1, 1]} : vector<1x64xf32> to vector<1x32xf32>
    %762 = vector.broadcast %761 : vector<1x32xf32> to vector<2x32xf32>
    %763 = arith.mulf %760, %762 : vector<2x32xf32>
    %764 = vector.extract_strided_slice %749 {offsets = [0, 0], sizes = [1, 32], strides = [1, 1]} : vector<1x64xf32> to vector<1x32xf32>
    %765 = vector.broadcast %764 : vector<1x32xf32> to vector<2x32xf32>
    %766 = arith.addf %763, %765 : vector<2x32xf32>
    %767 = vector.extract_strided_slice %750 {offsets = [0, 32], sizes = [1, 32], strides = [1, 1]} : vector<1x64xf32> to vector<1x32xf32>
    %768 = vector.broadcast %767 : vector<1x32xf32> to vector<2x32xf32>
    %769 = arith.subf %747, %768 : vector<2x32xf32>
    %770 = vector.extract_strided_slice %754 {offsets = [0, 32], sizes = [1, 32], strides = [1, 1]} : vector<1x64xf32> to vector<1x32xf32>
    %771 = vector.broadcast %770 : vector<1x32xf32> to vector<2x32xf32>
    %772 = arith.mulf %769, %771 : vector<2x32xf32>
    %773 = vector.extract_strided_slice %748 {offsets = [0, 32], sizes = [1, 32], strides = [1, 1]} : vector<1x64xf32> to vector<1x32xf32>
    %774 = vector.broadcast %773 : vector<1x32xf32> to vector<2x32xf32>
    %775 = arith.mulf %772, %774 : vector<2x32xf32>
    %776 = vector.extract_strided_slice %749 {offsets = [0, 32], sizes = [1, 32], strides = [1, 1]} : vector<1x64xf32> to vector<1x32xf32>
    %777 = vector.broadcast %776 : vector<1x32xf32> to vector<2x32xf32>
    %778 = arith.addf %775, %777 : vector<2x32xf32>
    %c768 = arith.constant 768 : index
    %c0_166 = arith.constant 0 : index
    %779 = vector.load %arg3[%c768, %c0_166] : memref<864x192xbf16, #tpu.memory_space<vmem>>, vector<64x32xbf16>
    %780 = arith.truncf %766 : vector<2x32xf32> to vector<2x32xbf16>
    %781 = vector.extract_strided_slice %779 {offsets = [0, 0], sizes = [32, 32], strides = [1, 1]} : vector<64x32xbf16> to vector<32x32xbf16>
    %cst_167 = arith.constant dense<0.000000e+00> : vector<2x32xf32>
    %782 = tpu.matmul %780, %781, %cst_167 {dimension_numbers = #tpu.dot_dimension_numbers<[1], [0], [0], [1], [0, 0, 1, 1], [], []>} : vector<2x32xbf16>, vector<32x32xbf16>, vector<2x32xf32> -> vector<2x32xf32>
    %783 = arith.truncf %778 : vector<2x32xf32> to vector<2x32xbf16>
    %784 = vector.extract_strided_slice %779 {offsets = [32, 0], sizes = [32, 32], strides = [1, 1]} : vector<64x32xbf16> to vector<32x32xbf16>
    %cst_168 = arith.constant dense<0.000000e+00> : vector<2x32xf32>
    %785 = tpu.matmul %783, %784, %cst_168 {dimension_numbers = #tpu.dot_dimension_numbers<[1], [0], [0], [1], [0, 0, 1, 1], [], []>} : vector<2x32xbf16>, vector<32x32xbf16>, vector<2x32xf32> -> vector<2x32xf32>
    %786 = arith.addf %782, %785 : vector<2x32xf32>
    %c33 = arith.constant 33 : index
    %c0_169 = arith.constant 0 : index
    %787 = vector.load %arg4[%c33, %c0_169] : memref<35x192xf32, #tpu.memory_space<vmem>>, vector<1x32xf32>
    %788 = vector.broadcast %787 : vector<1x32xf32> to vector<2x32xf32>
    %789 = arith.addf %786, %788 : vector<2x32xf32>
    %cst_170 = arith.constant 0.000000e+00 : f32
    %790 = vector.broadcast %cst_170 : f32 to vector<2x32xf32>
    %791 = arith.maximumf %789, %790 : vector<2x32xf32>
    %c832 = arith.constant 832 : index
    %c0_171 = arith.constant 0 : index
    %792 = vector.load %arg3[%c832, %c0_171] : memref<864x192xbf16, #tpu.memory_space<vmem>>, vector<32x2xbf16>
    %793 = arith.truncf %791 : vector<2x32xf32> to vector<2x32xbf16>
    %cst_172 = arith.constant dense<0.000000e+00> : vector<2x2xf32>
    %794 = tpu.matmul %793, %792, %cst_172 {dimension_numbers = #tpu.dot_dimension_numbers<[1], [0], [0], [1], [0, 0, 1, 1], [], []>} : vector<2x32xbf16>, vector<32x2xbf16>, vector<2x2xf32> -> vector<2x2xf32>
    %c34 = arith.constant 34 : index
    %c0_173 = arith.constant 0 : index
    %795 = vector.load %arg4[%c34, %c0_173] : memref<35x192xf32, #tpu.memory_space<vmem>>, vector<1x2xf32>
    %796 = vector.broadcast %795 : vector<1x2xf32> to vector<2x2xf32>
    %797 = arith.addf %794, %796 : vector<2x2xf32>
    %c0_174 = arith.constant 0 : index
    %c0_175 = arith.constant 0 : index
    %798 = vector.load %arg5[%c0_174, %c0_175] : memref<2x2xf32, #tpu.memory_space<vmem>>, vector<2x2xf32>
    tpu.vector_store %arg5[%c0_174, %c0_175], %797 {strides = array<i32>} : memref<2x2xf32, #tpu.memory_space<vmem>>, vector<2x2xf32>,
    return
  }
}

</mosaic_0001>

<bundles_post_ra>
// kernel: codebert_classifier_forward.1
= control target key start
LH: loop header
LB: loop body
LE: loop exit
PB: predicated region body
PF: predicated region fallthrough
CT: control target
= control target key end

     0   :  { %v5886_v2 = vmov 0   ;;  %s7105_s0 = inlined_call_operand.vmem [shape: s32[16,1], index: 0, kind: input, shape index: {}]   ;;  %s7106_s1 = inlined_call_operand.vmem [shape: f32[2,8], index: 1, kind: input, shape index: {}]   ;;  %s7107_s2 = inlined_call_operand.vmem [shape: f32[128,64], index: 2, kind: input, shape index: {}]   ;;  %s7108_s3 = inlined_call_operand.vmem [shape: bf16[864,192], index: 3, kind: input, shape index: {}]   ;;  %s7109_s4 = inlined_call_operand.vmem [shape: f32[35,192], index: 4, kind: input, shape index: {}]   ;;  %s7110_s5 = inlined_call_operand.hbm [shape: f32[2,2], index: 5, kind: output, shape index: {}]  }
   0x1   :  { %v22_v0 = vld [vmem:[%s7105_s0] sm:$0xff]  ;;  %5516 = vset.pattern.permute.xlu0 %v5886_v2  ;;  %v39_v3 = vld [vmem:[%s7107_s2 + $0x8] sm:$0xff]  ;;  %v40_v4 = vld [vmem:[%s7107_s2 + $0x10] sm:$0xff]  ;;  %297 = vmatprep.mubr.bf16.mxu1 %v5886_v2 }
   0x2   :  { %v38_v1 = vld [vmem:[%s7107_s2] sm:$0xff]  ;;  %v41_v5 = vld [vmem:[%s7107_s2 + $0x18] sm:$0xff]  ;;  %27 = vperm.xlu0 %5516, %v22_v0   ;;  %v23_v8 = vld [vmem:[%s7105_s0 + $0x8] sm:$0xff] }
   0x3   :  { %v5471_v6 = vpack.c.bf16 %v39_v3, %v38_v1  ;;  %v5475_v7 = vpack.c.bf16 %v41_v5, %v40_v4  ;;  %v42_v9 = vld [vmem:[%s7107_s2 + $0x20] sm:$0xff]  ;;  %v43_v10 = vld [vmem:[%s7107_s2 + $0x28] sm:$0xff]  ;;  %v44_v11 = vld [vmem:[%s7107_s2 + $0x30] sm:$0xff] }
   0x4   :  { %v5479_v12 = vpack.c.bf16 %v43_v10, %v42_v9  ;;  %v45_v13 = vld [vmem:[%s7107_s2 + $0x38] sm:$0xff]  ;;  %v46_v14 = vld [vmem:[%s7107_s2 + $0x40] sm:$0xff]  ;;  %v47_v15 = vld [vmem:[%s7107_s2 + $0x48] sm:$0xff] }
   0x5   :  { %5472 = vmatprep.subr.bf16.mxu0 %v5471_v6  ;;  %v5483_v16 = vpack.c.bf16 %v45_v13, %v44_v11  ;;  %v48_v17 = vld [vmem:[%s7107_s2 + $0x50] sm:$0xff]  ;;  %v49_v18 = vld [vmem:[%s7107_s2 + $0x58] sm:$0xff]  ;;  %v5487_v19 = vpack.c.bf16 %v47_v15, %v46_v14  ;;  %v50_v20 = vld [vmem:[%s7107_s2 + $0x60] sm:$0xff] }
   0x6   :  { %5474 = vmatpush3.bf16.msra.mxu0 %v5471_v6  ;;  %30 = vperm.xlu0 %5516, %v23_v8   ;;  %v51_v21 = vld [vmem:[%s7107_s2 + $0x68] sm:$0xff]  ;;  %v5491_v22 = vpack.c.bf16 %v49_v18, %v48_v17  ;;  %v52_v23 = vld [vmem:[%s7107_s2 + $0x70] sm:$0xff]  ;;  %v53_v24 = vld [vmem:[%s7107_s2 + $0x78] sm:$0xff] }
   0x7   :  { %5476 = vmatprep.subr.bf16.mxu0 %v5475_v7  ;;  %v5495_v25 = vpack.c.bf16 %v51_v21, %v50_v20  ;;  %v5499_v26 = vpack.c.bf16 %v53_v24, %v52_v23 }
   0xa   :  { %5478 = vmatpush3.bf16.msra.mxu0 %v5475_v7 }
   0xb   :  { %5480 = vmatprep.subr.bf16.mxu0 %v5479_v12 }
   0xe   :  { %5482 = vmatpush3.bf16.msra.mxu0 %v5479_v12 }
   0xf   :  { %5484 = vmatprep.subr.bf16.mxu0 %v5483_v16 }
  0x12   :  { %5486 = vmatpush3.bf16.msra.mxu0 %v5483_v16 }
  0x13   :  { %5488 = vmatprep.subr.bf16.mxu0 %v5487_v19 }
  0x16   :  { %5490 = vmatpush3.bf16.msra.mxu0 %v5487_v19 }
  0x17   :  { %5492 = vmatprep.subr.bf16.mxu0 %v5491_v22 }
  0x1a   :  { %5494 = vmatpush3.bf16.msra.mxu0 %v5491_v22 }
  0x1b   :  { %5496 = vmatprep.subr.bf16.mxu0 %v5495_v25 }
  0x1e   :  { %5498 = vmatpush3.bf16.msra.mxu0 %v5495_v25 }
  0x1f   :  { %5500 = vmatprep.subr.bf16.mxu0 %v5499_v26 }
  0x22   :  { %5502 = vmatpush3.bf16.msra.mxu0 %v5499_v26 }
  0x23   :  { %10 = vsyncpa [#allocation3], 0  ;;  %v24_v27 = vlaneseq  ;;  %v5887_v30 = vmov 1.0   ;;  %v129_v32 = vld [vmem:[%s7109_s4] sm:$0xfc]  ;;  %vm133_vm2 = vcmask 1045504  }
  0x24   :  { %v130_v33 = vld [vmem:[%s7109_s4 + $0x10] sm:$0x3]  ;;  %v134_v34 = vrot.slane %v129_v32, 2  ;;  %vm142_vm3 = vcmask 523264   ;;  %v5517_v53 = vld [vmem:[%s7108_s3 + $0x4] ss:$8 sps:$4 sm:$0xff]  }
  0x25   :  { %v25_v28 = vand.u32 127, %v24_v27  ;;  %v135_v35 = vrot.slane %v130_v33, 2  ;;  %v5519_v54 = vld [vmem:[%s7108_s3] ss:$8 sps:$4 sm:$0xff]   ;;  %v5520_v55 = vld [vmem:[%s7108_s3 + $0x14] ss:$8 sps:$4 sm:$0xff]   ;;  %265 = vmatprep.subr.bf16.mxu1 %v5517_v53 }
  0x26   :  { %266 = vmatpush1.bf16.msra.mxu1 %v5519_v54  ;;  %v5522_v56 = vld [vmem:[%s7108_s3 + $0x10] ss:$8 sps:$4 sm:$0xff]   ;;  %v5523_v57 = vld [vmem:[%s7108_s3 + $0x24] ss:$8 sps:$4 sm:$0xff]   ;;  %v5525_v58 = vld [vmem:[%s7108_s3 + $0x20] ss:$8 sps:$4 sm:$0xff]  }
  0x27   :  { %v136_v36 = vsel %vm133_vm2, %v134_v34, %v135_v35  ;;  %267 = vmatprep.subr.bf16.mxu1 %v5520_v55  ;;  %v5526_v59 = vld [vmem:[%s7108_s3 + $0x34] ss:$8 sps:$4 sm:$0xff]   ;;  %v5528_v60 = vld [vmem:[%s7108_s3 + $0x30] ss:$8 sps:$4 sm:$0xff]   ;;  %v140_v6 = vld [vmem:[%s7109_s4] ss:$0 sm:$0xff] }
  0x28   :  { %v141_v10 = vld [vmem:[%s7109_s4 + $0x1] ss:$0 sm:$0xff]  ;;  %v5888_v15 = vmov 0.0   ;;  %v182_v16 = vshrl.u32 %v24_v27, 7  ;;  %vm5889_vm4 = vmmov 0   ;;  %vm457_vm5 = vcmask 1043456  }
  0x29   :  { %5083 = vmatprep.subr.bf16.mxu0 %v5888_v15  ;;  %v4716_v18 = vld [vmem:[%s7109_s4 + $0x12] ss:$8 sm:$0x3]  ;;  %s5890_s27 = smov 64   ;;  %vm333_vm6 = vcmask 130048   ;;  %vm429_vm7 = vcmask 64512  }
  0x2a   :  { %268 = vmatpush1.bf16.msra.mxu1 %v5522_v56  ;;  %v6036_v17 = vsub.s32 0, %v182_v16  ;;  %v6041_v19 = vsub.s32 1, %v182_v16  ;;  %s5893_s29 = smov 112   ;;  %s5894_s30 = smov 32   ;;  %vm3530_vm8 = vcmask 1041409   ;;  %vm3294_vm9 = vcmask 261120  }
  0x2b   :  { %269 = vmatprep.subr.bf16.mxu1 %v5523_v57  ;;  %s5895_s6 = smov 96   ;;  %s5896_s11 = smov 16   ;;  %vm4696_vm10 = vcmask 9216  }
  0x2c   :  { %v215_v20 = vrot.slane %v4716_v18, %v6036_v17  ;;  %v219_v21 = vrot.slane %v4716_v18, %v6041_v19  ;;  %s5897_s12 = smov 80   ;;  %s5898_s28 = smov [#allocation2]  }
  0x2d   :  { %s4704_s7 = sshll.u32 %s5898_s28, 4  ;;  %s4705_s7 = int_to_ptr.vmem [resolvable:$true] %s4704_s7 }
  0x2e   :  { %270 = vmatpush1.bf16.msra.mxu1 %v5525_v58  ;;  %p5867_p1 = scmp.lt.s32.totalorder %s4705_s7, %s4705_s7 }
  0x2f   :  { %271 = vmatprep.subr.bf16.mxu1 %v5526_v59 }
  0x32   :  { %272 = vmatpush1.bf16.msra.mxu1 %v5528_v60 }
  0x33   :  { %5071 = vmatprep.subr.bf16.mxu1 %v5888_v15 }
  0x81   :  { %v28_v29 = vpop.permute.xlu0 %27 }
  0x82   :  { %vm32_vm0 = vcmp.eq.s32.totalorder %v25_v28, %v28_v29 }
  0x83   :  { %5068 = vmatprep.mubr.msk.f32.mxu0 %vm32_vm0, %v5887_v30 }
  0x85   :  { %v31_v31 = vpop.permute.xlu0 %30 }
  0x86   :  { %vm33_vm1 = vcmp.eq.s32.totalorder %v25_v28, %v31_v31 }
  0x87   :  { %5069 = vmatmul.mubr.msk.f32.vlgmr.msra.gmra.mrb[0].mxu0 %vm33_vm1, %v5887_v30 }
  0x88   :  { %5085 = vmatprep.mubr.msk.bf16.mxu0 %vm5889_vm4, %v5888_v15 }
 0x15a   :  { %v5070_v37 = vpop.f32.mrb[0].mxu0 }
 0x15b   :  { %v120_v38 = vpop.f32.mrb[1].mxu0  ;;  %v139_v40 = vadd.f32 %v5070_v37, %v136_v36 }
 0x15c   :  { %v138_v39 = vadd.f32 %v136_v36, %v120_v38 }
 0x15d   :  { %v146_v42 = vsel %vm142_vm3, %v139_v40, 0.0 }
 0x15e   :  { %v143_v41 = vsel %vm142_vm3, %v138_v39, 0.0 }
 0x15f   :  { %144 = vadd.xlane.f32.xlu1 %v143_v41 }
 0x163   :  { %147 = vadd.xlane.f32.xlu1 %v146_v42  ;;  %v174_v42 = vld [vmem:[%s7106_s1] sm:$0x3]  ;;  %s5892_s1 = smov 48  }
 0x1ec   :  { %v145_v43 = vpop.xlane.xlu1 %144 }
 0x1ed   :  { %v150_v44 = vmul.f32 0.015625, %v145_v43  ;;  %v175_v43 = vsub.f32 1.0, %v174_v42 }
 0x1ef   :  { %v152_v45 = vsub.f32 %v138_v39, %v150_v44 }
 0x1f0   :  { %v148_v46 = vpop.xlane.xlu1 %147 }
 0x1f1   :  { %v151_v47 = vmul.f32 0.015625, %v148_v46  ;;  %v154_v48 = vmul.f32 %v152_v45, %v152_v45 }
 0x1f3   :  { %v153_v49 = vsub.f32 %v139_v40, %v151_v47  ;;  %v156_v50 = vsel %vm142_vm3, %v154_v48, 0.0  ;;  %v5891_v40 = vmov 1966171168  }
 0x1f4   :  { %157 = vadd.xlane.f32.xlu0 %v156_v50  ;;  %v179_v41 = vunpack.c.l.s4 %v5891_v40 }
 0x1f5   :  { %v155_v51 = vmul.f32 %v153_v49, %v153_v49 }
 0x1f6   :  { %v180_v44 = vunpack.c.0.s8 %v179_v41 }
 0x1f7   :  { %v159_v52 = vsel %vm142_vm3, %v155_v51, 0.0 }
 0x1f8   :  { %160 = vadd.xlane.f32.xlu1 %v159_v52  ;;  %v183_v46 = vsub.s32 %v180_v44, %v182_v16 }
 0x281   :  { %v158_v61 = vpop.xlane.xlu0 %157 }
 0x282   :  { %v162_v62 = vmul.f32 0.015625, %v158_v61 }
 0x284   :  { %v164_v63 = vadd.f32 1e-12, %v162_v62 }
 0x285   :  { %v161_v0 = vpop.xlane.xlu1 %160 }
 0x286   :  { %5595 = vrsqrt.f32 %v164_v63  ;;  %v163_v1 = vmul.f32 0.015625, %v161_v0 }
 0x288   :  { %v165_v3 = vadd.f32 1e-12, %v163_v1 }
 0x28a   :  { %5597 = vrsqrt.f32 %v165_v3 }
 0x290   :  { %v5596_v4 = vpop.eup %5595 }
 0x291   :  { %v168_v5 = vmul.f32 %v5596_v4, %v152_v45  ;;  %v176_v45 = vmul.f32 -1e+09, %v175_v43 }
 0x293   :  { %v170_v9 = vmul.f32 %v168_v5, %v140_v6  ;;  %v184_v47 = vrot.slane %v176_v45, %v183_v46 }
 0x294   :  { %v5598_v7 = vpop.eup %5597 }
 0x295   :  { %v169_v8 = vmul.f32 %v5598_v7, %v153_v49  ;;  %v6026_v12 = vadd.f32 %v170_v9, %v141_v10  ;;  %v192_v48 = vrot.slane %v184_v47, %v183_v46  ;;  %v185_v49 = vcombine.high %v184_v47, %v184_v47 }
 0x297   :  { %v171_v11 = vmul.f32 %v169_v8, %v140_v6  ;;  %v6083_v50 = vrot.slane %v192_v48, %v6036_v17  ;;  %v199_v52 = vrot.slane %v185_v49, %v183_v46 }
 0x299   :  { %v6028_v13 = vadd.f32 %v171_v11, %v141_v10  ;;  %v6088_v58 = vrot.slane %v199_v52, %v6036_v17 }
 0x29b   :  { %v200_v14 = vpack.c.bf16 %v6028_v13, %v6026_v12 }
 0x29d   :  { %4725 = vmatmul.mubr.msk.bf16.vlgmr.msra.gmra.mrb[0].mxu1 %vm142_vm3, %v200_v14 }
 0x29e   :  { %5073 = vmatprep.mubr.msk.bf16.mxu1 %vm5889_vm4, %v5888_v15 }
 0x370   :  { %v299_v22 = vpop.f32.mrb[0].mxu1 }
 0x371   :  { %v300_v23 = vadd.f32 %v299_v22, %v215_v20  ;;  %v301_v24 = vpop.f32.mrb[1].mxu1 }
 0x372   :  { %v302_v25 = vadd.f32 %v301_v24, %v219_v21  ;;  %v303_v26 = vpop.f32.mrb[2].mxu1 }
 0x373   :  { %v6049_v27 = vpack.c.bf16 %v300_v23, %v300_v23  ;;  %v304_v28 = vadd.f32 %v303_v26, %v215_v20  ;;  %v305_v29 = vpop.f32.mrb[3].mxu1 }
 0x374   :  { %v6051_v30 = vpack.c.bf16 %v302_v25, %v302_v25  ;;  %v306_v31 = vadd.f32 %v305_v29, %v219_v21 }
 0x375   :  { %331 = vrot.lane.b32.xlu1 %v6049_v27, %s5890_s27  ;;  %v6057_v33 = vpack.c.bf16 %v304_v28, %v304_v28 }
 0x376   :  { %v459_v32 = vsel %vm457_vm5, %v6051_v30, 0  ;;  %v6070_v38 = vpack.c.bf16 %v306_v31, %v306_v31 }
 0x377   :  { %5084 = vmatpush3.bf16.msra.mxu0 %v459_v32 }
 0x378   :  { %5095 = vmatprep.subr.bf16.mxu0 %v5888_v15  ;;  %v505_v39 = vsel %vm457_vm5, %v6070_v38, 0 }
 0x379   :  { %381 = vrot.lane.b32.xlu1 %v6057_v33, %s5890_s27 }
 0x3e7   :  { %v332_v34 = vpop.permute.xlu1 %331 }
 0x3e8   :  { %v338_v35 = vsel %vm333_vm6, %v332_v34, 0 }
 0x3e9   :  { %5072 = vmatpush3.bf16.xpose.msra.mxu1 %v338_v35 }
 0x3ea   :  { %5077 = vmatprep.subr.bf16.mxu1 %v5888_v15 }
 0x3eb   :  { %v382_v36 = vpop.permute.xlu1 %381 }
 0x3ec   :  { %v387_v37 = vsel %vm333_vm6, %v382_v36, 0 }
 0x3f0   :  { %5074 = vmatmul.mubr.msk.bf16.vlgmr.msra.gmra.mrb[4].mxu1 %vm333_vm6, %v6049_v27 }
 0x3f1   :  { %5078 = vmatpush3.bf16.xpose.msra.mxu1 %v387_v37  ;;  %5079 = vmatprep.mubr.msk.bf16.mxu1 %vm5889_vm4, %v5888_v15 }
 0x3f2   :  { %5089 = vmatprep.subr.bf16.mxu1 %v5888_v15 }
 0x3f8   :  { %5080 = vmatmul.mubr.msk.bf16.vlgmr.msra.gmra.mrb[8].mxu1 %vm333_vm6, %v6057_v33 }
 0x3f9   :  { %5090 = vmatpush3.bf16.msra.mxu1 %v505_v39  ;;  %5091 = vmatprep.mubr.msk.bf16.mxu1 %vm5889_vm4, %v5888_v15 }
 0x3fa   :  { %5101 = vmatprep.subr.bf16.mxu1 %v5888_v15 }
 0x4c3   :  { %v374_v51 = vpop.f32.mrb[4].mxu1 }
 0x4c4   :  { %v375_v53 = vadd.f32 %v374_v51, %v6083_v50  ;;  %v5075_v54 = vpop.f32.mrb[5].mxu1 }
 0x4c5   :  { %v377_v55 = vpop.f32.mrb[6].mxu1 }
 0x4c6   :  { %v5076_v56 = vpop.f32.mrb[7].mxu1  ;;  %v430_v57 = vsel %vm429_vm7, %v375_v53, -inf }
 0x4c7   :  { %431 = vmax.xlane.f32.xlu1 %v430_v57 }
 0x4cb   :  { %v423_v59 = vpop.f32.mrb[8].mxu1 }
 0x4cc   :  { %v424_v60 = vadd.f32 %v423_v59, %v6088_v58  ;;  %v5081_v61 = vpop.f32.mrb[9].mxu1 }
 0x4cd   :  { %v426_v62 = vpop.f32.mrb[10].mxu1 }
 0x4ce   :  { %v5082_v63 = vpop.f32.mrb[11].mxu1  ;;  %v433_v0 = vsel %vm429_vm7, %v424_v60, -inf }
 0x4cf   :  { %434 = vmax.xlane.f32.xlu0 %v433_v0 }
 0x4d8   :  { %600 = vrot.lane.b32.xlu1 %v6057_v33, %s5892_s1 }
 0x554   :  { %v432_v1 = vpop.xlane.xlu1 %431 }
 0x555   :  { %v436_v3 = vsub.f32 %v375_v53, %v432_v1 }
 0x557   :  { %v438_v4 = vmul.f32 1.442695, %v436_v3 }
 0x558   :  { %v601_v26 = vpop.permute.xlu1 %600 }
 0x559   :  { %5599 = vpow2.f32 %v438_v4  ;;  %v606_v31 = vsel %vm333_vm6, %v601_v26, 0  ;;  %v5530_v26 = vld [vmem:[%s7108_s3 + $0x50] ss:$8 sps:$4 sm:$0xff]  }
 0x55c   :  { %v435_v5 = vpop.xlane.xlu0 %434 }
 0x55d   :  { %v437_v6 = vsub.f32 %v424_v60, %v435_v5 }
 0x55f   :  { %v440_v7 = vmul.f32 1.442695, %v437_v6 }
 0x561   :  { %5601 = vpow2.f32 %v440_v7 }
 0x563   :  { %v5600_v8 = vpop.eup %5599 }
 0x564   :  { %v442_v9 = vsel %vm429_vm7, %v5600_v8, 0.0 }
 0x565   :  { %443 = vadd.xlane.f32.xlu0 %v442_v9 }
 0x56b   :  { %v5602_v10 = vpop.eup %5601 }
 0x56c   :  { %v445_v11 = vsel %vm429_vm7, %v5602_v10, 0.0 }
 0x56d   :  { %446 = vadd.xlane.f32.xlu0 %v445_v11 }
 0x583   :  { %550 = vrot.lane.b32.xlu0 %v6049_v27, %s5892_s1 }
 0x587   :  { %548 = vrot.lane.b32.xlu0 %v6049_v27, %s5893_s29 }
 0x58b   :  { %598 = vrot.lane.b32.xlu0 %v6057_v33, %s5893_s29 }
 0x5f2   :  { %v444_v14 = vpop.xlane.xlu0 %443 }
 0x5f3   :  { %5603 = vrcp.f32 %v444_v14 }
 0x5fa   :  { %v447_v16 = vpop.xlane.xlu0 %446 }
 0x5fb   :  { %5605 = vrcp.f32 %v447_v16 }
 0x5fd   :  { %v5604_v18 = vpop.eup %5603 }
 0x5fe   :  { %v450_v20 = vmul.f32 %v5604_v18, %v5600_v8  ;;  %v551_v21 = vpop.permute.xlu0 %550 }
 0x5ff   :  { %v556_v23 = vsel %vm333_vm6, %v551_v21, 0  ;;  %v5529_v21 = vld [vmem:[%s7108_s3 + $0x40] ss:$8 sps:$4 sm:$0xff]  }
 0x600   :  { %v452_v22 = vpack.c.bf16 %v450_v20, %v450_v20 }
 0x602   :  { %5086 = vmatmul.mubr.msk.bf16.vlgmr.msra.gmra.mrb[4].mxu0 %vm429_vm7, %v452_v22  ;;  %v549_v29 = vpop.permute.xlu0 %548 }
 0x603   :  { %5096 = vmatpush3.bf16.xpose.msra.mxu0 %v556_v23  ;;  %5097 = vmatprep.mubr.msk.bf16.mxu0 %vm5889_vm4, %v5888_v15 }
 0x604   :  { %5107 = vmatprep.subr.bf16.mxu0 %v5888_v15 }
 0x605   :  { %v5606_v24 = vpop.eup %5605 }
 0x606   :  { %v451_v25 = vmul.f32 %v5606_v24, %v5602_v10  ;;  %v599_v32 = vpop.permute.xlu0 %598 }
 0x608   :  { %v453_v28 = vpack.c.bf16 %v451_v25, %v451_v25 }
 0x60a   :  { %5092 = vmatmul.mubr.msk.bf16.vlgmr.msra.gmra.mrb[12].mxu1 %vm429_vm7, %v453_v28  ;;  %5098 = vmatmul.mubr.msk.bf16.vlgmr.msra.gmra.mrb[8].mxu0 %vm333_vm6, %v549_v29 }
 0x60b   :  { %5102 = vmatpush3.bf16.xpose.msra.mxu1 %v606_v31  ;;  %5103 = vmatprep.mubr.msk.bf16.mxu1 %vm5889_vm4, %v5888_v15 }
 0x60c   :  { %5113 = vmatprep.subr.bf16.mxu1 %v5888_v15  ;;  %5109 = vmatprep.mubr.msk.bf16.mxu0 %vm5889_vm4, %v5888_v15 }
 0x612   :  { %5104 = vmatmul.mubr.msk.bf16.vlgmr.msra.gmra.mrb[16].mxu1 %vm333_vm6, %v599_v32 }
 0x613   :  { %5115 = vmatprep.mubr.msk.bf16.mxu1 %vm5889_vm4, %v5888_v15 }
 0x6d5   :  { %v6118_v34 = vpop.f32.mrb[4].mxu0 }
 0x6d6   :  { %v5087_v35 = vpop.f32.mrb[5].mxu0 }
 0x6d7   :  { %v498_v36 = vpop.f32.mrb[6].mxu0 }
 0x6d8   :  { %v5088_v37 = vpop.f32.mrb[7].mxu0 }
 0x6dd   :  { %v6120_v39 = vpop.f32.mrb[12].mxu1  ;;  %v592_v40 = vpop.f32.mrb[8].mxu0 }
 0x6de   :  { %v547_v41 = vpack.c.bf16 %v6120_v39, %v6118_v34  ;;  %v593_v42 = vadd.f32 %v592_v40, %v6083_v50  ;;  %v5093_v43 = vpop.f32.mrb[13].mxu1  ;;  %v5099_v44 = vpop.f32.mrb[9].mxu0 }
 0x6df   :  { %v544_v45 = vpop.f32.mrb[14].mxu1  ;;  %v595_v46 = vpop.f32.mrb[10].mxu0 }
 0x6e0   :  { %v5094_v47 = vpop.f32.mrb[15].mxu1  ;;  %v5100_v48 = vpop.f32.mrb[11].mxu0  ;;  %v648_v49 = vsel %vm429_vm7, %v593_v42, -inf }
 0x6e1   :  { %649 = vmax.xlane.f32.xlu0 %v648_v49 }
 0x6e5   :  { %v642_v51 = vpop.f32.mrb[16].mxu1 }
 0x6e6   :  { %v643_v52 = vadd.f32 %v642_v51, %v6088_v58  ;;  %v5105_v53 = vpop.f32.mrb[17].mxu1 }
 0x6e7   :  { %v645_v54 = vpop.f32.mrb[18].mxu1 }
 0x6e8   :  { %v5106_v55 = vpop.f32.mrb[19].mxu1  ;;  %v651_v56 = vsel %vm429_vm7, %v643_v52, -inf }
 0x6e9   :  { %652 = vmax.xlane.f32.xlu1 %v651_v56 }
 0x6fa   :  { %722 = vrot.lane.b32.xlu1 %v6070_v38, %s5893_s29 }
 0x6fe   :  { %873 = vrot.lane.b32.xlu1 %v6049_v27, %s5894_s30 }
 0x702   :  { %871 = vrot.lane.b32.xlu1 %v6049_v27, %s5895_s6 }
 0x76e   :  { %v650_v57 = vpop.xlane.xlu0 %649 }
 0x76f   :  { %v654_v59 = vsub.f32 %v593_v42, %v650_v57 }
 0x771   :  { %v656_v60 = vmul.f32 1.442695, %v654_v59 }
 0x773   :  { %5607 = vpow2.f32 %v656_v60 }
 0x776   :  { %v653_v61 = vpop.xlane.xlu1 %652 }
 0x777   :  { %v655_v62 = vsub.f32 %v643_v52, %v653_v61 }
 0x779   :  { %v658_v63 = vmul.f32 1.442695, %v655_v62 }
 0x77a   :  { %v723_v0 = vpop.permute.xlu1 %722 }
 0x77b   :  { %5609 = vpow2.f32 %v658_v63  ;;  %v728_v1 = vsel %vm457_vm5, %v723_v0, 0 }
 0x77c   :  { %5114 = vmatpush3.bf16.msra.mxu1 %v728_v1 }
 0x77d   :  { %v5608_v3 = vpop.eup %5607  ;;  %5125 = vmatprep.subr.bf16.mxu1 %v5888_v15 }
 0x77e   :  { %v660_v4 = vsel %vm429_vm7, %v5608_v3, 0.0  ;;  %v874_v34 = vpop.permute.xlu1 %873 }
 0x77f   :  { %661 = vadd.xlane.f32.xlu0 %v660_v4  ;;  %v879_v40 = vsel %vm333_vm6, %v874_v34, 0 }
 0x782   :  { %v872_v44 = vpop.permute.xlu1 %871 }
 0x785   :  { %v5610_v5 = vpop.eup %5609 }
 0x786   :  { %v663_v6 = vsel %vm429_vm7, %v5610_v5, 0.0 }
 0x787   :  { %664 = vadd.xlane.f32.xlu0 %v663_v6 }
 0x79d   :  { %673 = vrot.lane.b32.xlu0 %v6051_v30, %s5893_s29 }
 0x7a1   :  { %923 = vrot.lane.b32.xlu0 %v6057_v33, %s5894_s30 }
 0x7a5   :  { %921 = vrot.lane.b32.xlu0 %v6057_v33, %s5895_s6 }
 0x80c   :  { %v662_v7 = vpop.xlane.xlu0 %661 }
 0x80d   :  { %5611 = vrcp.f32 %v662_v7 }
 0x814   :  { %v665_v8 = vpop.xlane.xlu0 %664 }
 0x815   :  { %5613 = vrcp.f32 %v665_v8 }
 0x817   :  { %v5612_v9 = vpop.eup %5611 }
 0x818   :  { %v674_v10 = vpop.permute.xlu0 %673  ;;  %v668_v11 = vmul.f32 %v5612_v9, %v5608_v3 }
 0x819   :  { %v679_v14 = vsel %vm457_vm5, %v674_v10, 0 }
 0x81a   :  { %5108 = vmatpush3.bf16.msra.mxu0 %v679_v14  ;;  %v670_v16 = vpack.c.bf16 %v668_v11, %v668_v11 }
 0x81b   :  { %5119 = vmatprep.subr.bf16.mxu0 %v5888_v15 }
 0x81c   :  { %v924_v23 = vpop.permute.xlu0 %923 }
 0x81d   :  { %5110 = vmatmul.mubr.msk.bf16.vlgmr.msra.gmra.mrb[12].mxu0 %vm429_vm7, %v670_v16  ;;  %v929_v24 = vsel %vm333_vm6, %v924_v23, 0 }
 0x81e   :  { %5121 = vmatprep.mubr.msk.bf16.mxu0 %vm5889_vm4, %v5888_v15  ;;  %5120 = vmatpush3.bf16.msra.mxu0 %v5530_v26 }
 0x81f   :  { %v5614_v18 = vpop.eup %5613  ;;  %5131 = vmatprep.subr.bf16.mxu0 %v5888_v15 }
 0x820   :  { %v669_v20 = vmul.f32 %v5614_v18, %v5610_v5  ;;  %v922_v25 = vpop.permute.xlu0 %921 }
 0x822   :  { %v671_v22 = vpack.c.bf16 %v669_v20, %v669_v20 }
 0x824   :  { %5116 = vmatmul.mubr.msk.bf16.vlgmr.msra.gmra.mrb[20].mxu1 %vm429_vm7, %v671_v22 }
 0x825   :  { %5126 = vmatpush3.bf16.msra.mxu1 %v5529_v21  ;;  %5127 = vmatprep.mubr.msk.bf16.mxu1 %vm5889_vm4, %v5888_v15 }
 0x826   :  { %5137 = vmatprep.subr.bf16.mxu1 %v5888_v15 }
 0x82c   :  { %5128 = vmatmul.mubr.msk.bf16.vlgmr.msra.gmra.mrb[24].mxu1 %vm333_vm6, %v547_v41 }
 0x82d   :  { %5139 = vmatprep.mubr.msk.bf16.mxu1 %vm5889_vm4, %v5888_v15 }
 0x82e   :  { %5138 = vmatpush3.bf16.xpose.msra.mxu1 %v929_v24 }
 0x82f   :  { %5149 = vmatprep.subr.bf16.mxu1 %v5888_v15 }
 0x835   :  { %5140 = vmatmul.mubr.msk.bf16.vlgmr.msra.gmra.mrb[28].mxu1 %vm333_vm6, %v922_v25 }
 0x836   :  { %5151 = vmatprep.mubr.msk.bf16.mxu1 %vm5889_vm4, %v5888_v15 }
 0x8f0   :  { %v715_v28 = vpop.f32.mrb[12].mxu0 }
 0x8f1   :  { %v5111_v29 = vpop.f32.mrb[13].mxu0 }
 0x8f2   :  { %v718_v31 = vpop.f32.mrb[14].mxu0 }
 0x8f3   :  { %v5112_v32 = vpop.f32.mrb[15].mxu0 }
 0x8f7   :  { %v764_v35 = vpop.f32.mrb[20].mxu1 }
 0x8f8   :  { %v770_v36 = vpack.c.bf16 %v764_v35, %v715_v28  ;;  %v5117_v37 = vpop.f32.mrb[21].mxu1  ;;  %v5531_v35 = vld [vmem:[%s7108_s3 + $0x60] ss:$8 sps:$4 sm:$0xff]  }
 0x8f9   :  { %v767_v39 = vpop.f32.mrb[22].mxu1 }
 0x8fa   :  { %v5118_v41 = vpop.f32.mrb[23].mxu1  ;;  %5122 = vmatmul.mubr.msk.bf16.vlgmr.msra.gmra.mrb[16].mxu0 %vm333_vm6, %v770_v36 }
 0x8fb   :  { %5132 = vmatpush3.bf16.xpose.msra.mxu0 %v879_v40  ;;  %5133 = vmatprep.mubr.msk.bf16.mxu0 %vm5889_vm4, %v5888_v15 }
 0x8fc   :  { %5143 = vmatprep.subr.bf16.mxu0 %v5888_v15 }
 0x8ff   :  { %v864_v42 = vpop.f32.mrb[24].mxu1 }
 0x900   :  { %v5129_v43 = vpop.f32.mrb[25].mxu1 }
 0x901   :  { %v867_v45 = vpop.f32.mrb[26].mxu1 }
 0x902   :  { %v5130_v46 = vpop.f32.mrb[27].mxu1  ;;  %5134 = vmatmul.mubr.msk.bf16.vlgmr.msra.gmra.mrb[20].mxu0 %vm333_vm6, %v872_v44 }
 0x903   :  { %5145 = vmatprep.mubr.msk.bf16.mxu0 %vm5889_vm4, %v5888_v15 }
 0x908   :  { %v965_v47 = vpop.f32.mrb[28].mxu1 }
 0x909   :  { %v966_v48 = vadd.f32 %v965_v47, %v6088_v58  ;;  %v5141_v49 = vpop.f32.mrb[29].mxu1 }
 0x90a   :  { %v968_v51 = vpop.f32.mrb[30].mxu1 }
 0x90b   :  { %v5142_v52 = vpop.f32.mrb[31].mxu1  ;;  %v974_v53 = vsel %vm429_vm7, %v966_v48, -inf }
 0x90c   :  { %975 = vmax.xlane.f32.xlu0 %v974_v53 }
 0x999   :  { %v976_v54 = vpop.xlane.xlu0 %975 }
 0x99a   :  { %v978_v55 = vsub.f32 %v966_v48, %v976_v54 }
 0x99c   :  { %v981_v56 = vmul.f32 1.442695, %v978_v55 }
 0x99e   :  { %5615 = vpow2.f32 %v981_v56 }
 0x9a8   :  { %v5616_v7 = vpop.eup %5615 }
 0x9a9   :  { %v986_v8 = vsel %vm429_vm7, %v5616_v7, 0.0 }
 0x9cd   :  { %v814_v57 = vpop.f32.mrb[16].mxu0 }
 0x9ce   :  { %v6181_v59 = vadd.f32 %v864_v42, %v814_v57  ;;  %v5123_v60 = vpop.f32.mrb[17].mxu0 }
 0x9cf   :  { %v817_v61 = vpop.f32.mrb[18].mxu0 }
 0x9d0   :  { %v6183_v62 = vadd.f32 %v867_v45, %v817_v61  ;;  %v5124_v63 = vpop.f32.mrb[19].mxu0 }
 0x9d5   :  { %v915_v0 = vpop.f32.mrb[20].mxu0 }
 0x9d6   :  { %v916_v1 = vadd.f32 %v915_v0, %v6083_v50  ;;  %v5135_v3 = vpop.f32.mrb[21].mxu0 }
 0x9d7   :  { %v918_v4 = vpop.f32.mrb[22].mxu0 }
 0x9d8   :  { %v5136_v5 = vpop.f32.mrb[23].mxu0  ;;  %v971_v6 = vsel %vm429_vm7, %v916_v1, -inf }
 0x9d9   :  { %972 = vmax.xlane.f32.xlu1 %v971_v6 }
 0x9dd   :  { %987 = vadd.xlane.f32.xlu1 %v986_v8 }
 0x9ee   :  { %1043 = vrot.lane.b32.xlu1 %v6070_v38, %s5895_s6 }
 0x9f2   :  { %1146 = vrot.lane.b32.xlu1 %v6049_v27, %s5896_s11 }
 0x9f6   :  { %1144 = vrot.lane.b32.xlu1 %v6049_v27, %s5897_s12 }
 0xa66   :  { %v973_v9 = vpop.xlane.xlu1 %972 }
 0xa67   :  { %v977_v10 = vsub.f32 %v916_v1, %v973_v9 }
 0xa69   :  { %v979_v11 = vmul.f32 1.442695, %v977_v10 }
 0xa6a   :  { %v988_v14 = vpop.xlane.xlu1 %987 }
 0xa6b   :  { %5617 = vpow2.f32 %v979_v11 }
 0xa6c   :  { %5619 = vrcp.f32 %v988_v14 }
 0xa6e   :  { %v1044_v16 = vpop.permute.xlu1 %1043 }
 0xa6f   :  { %v1049_v18 = vsel %vm457_vm5, %v1044_v16, 0 }
 0xa70   :  { %5150 = vmatpush3.bf16.msra.mxu1 %v1049_v18 }
 0xa71   :  { %5161 = vmatprep.subr.bf16.mxu1 %v5888_v15 }
 0xa72   :  { %v1147_v24 = vpop.permute.xlu1 %1146 }
 0xa73   :  { %v1152_v25 = vsel %vm333_vm6, %v1147_v24, 0 }
 0xa75   :  { %v5618_v20 = vpop.eup %5617 }
 0xa76   :  { %v5620_v21 = vpop.eup %5619  ;;  %v983_v22 = vsel %vm429_vm7, %v5618_v20, 0.0  ;;  %v1145_v26 = vpop.permute.xlu1 %1144 }
 0xa77   :  { %984 = vadd.xlane.f32.xlu0 %v983_v22  ;;  %v992_v23 = vmul.f32 %v5620_v21, %v5616_v7 }
 0xa79   :  { %v994_v27 = vpack.c.bf16 %v992_v23, %v992_v23 }
 0xa7b   :  { %5152 = vmatmul.mubr.msk.bf16.vlgmr.msra.gmra.mrb[32].mxu1 %vm429_vm7, %v994_v27 }
 0xa7c   :  { %5162 = vmatpush3.bf16.xpose.msra.mxu1 %v1152_v25  ;;  %5163 = vmatprep.mubr.msk.bf16.mxu1 %vm5889_vm4, %v5888_v15 }
 0xa7d   :  { %5173 = vmatprep.subr.bf16.mxu1 %v5888_v15 }
 0xa83   :  { %5164 = vmatmul.mubr.msk.bf16.vlgmr.msra.gmra.mrb[36].mxu1 %vm333_vm6, %v1145_v26 }
 0xa84   :  { %5175 = vmatprep.mubr.msk.bf16.mxu1 %vm5889_vm4, %v5888_v15 }
 0xa8d   :  { %995 = vrot.lane.b32.xlu0 %v6051_v30, %s5895_s6 }
 0xa91   :  { %1196 = vrot.lane.b32.xlu0 %v6057_v33, %s5896_s11 }
 0xa95   :  { %1194 = vrot.lane.b32.xlu0 %v6057_v33, %s5897_s12 }
 0xb04   :  { %v985_v28 = vpop.xlane.xlu0 %984 }
 0xb05   :  { %5621 = vrcp.f32 %v985_v28 }
 0xb08   :  { %v996_v29 = vpop.permute.xlu0 %995 }
 0xb09   :  { %v1001_v31 = vsel %vm457_vm5, %v996_v29, 0 }
 0xb0a   :  { %5144 = vmatpush3.bf16.msra.mxu0 %v1001_v31 }
 0xb0b   :  { %5155 = vmatprep.subr.bf16.mxu0 %v5888_v15 }
 0xb0c   :  { %v1197_v47 = vpop.permute.xlu0 %1196 }
 0xb0d   :  { %v1202_v53 = vsel %vm333_vm6, %v1197_v47, 0 }
 0xb0f   :  { %v5622_v32 = vpop.eup %5621 }
 0xb10   :  { %v991_v34 = vmul.f32 %v5622_v32, %v5618_v20  ;;  %v1195_v55 = vpop.permute.xlu0 %1194 }
 0xb12   :  { %v993_v36 = vpack.c.bf16 %v991_v34, %v991_v34 }
 0xb14   :  { %5146 = vmatmul.mubr.msk.bf16.vlgmr.msra.gmra.mrb[24].mxu0 %vm429_vm7, %v993_v36 }
 0xb15   :  { %5156 = vmatpush3.bf16.msra.mxu0 %v5531_v35  ;;  %5157 = vmatprep.mubr.msk.bf16.mxu0 %vm5889_vm4, %v5888_v15 }
 0xb16   :  { %5167 = vmatprep.subr.bf16.mxu0 %v5888_v15 }
 0xb4e   :  { %v1085_v33 = vpop.f32.mrb[32].mxu1 }
 0xb4f   :  { %v5153_v37 = vpop.f32.mrb[33].mxu1 }
 0xb50   :  { %v1088_v39 = vpop.f32.mrb[34].mxu1 }
 0xb51   :  { %v5154_v40 = vpop.f32.mrb[35].mxu1 }
 0xb56   :  { %v1188_v41 = vpop.f32.mrb[36].mxu1 }
 0xb57   :  { %v1189_v42 = vadd.f32 %v1188_v41, %v6083_v50  ;;  %v5165_v43 = vpop.f32.mrb[37].mxu1 }
 0xb58   :  { %v1191_v44 = vpop.f32.mrb[38].mxu1 }
 0xb59   :  { %v5166_v45 = vpop.f32.mrb[39].mxu1  ;;  %v1244_v46 = vsel %vm429_vm7, %v1189_v42, -inf  ;;  %v1417_v44 = vld [vmem:[%s7109_s4 + $0x13] ss:$0 sm:$0xff] }
 0xb5a   :  { %1245 = vmax.xlane.f32.xlu1 %v1244_v46 }
 0xbe7   :  { %v1037_v48 = vpop.f32.mrb[24].mxu0  ;;  %v1246_v56 = vpop.xlane.xlu1 %1245 }
 0xbe8   :  { %v1091_v49 = vpack.c.bf16 %v1085_v33, %v1037_v48  ;;  %v5147_v51 = vpop.f32.mrb[25].mxu0  ;;  %v1250_v57 = vsub.f32 %v1189_v42, %v1246_v56 }
 0xbe9   :  { %v1040_v52 = vpop.f32.mrb[26].mxu0 }
 0xbea   :  { %v5148_v54 = vpop.f32.mrb[27].mxu0  ;;  %5158 = vmatmul.mubr.msk.bf16.vlgmr.msra.gmra.mrb[28].mxu0 %vm333_vm6, %v1091_v49  ;;  %v1252_v60 = vmul.f32 1.442695, %v1250_v57 }
 0xbeb   :  { %5168 = vmatpush3.bf16.xpose.msra.mxu0 %v1202_v53  ;;  %5169 = vmatprep.mubr.msk.bf16.mxu0 %vm5889_vm4, %v5888_v15 }
 0xbec   :  { %5179 = vmatprep.subr.bf16.mxu0 %v5888_v15  ;;  %5623 = vpow2.f32 %v1252_v60 }
 0xbf2   :  { %5170 = vmatmul.mubr.msk.bf16.vlgmr.msra.gmra.mrb[32].mxu0 %vm333_vm6, %v1195_v55 }
 0xbf3   :  { %5181 = vmatprep.mubr.msk.bf16.mxu0 %vm5889_vm4, %v5888_v15 }
 0xbf6   :  { %v5624_v11 = vpop.eup %5623 }
 0xcbd   :  { %v1135_v61 = vpop.f32.mrb[28].mxu0 }
 0xcbe   :  { %v6231_v63 = vadd.f32 %v1135_v61, %v6181_v59  ;;  %v5159_v0 = vpop.f32.mrb[29].mxu0  ;;  %v1256_v59 = vsel %vm429_vm7, %v5624_v11, 0.0 }
 0xcbf   :  { %v1138_v1 = vpop.f32.mrb[30].mxu0 }
 0xcc0   :  { %v6234_v3 = vadd.f32 %v1138_v1, %v6183_v62  ;;  %v5160_v4 = vpop.f32.mrb[31].mxu0 }
 0xcc5   :  { %v1238_v5 = vpop.f32.mrb[32].mxu0 }
 0xcc6   :  { %v1239_v6 = vadd.f32 %v1238_v5, %v6088_v58  ;;  %v5171_v7 = vpop.f32.mrb[33].mxu0 }
 0xcc7   :  { %v1241_v8 = vpop.f32.mrb[34].mxu0  ;;  %v5535_v7 = vld [vmem:[%s7108_s3 + $0xa0] ss:$8 sps:$4 sm:$0xff]  }
 0xcc8   :  { %v5172_v9 = vpop.f32.mrb[35].mxu0  ;;  %v1247_v10 = vsel %vm429_vm7, %v1239_v6, -inf  ;;  %v5536_v8 = vld [vmem:[%s7108_s3 + $0xb0] ss:$8 sps:$4 sm:$0xff]  }
 0xcc9   :  { %1248 = vmax.xlane.f32.xlu0 %v1247_v10 }
 0xccd   :  { %1257 = vadd.xlane.f32.xlu0 %v1256_v59 }
 0xce3   :  { %1268 = vrot.lane.b32.xlu0 %v6051_v30, %s5897_s12  ;;  %v5532_v30 = vld [vmem:[%s7108_s3 + $0x70] ss:$8 sps:$4 sm:$0xff]  }
 0xd56   :  { %v1249_v14 = vpop.xlane.xlu0 %1248 }
 0xd57   :  { %v1251_v62 = vsub.f32 %v1239_v6, %v1249_v14  ;;  %v5534_v6 = vld [vmem:[%s7108_s3 + $0x90] ss:$8 sps:$4 sm:$0xff]  }
 0xd59   :  { %v1254_v16 = vmul.f32 1.442695, %v1251_v62 }
 0xd5a   :  { %v1258_v18 = vpop.xlane.xlu0 %1257 }
 0xd5b   :  { %5625 = vpow2.f32 %v1254_v16 }
 0xd5c   :  { %5627 = vrcp.f32 %v1258_v18  ;;  %v1422_v18 = vld [vmem:[%s7109_s4 + $0x14] ss:$0 sm:$0xff] }
 0xd5e   :  { %v1269_v20 = vpop.permute.xlu0 %1268 }
 0xd5f   :  { %v1274_v21 = vsel %vm457_vm5, %v1269_v20, 0 }
 0xd60   :  { %5174 = vmatpush3.bf16.msra.mxu1 %v1274_v21 }
 0xd61   :  { %5185 = vmatprep.subr.bf16.mxu1 %v5888_v15 }
 0xd65   :  { %v5626_v22 = vpop.eup %5625 }
 0xd66   :  { %v5628_v23 = vpop.eup %5627  ;;  %v1259_v24 = vsel %vm429_vm7, %v5626_v22, 0.0 }
 0xd67   :  { %1260 = vadd.xlane.f32.xlu1 %v1259_v24  ;;  %v1264_v27 = vmul.f32 %v5628_v23, %v5624_v11  ;;  %v1423_v24 = vld [vmem:[%s7109_s4 + $0x15] ss:$0 sm:$0xff] }
 0xd69   :  { %v1266_v25 = vpack.c.bf16 %v1264_v27, %v1264_v27 }
 0xd6b   :  { %5176 = vmatmul.mubr.msk.bf16.vlgmr.msra.gmra.mrb[40].mxu1 %vm429_vm7, %v1266_v25 }
 0xd6c   :  { %5187 = vmatprep.mubr.msk.bf16.mxu1 %vm5889_vm4, %v5888_v15  ;;  %5186 = vmatpush3.bf16.msra.mxu1 %v5532_v30 }
 0xd6d   :  { %5203 = vmatprep.subr.bf16.mxu1 %v5888_v15 }
 0xd78   :  { %1316 = vrot.lane.b32.xlu1 %v6070_v38, %s5897_s12 }
 0xdf4   :  { %v1261_v26 = vpop.xlane.xlu1 %1260 }
 0xdf5   :  { %5629 = vrcp.f32 %v1261_v26 }
 0xdf8   :  { %v1317_v28 = vpop.permute.xlu1 %1316 }
 0xdf9   :  { %v1322_v29 = vsel %vm457_vm5, %v1317_v28, 0  ;;  %v5537_v28 = vld [vmem:[%s7108_s3 + $0xc0] ss:$8 sps:$4 sm:$0xff]  }
 0xdfa   :  { %5180 = vmatpush3.bf16.msra.mxu0 %v1322_v29  ;;  %v5538_v29 = vld [vmem:[%s7108_s3 + $0xd0] ss:$8 sps:$4 sm:$0xff]  }
 0xdfb   :  { %5191 = vmatprep.subr.bf16.mxu0 %v5888_v15 }
 0xdff   :  { %v5630_v31 = vpop.eup %5629 }
 0xe00   :  { %v1265_v32 = vmul.f32 %v5630_v31, %v5626_v22  ;;  %v5539_v31 = vld [vmem:[%s7108_s3 + $0xe0] ss:$8 sps:$4 sm:$0xff]  }
 0xe02   :  { %v1267_v34 = vpack.c.bf16 %v1265_v32, %v1265_v32  ;;  %v5540_v32 = vld [vmem:[%s7108_s3 + $0xf0] ss:$8 sps:$4 sm:$0xff]  }
 0xe04   :  { %5182 = vmatmul.mubr.msk.bf16.vlgmr.msra.gmra.mrb[36].mxu0 %vm429_vm7, %v1267_v34  ;;  %v5541_v34 = vld [vmem:[%s7108_s3 + $0x100] ss:$8 sps:$4 sm:$0xff]  }
 0xe05   :  { %5199 = vmatprep.mubr.msk.bf16.mxu0 %vm5889_vm4, %v5888_v15 }
 0xe3e   :  { %v1310_v38 = vpop.f32.mrb[40].mxu1 }
 0xe3f   :  { %v5177_v35 = vpop.f32.mrb[41].mxu1 }
 0xe40   :  { %v1313_v36 = vpop.f32.mrb[42].mxu1  ;;  %v5543_v35 = vld [vmem:[%s7108_s3 + $0x120] ss:$8 sps:$4 sm:$0xff]  }
 0xe41   :  { %v5178_v33 = vpop.f32.mrb[43].mxu1  ;;  %v5544_v36 = vld [vmem:[%s7108_s3 + $0x130] ss:$8 sps:$4 sm:$0xff]  }
 0xe42   :  { %v1463_v33 = vld [vmem:[%s7109_s4 + $0x16] ss:$0 sm:$0xff] }
 0xed7   :  { %v1358_v37 = vpop.f32.mrb[36].mxu0 }
 0xed8   :  { %v1364_v39 = vpack.c.bf16 %v1358_v37, %v1310_v38  ;;  %v5183_v40 = vpop.f32.mrb[37].mxu0  ;;  %v5542_v38 = vld [vmem:[%s7108_s3 + $0x110] ss:$8 sps:$4 sm:$0xff]  }
 0xed9   :  { %v1361_v41 = vpop.f32.mrb[38].mxu0 }
 0xeda   :  { %v5184_v42 = vpop.f32.mrb[39].mxu0  ;;  %5188 = vmatmul.mubr.msk.bf16.vlgmr.msra.gmra.mrb[44].mxu1 %vm333_vm6, %v1364_v39 }
 0xedb   :  { %5219 = vmatprep.mubr.msk.bf16.mxu1 %vm5889_vm4, %v5888_v15  ;;  %5204 = vmatpush3.bf16.msra.mxu1 %v5537_v28  ;;  %v5548_v28 = vld [vmem:[%s7108_s3 + $0x150] ss:$8 sps:$4 sm:$0xff]  }
 0xedc   :  { %5205 = vmatprep.subr.bf16.mxu1 %v5888_v15 }
 0xedf   :  { %5206 = vmatpush3.bf16.msra.mxu1 %v5538_v29  ;;  %v5553_v29 = vld [vmem:[%s7108_s3 + $0x164] ss:$8 sps:$4 sm:$0xff]  }
 0xee0   :  { %5207 = vmatprep.subr.bf16.mxu1 %v5888_v15 }
 0xee3   :  { %5208 = vmatpush3.bf16.msra.mxu1 %v5539_v31  ;;  %v5551_v31 = vld [vmem:[%s7108_s3 + $0x160] ss:$8 sps:$4 sm:$0xff]  }
 0xee4   :  { %5209 = vmatprep.subr.bf16.mxu1 %v5888_v15 }
 0xee7   :  { %5210 = vmatpush3.bf16.msra.mxu1 %v5540_v32  ;;  %v5556_v32 = vld [vmem:[%s7108_s3 + $0x174] ss:$8 sps:$4 sm:$0xff]  }
 0xee8   :  { %5211 = vmatprep.subr.bf16.mxu1 %v5888_v15 }
 0xeeb   :  { %5212 = vmatpush3.bf16.msra.mxu1 %v5541_v34  ;;  %v5554_v34 = vld [vmem:[%s7108_s3 + $0x170] ss:$8 sps:$4 sm:$0xff]  }
 0xeec   :  { %5213 = vmatprep.subr.bf16.mxu1 %v5888_v15 }
 0xeef   :  { %5214 = vmatpush3.bf16.msra.mxu1 %v5542_v38 }
 0xef0   :  { %5215 = vmatprep.subr.bf16.mxu1 %v5888_v15 }
 0xef3   :  { %5216 = vmatpush3.bf16.msra.mxu1 %v5543_v35 }
 0xef4   :  { %5217 = vmatprep.subr.bf16.mxu1 %v5888_v15 }
 0xef7   :  { %5218 = vmatpush3.bf16.msra.mxu1 %v5544_v36 }
 0xef8   :  { %5229 = vmatprep.subr.bf16.mxu1 %v5888_v15 }
 0xfad   :  { %v1408_v43 = vpop.f32.mrb[44].mxu1 }
 0xfae   :  { %v1415_v45 = vadd.f32 %v1408_v43, %v6231_v63  ;;  %v5189_v46 = vpop.f32.mrb[45].mxu1 }
 0xfaf   :  { %v1411_v47 = vpop.f32.mrb[46].mxu1 }
 0xfb0   :  { %v1418_v48 = vadd.f32 %v1417_v44, %v1415_v45  ;;  %v1416_v49 = vadd.f32 %v1411_v47, %v6234_v3  ;;  %v5190_v51 = vpop.f32.mrb[47].mxu1 }
 0xfb2   :  { %v1419_v52 = vadd.f32 %v1417_v44, %v1416_v49  ;;  %v1420_v53 = vadd.f32 %v1418_v48, %v6026_v12 }
 0xfb4   :  { %v1424_v54 = vsel %vm142_vm3, %v1420_v53, 0.0  ;;  %v1421_v55 = vadd.f32 %v1419_v52, %v6028_v13  ;;  %v5533_v13 = vld [vmem:[%s7108_s3 + $0x80] ss:$8 sps:$4 sm:$0xff]  }
 0xfb5   :  { %1425 = vadd.xlane.f32.xlu1 %v1424_v54  ;;  %5192 = vmatpush3.bf16.msra.mxu0 %v5533_v13 }
 0xfb6   :  { %v1427_v56 = vsel %vm142_vm3, %v1421_v55, 0.0  ;;  %5193 = vmatprep.subr.bf16.mxu0 %v5888_v15 }
 0xfb7   :  { %1428 = vadd.xlane.f32.xlu0 %v1427_v56 }
 0xfb9   :  { %5194 = vmatpush3.bf16.msra.mxu0 %v5534_v6 }
 0xfba   :  { %5195 = vmatprep.subr.bf16.mxu0 %v5888_v15 }
 0xfbd   :  { %5196 = vmatpush3.bf16.msra.mxu0 %v5535_v7 }
 0xfbe   :  { %5197 = vmatprep.subr.bf16.mxu0 %v5888_v15 }
 0xfc1   :  { %5198 = vmatpush3.bf16.msra.mxu0 %v5536_v8 }
0x1042   :  { %v1426_v57 = vpop.xlane.xlu1 %1425 }
0x1043   :  { %v1430_v60 = vmul.f32 0.015625, %v1426_v57 }
0x1044   :  { %v1429_v61 = vpop.xlane.xlu0 %1428 }
0x1045   :  { %v1432_v63 = vsub.f32 %v1420_v53, %v1430_v60  ;;  %v1431_v0 = vmul.f32 0.015625, %v1429_v61 }
0x1047   :  { %v1433_v1 = vsub.f32 %v1421_v55, %v1431_v0  ;;  %v1434_v4 = vmul.f32 %v1432_v63, %v1432_v63 }
0x1049   :  { %v1436_v3 = vsel %vm142_vm3, %v1434_v4, 0.0  ;;  %v1435_v5 = vmul.f32 %v1433_v1, %v1433_v1 }
0x104a   :  { %1437 = vadd.xlane.f32.xlu0 %v1436_v3  ;;  %v1567_v3 = vld [vmem:[%s7109_s4 + $0x17] ss:$0 sm:$0xff] }
0x104b   :  { %v1439_v12 = vsel %vm142_vm3, %v1435_v5, 0.0 }
0x104c   :  { %1440 = vadd.xlane.f32.xlu1 %v1439_v12 }
0x10d7   :  { %v1438_v9 = vpop.xlane.xlu0 %1437 }
0x10d8   :  { %v1442_v10 = vmul.f32 0.015625, %v1438_v9 }
0x10d9   :  { %v1441_v11 = vpop.xlane.xlu1 %1440 }
0x10da   :  { %v1444_v59 = vadd.f32 1e-12, %v1442_v10  ;;  %v1443_v14 = vmul.f32 0.015625, %v1441_v11 }
0x10dc   :  { %5631 = vrsqrt.f32 %v1444_v59  ;;  %v1445_v62 = vadd.f32 1e-12, %v1443_v14 }
0x10de   :  { %5633 = vrsqrt.f32 %v1445_v62 }
0x10e6   :  { %v5632_v16 = vpop.eup %5631 }
0x10e7   :  { %v1448_v20 = vmul.f32 %v5632_v16, %v1432_v63 }
0x10e8   :  { %v5634_v21 = vpop.eup %5633 }
0x10e9   :  { %v1450_v22 = vmul.f32 %v1448_v20, %v1422_v18  ;;  %v1449_v23 = vmul.f32 %v5634_v21, %v1433_v1 }
0x10eb   :  { %v1451_v27 = vmul.f32 %v1449_v23, %v1422_v18  ;;  %v6293_v25 = vadd.f32 %v1450_v22, %v1423_v24 }
0x10ed   :  { %v6295_v30 = vadd.f32 %v1451_v27, %v1423_v24 }
0x10ef   :  { %v1454_v26 = vpack.c.bf16 %v6295_v30, %v6293_v25 }
0x10f1   :  { %5200 = vmatmul.mubr.msk.bf16.vlgmr.msra.gmra.mrb[40].mxu0 %vm142_vm3, %v1454_v26  ;;  %v5550_v26 = vld [vmem:[%s7108_s3 + $0x154] ss:$8 sps:$4 sm:$0xff]  }
0x10f2   :  { %1788 = vmatprep.mubr.bf16.mxu0 %v5886_v2 }
0x11c4   :  { %v1525_v37 = vpop.f32.mrb[40].mxu0 }
0x11c5   :  { %v1526_v39 = vadd.f32 %v1525_v37, %v1463_v33  ;;  %v5201_v40 = vpop.f32.mrb[41].mxu0 }
0x11c6   :  { %v1528_v41 = vpop.f32.mrb[42].mxu0 }
0x11c7   :  { %v1532_v42 = vmul.f32 %v1526_v39, %v1526_v39  ;;  %v1529_v43 = vadd.f32 %v1528_v41, %v1463_v33  ;;  %v5202_v44 = vpop.f32.mrb[43].mxu0  ;;  %v1659_v41 = vld [vmem:[%s7109_s4 + $0x20] ss:$0 sm:$0xff] }
0x11c9   :  { %v1534_v45 = vmul.f32 %v1532_v42, %v1526_v39  ;;  %v1533_v46 = vmul.f32 %v1529_v43, %v1529_v43 }
0x11cb   :  { %v1536_v47 = vmul.f32 0.044715, %v1534_v45  ;;  %v1535_v48 = vmul.f32 %v1533_v46, %v1529_v43  ;;  %v1660_v46 = vld [vmem:[%s7109_s4 + $0x21] ss:$0 sm:$0xff] }
0x11cd   :  { %v1538_v49 = vadd.f32 %v1536_v47, %v1526_v39  ;;  %v1537_v51 = vmul.f32 0.044715, %v1535_v48 }
0x11cf   :  { %v1540_v52 = vmul.f32 0.7978846, %v1538_v49  ;;  %v1539_v53 = vadd.f32 %v1537_v51, %v1529_v43 }
0x11d1   :  { %5635 = vtanh.f32 %v1540_v52  ;;  %v1541_v54 = vmul.f32 0.7978846, %v1539_v53  ;;  %v4763_v52 = vld [vmem:[%s7109_s4 + $0x22] ss:$8 sm:$0x3] }
0x11d2   :  { %v1706_v53 = vrot.slane %v4763_v52, %v6036_v17 }
0x11d3   :  { %5637 = vtanh.f32 %v1541_v54 }
0x11db   :  { %v5636_v55 = vpop.eup %5635 }
0x11dc   :  { %v1544_v56 = vadd.f32 1.0, %v5636_v55 }
0x11dd   :  { %v5638_v57 = vpop.eup %5637 }
0x11de   :  { %v1546_v60 = vmul.f32 0.5, %v1544_v56  ;;  %v1545_v61 = vadd.f32 1.0, %v5638_v57 }
0x11e0   :  { %v1547_v63 = vmul.f32 0.5, %v1545_v61  ;;  %v1548_v0 = vmul.f32 %v1546_v60, %v1526_v39 }
0x11e2   :  { %v1549_v1 = vmul.f32 %v1547_v63, %v1529_v43 }
0x11e4   :  { %v1550_v4 = vpack.c.bf16 %v1549_v1, %v1548_v0  ;;  %v1710_v1 = vrot.slane %v4763_v52, %v6041_v19 }
0x11e6   :  { %5220 = vmatmul.mubr.bf16.vlgmr.msra.gmra.mrb[48].mxu1 %v1550_v4 }
0x11e7   :  { %5231 = vmatprep.mubr.msk.bf16.mxu1 %vm5889_vm4, %v5888_v15 }
0x12b9   :  { %v1650_v5 = vpop.f32.mrb[48].mxu1 }
0x12ba   :  { %v1651_v12 = vadd.f32 %v1650_v5, %v1567_v3  ;;  %v5221_v13 = vpop.f32.mrb[49].mxu1 }
0x12bb   :  { %v1653_v6 = vpop.f32.mrb[50].mxu1 }
0x12bc   :  { %v1654_v7 = vadd.f32 %v1653_v6, %v1567_v3  ;;  %v5222_v8 = vpop.f32.mrb[51].mxu1  ;;  %v1657_v9 = vadd.f32 %v1651_v12, %v6293_v25  ;;  %v5547_v25 = vld [vmem:[%s7108_s3 + $0x144] ss:$8 sps:$4 sm:$0xff]  }
0x12bd   :  { %1756 = vmatprep.subr.bf16.mxu0 %v5547_v25 }
0x12be   :  { %v1661_v10 = vsel %vm142_vm3, %v1657_v9, 0.0  ;;  %v1658_v11 = vadd.f32 %v1654_v7, %v6295_v30  ;;  %v5545_v30 = vld [vmem:[%s7108_s3 + $0x140] ss:$8 sps:$4 sm:$0xff]  }
0x12bf   :  { %1662 = vadd.xlane.f32.xlu0 %v1661_v10  ;;  %1757 = vmatpush1.bf16.msra.mxu0 %v5545_v30 }
0x12c0   :  { %v1664_v59 = vsel %vm142_vm3, %v1658_v11, 0.0  ;;  %1758 = vmatprep.subr.bf16.mxu0 %v5550_v26 }
0x12c1   :  { %1665 = vadd.xlane.f32.xlu1 %v1664_v59 }
0x12c3   :  { %1759 = vmatpush1.bf16.msra.mxu0 %v5548_v28 }
0x12c4   :  { %1760 = vmatprep.subr.bf16.mxu0 %v5553_v29 }
0x12c7   :  { %1761 = vmatpush1.bf16.msra.mxu0 %v5551_v31 }
0x12c8   :  { %1762 = vmatprep.subr.bf16.mxu0 %v5556_v32 }
0x12cb   :  { %1763 = vmatpush1.bf16.msra.mxu0 %v5554_v34 }
0x12cc   :  { %5223 = vmatprep.subr.bf16.mxu0 %v5888_v15 }
0x134c   :  { %v1663_v14 = vpop.xlane.xlu0 %1662 }
0x134d   :  { %v1667_v62 = vmul.f32 0.015625, %v1663_v14 }
0x134e   :  { %v1666_v16 = vpop.xlane.xlu1 %1665 }
0x134f   :  { %v1669_v18 = vsub.f32 %v1657_v9, %v1667_v62  ;;  %v1668_v20 = vmul.f32 0.015625, %v1666_v16 }
0x1351   :  { %v1670_v21 = vsub.f32 %v1658_v11, %v1668_v20  ;;  %v1671_v22 = vmul.f32 %v1669_v18, %v1669_v18 }
0x1353   :  { %v1673_v23 = vsel %vm142_vm3, %v1671_v22, 0.0  ;;  %v1672_v24 = vmul.f32 %v1670_v21, %v1670_v21 }
0x1354   :  { %1674 = vadd.xlane.f32.xlu0 %v1673_v23 }
0x1355   :  { %v1676_v27 = vsel %vm142_vm3, %v1672_v24, 0.0 }
0x1356   :  { %1677 = vadd.xlane.f32.xlu1 %v1676_v27 }
0x13e1   :  { %v1675_v38 = vpop.xlane.xlu0 %1674 }
0x13e2   :  { %v1679_v35 = vmul.f32 0.015625, %v1675_v38 }
0x13e3   :  { %v1678_v36 = vpop.xlane.xlu1 %1677 }
0x13e4   :  { %v1681_v33 = vadd.f32 1e-12, %v1679_v35  ;;  %v1680_v37 = vmul.f32 0.015625, %v1678_v36 }
0x13e6   :  { %5639 = vrsqrt.f32 %v1681_v33  ;;  %v1682_v39 = vadd.f32 1e-12, %v1680_v37 }
0x13e8   :  { %5641 = vrsqrt.f32 %v1682_v39 }
0x13f0   :  { %v5640_v40 = vpop.eup %5639 }
0x13f1   :  { %v1685_v42 = vmul.f32 %v5640_v40, %v1669_v18 }
0x13f2   :  { %v5642_v43 = vpop.eup %5641 }
0x13f3   :  { %v1687_v44 = vmul.f32 %v1685_v42, %v1659_v41  ;;  %v1686_v45 = vmul.f32 %v5642_v43, %v1670_v21 }
0x13f5   :  { %v1688_v47 = vmul.f32 %v1686_v45, %v1659_v41  ;;  %v6378_v48 = vadd.f32 %v1687_v44, %v1660_v46 }
0x13f7   :  { %v6380_v49 = vadd.f32 %v1688_v47, %v1660_v46 }
0x13f9   :  { %v1691_v51 = vpack.c.bf16 %v6380_v49, %v6378_v48 }
0x13fb   :  { %4772 = vmatmul.mubr.msk.bf16.vlgmr.msra.gmra.mrb[44].mxu0 %vm142_vm3, %v1691_v51 }
0x13fc   :  { %5225 = vmatprep.mubr.msk.bf16.mxu0 %vm5889_vm4, %v5888_v15 }
0x14ce   :  { %v1790_v54 = vpop.f32.mrb[44].mxu0 }
0x14cf   :  { %v1791_v55 = vadd.f32 %v1790_v54, %v1706_v53  ;;  %v1792_v56 = vpop.f32.mrb[45].mxu0 }
0x14d0   :  { %v1794_v57 = vpop.f32.mrb[46].mxu0  ;;  %v1793_v3 = vadd.f32 %v1792_v56, %v1710_v1 }
0x14d1   :  { %v6391_v60 = vpack.c.bf16 %v1791_v55, %v1791_v55  ;;  %v1795_v61 = vadd.f32 %v1794_v57, %v1706_v53  ;;  %v1796_v63 = vpop.f32.mrb[47].mxu0 }
0x14d2   :  { %v1797_v13 = vadd.f32 %v1796_v63, %v1710_v1  ;;  %v6403_v7 = vpack.c.bf16 %v1793_v3, %v1793_v3 }
0x14d3   :  { %v6393_v0 = vpack.c.bf16 %v1795_v61, %v1795_v61  ;;  %1812 = vrot.lane.b32.xlu0 %v6391_v60, %s5890_s27 }
0x14d4   :  { %v6406_v8 = vpack.c.bf16 %v1797_v13, %v1797_v13  ;;  %v1937_v9 = vsel %vm457_vm5, %v6403_v7, 0 }
0x14d5   :  { %1861 = vrot.lane.b32.xlu1 %v6393_v0, %s5890_s27 }
0x14d6   :  { %v1983_v10 = vsel %vm457_vm5, %v6406_v8, 0 }
0x1545   :  { %v1813_v4 = vpop.permute.xlu0 %1812 }
0x1546   :  { %v1818_v5 = vsel %vm333_vm6, %v1813_v4, 0 }
0x1547   :  { %v1862_v12 = vpop.permute.xlu1 %1861  ;;  %5224 = vmatpush3.bf16.xpose.msra.mxu0 %v1818_v5 }
0x1548   :  { %v1867_v6 = vsel %vm333_vm6, %v1862_v12, 0  ;;  %5235 = vmatprep.subr.bf16.mxu0 %v5888_v15 }
0x1549   :  { %5230 = vmatpush3.bf16.xpose.msra.mxu1 %v1867_v6 }
0x154a   :  { %5241 = vmatprep.subr.bf16.mxu1 %v5888_v15 }
0x154e   :  { %5226 = vmatmul.mubr.msk.bf16.vlgmr.msra.gmra.mrb[48].mxu0 %vm333_vm6, %v6391_v60 }
0x154f   :  { %5236 = vmatpush3.bf16.msra.mxu0 %v1937_v9  ;;  %5237 = vmatprep.mubr.msk.bf16.mxu0 %vm5889_vm4, %v5888_v15 }
0x1550   :  { %5232 = vmatmul.mubr.msk.bf16.vlgmr.msra.gmra.mrb[52].mxu1 %vm333_vm6, %v6393_v0  ;;  %5247 = vmatprep.subr.bf16.mxu0 %v5888_v15 }
0x1551   :  { %5242 = vmatpush3.bf16.msra.mxu1 %v1983_v10  ;;  %5243 = vmatprep.mubr.msk.bf16.mxu1 %vm5889_vm4, %v5888_v15 }
0x1552   :  { %5253 = vmatprep.subr.bf16.mxu1 %v5888_v15 }
0x1621   :  { %v1854_v11 = vpop.f32.mrb[48].mxu0 }
0x1622   :  { %v1855_v59 = vadd.f32 %v1854_v11, %v6083_v50  ;;  %v5227_v14 = vpop.f32.mrb[49].mxu0 }
0x1623   :  { %v1857_v62 = vpop.f32.mrb[50].mxu0  ;;  %v1903_v16 = vpop.f32.mrb[52].mxu1 }
0x1624   :  { %v1904_v18 = vadd.f32 %v1903_v16, %v6088_v58  ;;  %v5228_v20 = vpop.f32.mrb[51].mxu0  ;;  %v5233_v21 = vpop.f32.mrb[53].mxu1  ;;  %v1909_v22 = vsel %vm429_vm7, %v1855_v59, -inf }
0x1625   :  { %1910 = vmax.xlane.f32.xlu1 %v1909_v22  ;;  %v1906_v23 = vpop.f32.mrb[54].mxu1 }
0x1626   :  { %v5234_v24 = vpop.f32.mrb[55].mxu1  ;;  %v1912_v27 = vsel %vm429_vm7, %v1904_v18, -inf }
0x1627   :  { %1913 = vmax.xlane.f32.xlu0 %v1912_v27 }
0x16b2   :  { %v1911_v25 = vpop.xlane.xlu1 %1910 }
0x16b3   :  { %v1915_v30 = vsub.f32 %v1855_v59, %v1911_v25 }
0x16b4   :  { %v1914_v26 = vpop.xlane.xlu0 %1913 }
0x16b5   :  { %v1917_v28 = vmul.f32 1.442695, %v1915_v30  ;;  %v1916_v29 = vsub.f32 %v1904_v18, %v1914_v26 }
0x16b7   :  { %5643 = vpow2.f32 %v1917_v28  ;;  %v1919_v31 = vmul.f32 1.442695, %v1916_v29 }
0x16b9   :  { %5645 = vpow2.f32 %v1919_v31 }
0x16c1   :  { %v5644_v32 = vpop.eup %5643 }
0x16c2   :  { %v1921_v34 = vsel %vm429_vm7, %v5644_v32, 0.0 }
0x16c3   :  { %v5646_v38 = vpop.eup %5645  ;;  %1922 = vadd.xlane.f32.xlu0 %v1921_v34 }
0x16c4   :  { %v1924_v35 = vsel %vm429_vm7, %v5646_v38, 0.0 }
0x16c5   :  { %1925 = vadd.xlane.f32.xlu1 %v1924_v35 }
0x16d6   :  { %2078 = vrot.lane.b32.xlu1 %v6393_v0, %s5892_s1 }
0x16d9   :  { %2028 = vrot.lane.b32.xlu0 %v6391_v60, %s5892_s1  ;;  %s5862_s1 = scalar_lea.vmem %s4705_s7, 32 }
0x16da   :  { %2026 = vrot.lane.b32.xlu1 %v6391_v60, %s5893_s29  ;;  %p5863_p0 = scmp.ne.s32.totalorder %s4705_s7, %s5862_s1  ;;  %p5868_p2 = scmp.lt.s32.totalorder %s5862_s1, %s5862_s1 }
0x16dc   :  { %p5869_p3 = por %p5868_p2, %p5867_p1 }
0x16dd   :  { %2076 = vrot.lane.b32.xlu0 %v6393_v0, %s5893_s29 }
0x16de   :  { %p5870_p4 = pnand %p5869_p3, %p5863_p0 }
0x1750   :  { %v1923_v36 = vpop.xlane.xlu0 %1922 }
0x1751   :  { %5647 = vrcp.f32 %v1923_v36 }
0x1752   :  { %v1926_v33 = vpop.xlane.xlu1 %1925 }
0x1753   :  { %5649 = vrcp.f32 %v1926_v33 }
0x1754   :  { %v2029_v41 = vpop.permute.xlu0 %2028 }
0x1755   :  { %v2034_v45 = vsel %vm333_vm6, %v2029_v41, 0  ;;  %v5557_v41 = vld [vmem:[%s7108_s3 + $0x180] ss:$8 sps:$4 sm:$0xff]  }
0x1756   :  { %v2079_v44 = vpop.permute.xlu1 %2078 }
0x1757   :  { %v2084_v47 = vsel %vm333_vm6, %v2079_v44, 0 }
0x1758   :  { %v2077_v52 = vpop.permute.xlu0 %2076 }
0x175a   :  { %v2027_v51 = vpop.permute.xlu1 %2026 }
0x175b   :  { %v5648_v37 = vpop.eup %5647 }
0x175c   :  { %v1929_v39 = vmul.f32 %v5648_v37, %v5644_v32  ;;  %v5558_v37 = vld [vmem:[%s7108_s3 + $0x190] ss:$8 sps:$4 sm:$0xff]  }
0x175d   :  { %v5650_v40 = vpop.eup %5649 }
0x175e   :  { %v1931_v42 = vpack.c.bf16 %v1929_v39, %v1929_v39  ;;  %v1930_v43 = vmul.f32 %v5650_v40, %v5646_v38 }
0x1760   :  { %5238 = vmatmul.mubr.msk.bf16.vlgmr.msra.gmra.mrb[52].mxu0 %vm429_vm7, %v1931_v42  ;;  %v1932_v46 = vpack.c.bf16 %v1930_v43, %v1930_v43 }
0x1761   :  { %5248 = vmatpush3.bf16.xpose.msra.mxu0 %v2034_v45  ;;  %5249 = vmatprep.mubr.msk.bf16.mxu0 %vm5889_vm4, %v5888_v15 }
0x1762   :  { %5244 = vmatmul.mubr.msk.bf16.vlgmr.msra.gmra.mrb[56].mxu1 %vm429_vm7, %v1932_v46  ;;  %5259 = vmatprep.subr.bf16.mxu0 %v5888_v15 }
0x1763   :  { %5254 = vmatpush3.bf16.xpose.msra.mxu1 %v2084_v47  ;;  %5255 = vmatprep.mubr.msk.bf16.mxu1 %vm5889_vm4, %v5888_v15 }
0x1764   :  { %5265 = vmatprep.subr.bf16.mxu1 %v5888_v15 }
0x1768   :  { %5250 = vmatmul.mubr.msk.bf16.vlgmr.msra.gmra.mrb[56].mxu0 %vm333_vm6, %v2027_v51 }
0x1769   :  { %5261 = vmatprep.mubr.msk.bf16.mxu0 %vm5889_vm4, %v5888_v15 }
0x176a   :  { %5256 = vmatmul.mubr.msk.bf16.vlgmr.msra.gmra.mrb[60].mxu1 %vm333_vm6, %v2077_v52 }
0x176b   :  { %5267 = vmatprep.mubr.msk.bf16.mxu1 %vm5889_vm4, %v5888_v15 }
0x1833   :  { %v6452_v53 = vpop.f32.mrb[52].mxu0 }
0x1834   :  { %v5239_v54 = vpop.f32.mrb[53].mxu0 }
0x1835   :  { %v1976_v55 = vpop.f32.mrb[54].mxu0  ;;  %v6454_v56 = vpop.f32.mrb[56].mxu1 }
0x1836   :  { %v2025_v57 = vpack.c.bf16 %v6454_v56, %v6452_v53  ;;  %v5240_v61 = vpop.f32.mrb[55].mxu0  ;;  %v5245_v63 = vpop.f32.mrb[57].mxu1 }
0x1837   :  { %v2022_v1 = vpop.f32.mrb[58].mxu1 }
0x1838   :  { %v5246_v4 = vpop.f32.mrb[59].mxu1 }
0x183b   :  { %v2070_v3 = vpop.f32.mrb[56].mxu0 }
0x183c   :  { %v2071_v5 = vadd.f32 %v2070_v3, %v6083_v50  ;;  %v5251_v12 = vpop.f32.mrb[57].mxu0 }
0x183d   :  { %v2073_v13 = vpop.f32.mrb[58].mxu0  ;;  %v2120_v6 = vpop.f32.mrb[60].mxu1 }
0x183e   :  { %v2121_v9 = vadd.f32 %v2120_v6, %v6088_v58  ;;  %v5252_v10 = vpop.f32.mrb[59].mxu0  ;;  %v5257_v11 = vpop.f32.mrb[61].mxu1  ;;  %v2126_v59 = vsel %vm429_vm7, %v2071_v5, -inf }
0x183f   :  { %2127 = vmax.xlane.f32.xlu1 %v2126_v59  ;;  %v2123_v14 = vpop.f32.mrb[62].mxu1 }
0x1840   :  { %v5258_v62 = vpop.f32.mrb[63].mxu1  ;;  %v2129_v16 = vsel %vm429_vm7, %v2121_v9, -inf }
0x1841   :  { %2130 = vmax.xlane.f32.xlu0 %v2129_v16 }
0x18cc   :  { %v2128_v18 = vpop.xlane.xlu1 %2127 }
0x18cd   :  { %v2132_v20 = vsub.f32 %v2071_v5, %v2128_v18 }
0x18ce   :  { %v2131_v21 = vpop.xlane.xlu0 %2130 }
0x18cf   :  { %v2134_v22 = vmul.f32 1.442695, %v2132_v20  ;;  %v2133_v23 = vsub.f32 %v2121_v9, %v2131_v21 }
0x18d1   :  { %5651 = vpow2.f32 %v2134_v22  ;;  %v2136_v24 = vmul.f32 1.442695, %v2133_v23 }
0x18d3   :  { %5653 = vpow2.f32 %v2136_v24 }
0x18db   :  { %v5652_v27 = vpop.eup %5651 }
0x18dc   :  { %v2138_v25 = vsel %vm429_vm7, %v5652_v27, 0.0 }
0x18dd   :  { %v5654_v30 = vpop.eup %5653  ;;  %2139 = vadd.xlane.f32.xlu0 %v2138_v25 }
0x18de   :  { %v2141_v26 = vsel %vm429_vm7, %v5654_v30, 0.0 }
0x18df   :  { %2142 = vadd.xlane.f32.xlu1 %v2141_v26 }
0x18f0   :  { %2200 = vrot.lane.b32.xlu1 %v6406_v8, %s5893_s29 }
0x18f3   :  { %2151 = vrot.lane.b32.xlu0 %v6403_v7, %s5893_s29 }
0x18f4   :  { %2351 = vrot.lane.b32.xlu1 %v6391_v60, %s5894_s30 }
0x18f7   :  { %2401 = vrot.lane.b32.xlu0 %v6393_v0, %s5894_s30 }
0x18f8   :  { %2349 = vrot.lane.b32.xlu1 %v6391_v60, %s5895_s6 }
0x18fb   :  { %2399 = vrot.lane.b32.xlu0 %v6393_v0, %s5895_s6 }
0x196a   :  { %v2140_v28 = vpop.xlane.xlu0 %2139 }
0x196b   :  { %5655 = vrcp.f32 %v2140_v28 }
0x196c   :  { %v2143_v29 = vpop.xlane.xlu1 %2142 }
0x196d   :  { %5657 = vrcp.f32 %v2143_v29 }
0x196e   :  { %v2152_v31 = vpop.permute.xlu0 %2151 }
0x196f   :  { %v2157_v32 = vsel %vm457_vm5, %v2152_v31, 0 }
0x1970   :  { %v2201_v34 = vpop.permute.xlu1 %2200  ;;  %5260 = vmatpush3.bf16.msra.mxu0 %v2157_v32 }
0x1971   :  { %v2206_v38 = vsel %vm457_vm5, %v2201_v34, 0  ;;  %5271 = vmatprep.subr.bf16.mxu0 %v5888_v15 }
0x1972   :  { %5266 = vmatpush3.bf16.msra.mxu1 %v2206_v38  ;;  %v2402_v43 = vpop.permute.xlu0 %2401 }
0x1973   :  { %5277 = vmatprep.subr.bf16.mxu1 %v5888_v15  ;;  %v2407_v44 = vsel %vm333_vm6, %v2402_v43, 0 }
0x1974   :  { %v2352_v47 = vpop.permute.xlu1 %2351 }
0x1975   :  { %v5656_v35 = vpop.eup %5655  ;;  %v2357_v61 = vsel %vm333_vm6, %v2352_v47, 0 }
0x1976   :  { %v2146_v36 = vmul.f32 %v5656_v35, %v5652_v27  ;;  %v2400_v45 = vpop.permute.xlu0 %2399 }
0x1977   :  { %v5658_v33 = vpop.eup %5657 }
0x1978   :  { %v2148_v39 = vpack.c.bf16 %v2146_v36, %v2146_v36  ;;  %v2147_v40 = vmul.f32 %v5658_v33, %v5654_v30  ;;  %v2350_v3 = vpop.permute.xlu1 %2349 }
0x197a   :  { %5262 = vmatmul.mubr.msk.bf16.vlgmr.msra.gmra.mrb[60].mxu0 %vm429_vm7, %v2148_v39  ;;  %v2149_v42 = vpack.c.bf16 %v2147_v40, %v2147_v40 }
0x197b   :  { %5272 = vmatpush3.bf16.msra.mxu0 %v5558_v37  ;;  %5273 = vmatprep.mubr.msk.bf16.mxu0 %vm5889_vm4, %v5888_v15 }
0x197c   :  { %5268 = vmatmul.mubr.msk.bf16.vlgmr.msra.gmra.mrb[64].mxu1 %vm429_vm7, %v2149_v42  ;;  %5283 = vmatprep.subr.bf16.mxu0 %v5888_v15 }
0x197d   :  { %5278 = vmatpush3.bf16.msra.mxu1 %v5557_v41  ;;  %5279 = vmatprep.mubr.msk.bf16.mxu1 %vm5889_vm4, %v5888_v15 }
0x197e   :  { %5289 = vmatprep.subr.bf16.mxu1 %v5888_v15 }
0x1984   :  { %5280 = vmatmul.mubr.msk.bf16.vlgmr.msra.gmra.mrb[68].mxu1 %vm333_vm6, %v2025_v57 }
0x1985   :  { %5291 = vmatprep.mubr.msk.bf16.mxu1 %vm5889_vm4, %v5888_v15 }
0x1986   :  { %5290 = vmatpush3.bf16.xpose.msra.mxu1 %v2407_v44 }
0x1987   :  { %5301 = vmatprep.subr.bf16.mxu1 %v5888_v15 }
0x198d   :  { %5292 = vmatmul.mubr.msk.bf16.vlgmr.msra.gmra.mrb[72].mxu1 %vm333_vm6, %v2400_v45 }
0x198e   :  { %5303 = vmatprep.mubr.msk.bf16.mxu1 %vm5889_vm4, %v5888_v15 }
0x1a4d   :  { %v2193_v46 = vpop.f32.mrb[60].mxu0 }
0x1a4e   :  { %v5263_v51 = vpop.f32.mrb[61].mxu0 }
0x1a4f   :  { %v2196_v52 = vpop.f32.mrb[62].mxu0  ;;  %v2242_v53 = vpop.f32.mrb[64].mxu1 }
0x1a50   :  { %v2248_v54 = vpack.c.bf16 %v2242_v53, %v2193_v46  ;;  %v5264_v55 = vpop.f32.mrb[63].mxu0  ;;  %v5269_v56 = vpop.f32.mrb[65].mxu1 }
0x1a51   :  { %v2245_v57 = vpop.f32.mrb[66].mxu1 }
0x1a52   :  { %v5270_v63 = vpop.f32.mrb[67].mxu1  ;;  %5274 = vmatmul.mubr.msk.bf16.vlgmr.msra.gmra.mrb[64].mxu0 %vm333_vm6, %v2248_v54  ;;  %v5559_v54 = vld [vmem:[%s7108_s3 + $0x1a0] ss:$8 sps:$4 sm:$0xff]  }
0x1a53   :  { %5284 = vmatpush3.bf16.xpose.msra.mxu0 %v2357_v61  ;;  %5285 = vmatprep.mubr.msk.bf16.mxu0 %vm5889_vm4, %v5888_v15 }
0x1a54   :  { %5295 = vmatprep.subr.bf16.mxu0 %v5888_v15 }
0x1a57   :  { %v2342_v1 = vpop.f32.mrb[68].mxu1 }
0x1a58   :  { %v5281_v4 = vpop.f32.mrb[69].mxu1 }
0x1a59   :  { %v2345_v5 = vpop.f32.mrb[70].mxu1 }
0x1a5a   :  { %v5282_v12 = vpop.f32.mrb[71].mxu1  ;;  %5286 = vmatmul.mubr.msk.bf16.vlgmr.msra.gmra.mrb[68].mxu0 %vm333_vm6, %v2350_v3 }
0x1a5b   :  { %5297 = vmatprep.mubr.msk.bf16.mxu0 %vm5889_vm4, %v5888_v15 }
0x1a60   :  { %v2443_v13 = vpop.f32.mrb[72].mxu1 }
0x1a61   :  { %v2444_v6 = vadd.f32 %v2443_v13, %v6088_v58  ;;  %v5293_v9 = vpop.f32.mrb[73].mxu1 }
0x1a62   :  { %v2446_v10 = vpop.f32.mrb[74].mxu1 }
0x1a63   :  { %v5294_v11 = vpop.f32.mrb[75].mxu1  ;;  %v2452_v59 = vsel %vm429_vm7, %v2444_v6, -inf }
0x1a64   :  { %2453 = vmax.xlane.f32.xlu0 %v2452_v59 }
0x1af1   :  { %v2454_v14 = vpop.xlane.xlu0 %2453 }
0x1af2   :  { %v2456_v62 = vsub.f32 %v2444_v6, %v2454_v14 }
0x1af4   :  { %v2459_v16 = vmul.f32 1.442695, %v2456_v62 }
0x1af6   :  { %5659 = vpow2.f32 %v2459_v16 }
0x1b00   :  { %v5660_v31 = vpop.eup %5659 }
0x1b01   :  { %v2464_v32 = vsel %vm429_vm7, %v5660_v31, 0.0 }
0x1b25   :  { %v2292_v18 = vpop.f32.mrb[64].mxu0 }
0x1b26   :  { %v6515_v20 = vadd.f32 %v2342_v1, %v2292_v18  ;;  %v5275_v21 = vpop.f32.mrb[65].mxu0 }
0x1b27   :  { %v2295_v22 = vpop.f32.mrb[66].mxu0 }
0x1b28   :  { %v6517_v23 = vadd.f32 %v2345_v5, %v2295_v22  ;;  %v5276_v24 = vpop.f32.mrb[67].mxu0 }
0x1b2d   :  { %v2393_v27 = vpop.f32.mrb[68].mxu0 }
0x1b2e   :  { %v2394_v25 = vadd.f32 %v2393_v27, %v6083_v50  ;;  %v5287_v30 = vpop.f32.mrb[69].mxu0 }
0x1b2f   :  { %v2396_v26 = vpop.f32.mrb[70].mxu0 }
0x1b30   :  { %v5288_v28 = vpop.f32.mrb[71].mxu0  ;;  %v2449_v29 = vsel %vm429_vm7, %v2394_v25, -inf }
0x1b31   :  { %2450 = vmax.xlane.f32.xlu1 %v2449_v29 }
0x1b35   :  { %2465 = vadd.xlane.f32.xlu1 %v2464_v32 }
0x1b46   :  { %2521 = vrot.lane.b32.xlu1 %v6406_v8, %s5895_s6 }
0x1b4a   :  { %2624 = vrot.lane.b32.xlu1 %v6391_v60, %s5896_s11 }
0x1b4e   :  { %2622 = vrot.lane.b32.xlu1 %v6391_v60, %s5897_s12 }
0x1bbe   :  { %v2451_v34 = vpop.xlane.xlu1 %2450 }
0x1bbf   :  { %v2455_v38 = vsub.f32 %v2394_v25, %v2451_v34 }
0x1bc1   :  { %v2457_v35 = vmul.f32 1.442695, %v2455_v38 }
0x1bc2   :  { %v2466_v36 = vpop.xlane.xlu1 %2465 }
0x1bc3   :  { %5661 = vpow2.f32 %v2457_v35 }
0x1bc4   :  { %5663 = vrcp.f32 %v2466_v36 }
0x1bc6   :  { %v2522_v33 = vpop.permute.xlu1 %2521 }
0x1bc7   :  { %v2527_v37 = vsel %vm457_vm5, %v2522_v33, 0 }
0x1bc8   :  { %5302 = vmatpush3.bf16.msra.mxu1 %v2527_v37 }
0x1bc9   :  { %5313 = vmatprep.subr.bf16.mxu1 %v5888_v15 }
0x1bca   :  { %v2625_v43 = vpop.permute.xlu1 %2624 }
0x1bcb   :  { %v2630_v44 = vsel %vm333_vm6, %v2625_v43, 0 }
0x1bcd   :  { %v5662_v39 = vpop.eup %5661 }
0x1bce   :  { %v5664_v40 = vpop.eup %5663  ;;  %v2461_v41 = vsel %vm429_vm7, %v5662_v39, 0.0  ;;  %v2623_v45 = vpop.permute.xlu1 %2622 }
0x1bcf   :  { %2462 = vadd.xlane.f32.xlu0 %v2461_v41  ;;  %v2470_v42 = vmul.f32 %v5664_v40, %v5660_v31 }
0x1bd1   :  { %v2472_v60 = vpack.c.bf16 %v2470_v42, %v2470_v42 }
0x1bd3   :  { %5304 = vmatmul.mubr.msk.bf16.vlgmr.msra.gmra.mrb[76].mxu1 %vm429_vm7, %v2472_v60 }
0x1bd4   :  { %5314 = vmatpush3.bf16.xpose.msra.mxu1 %v2630_v44  ;;  %5315 = vmatprep.mubr.msk.bf16.mxu1 %vm5889_vm4, %v5888_v15 }
0x1bd5   :  { %5325 = vmatprep.subr.bf16.mxu1 %v5888_v15 }
0x1bdb   :  { %5316 = vmatmul.mubr.msk.bf16.vlgmr.msra.gmra.mrb[80].mxu1 %vm333_vm6, %v2623_v45 }
0x1bdc   :  { %5327 = vmatprep.mubr.msk.bf16.mxu1 %vm5889_vm4, %v5888_v15 }
0x1be5   :  { %2473 = vrot.lane.b32.xlu0 %v6403_v7, %s5895_s6 }
0x1be9   :  { %2674 = vrot.lane.b32.xlu0 %v6393_v0, %s5896_s11 }
0x1bed   :  { %2672 = vrot.lane.b32.xlu0 %v6393_v0, %s5897_s12 }
0x1c5c   :  { %v2463_v46 = vpop.xlane.xlu0 %2462 }
0x1c5d   :  { %5665 = vrcp.f32 %v2463_v46 }
0x1c60   :  { %v2474_v47 = vpop.permute.xlu0 %2473 }
0x1c61   :  { %v2479_v51 = vsel %vm457_vm5, %v2474_v47, 0 }
0x1c62   :  { %5296 = vmatpush3.bf16.msra.mxu0 %v2479_v51 }
0x1c63   :  { %5307 = vmatprep.subr.bf16.mxu0 %v5888_v15 }
0x1c64   :  { %v2675_v13 = vpop.permute.xlu0 %2674 }
0x1c65   :  { %v2680_v59 = vsel %vm333_vm6, %v2675_v13, 0 }
0x1c67   :  { %v5666_v52 = vpop.eup %5665 }
0x1c68   :  { %v2469_v53 = vmul.f32 %v5666_v52, %v5662_v39 }
0x1c6a   :  { %v2471_v55 = vpack.c.bf16 %v2469_v53, %v2469_v53 }
0x1c6c   :  { %5298 = vmatmul.mubr.msk.bf16.vlgmr.msra.gmra.mrb[72].mxu0 %vm429_vm7, %v2471_v55 }
0x1c6d   :  { %5308 = vmatpush3.bf16.msra.mxu0 %v5559_v54  ;;  %5309 = vmatprep.mubr.msk.bf16.mxu0 %vm5889_vm4, %v5888_v15 }
0x1c6e   :  { %5319 = vmatprep.subr.bf16.mxu0 %v5888_v15 }
0x1ca6   :  { %v2563_v0 = vpop.f32.mrb[76].mxu1 }
0x1ca7   :  { %v5305_v56 = vpop.f32.mrb[77].mxu1 }
0x1ca8   :  { %v2566_v57 = vpop.f32.mrb[78].mxu1 }
0x1ca9   :  { %v5306_v61 = vpop.f32.mrb[79].mxu1 }
0x1cae   :  { %v2666_v63 = vpop.f32.mrb[80].mxu1 }
0x1caf   :  { %v2667_v1 = vadd.f32 %v2666_v63, %v6083_v50  ;;  %v5317_v4 = vpop.f32.mrb[81].mxu1  ;;  %v2673_v50 = vpop.permute.xlu0 %2672 }
0x1cb0   :  { %v2669_v3 = vpop.f32.mrb[82].mxu1 }
0x1cb1   :  { %v5318_v5 = vpop.f32.mrb[83].mxu1  ;;  %v2722_v12 = vsel %vm429_vm7, %v2667_v1, -inf }
0x1cb2   :  { %2723 = vmax.xlane.f32.xlu1 %v2722_v12 }
0x1d3f   :  { %v2515_v6 = vpop.f32.mrb[72].mxu0  ;;  %v2724_v62 = vpop.xlane.xlu1 %2723 }
0x1d40   :  { %v2569_v9 = vpack.c.bf16 %v2563_v0, %v2515_v6  ;;  %v5299_v10 = vpop.f32.mrb[73].mxu0  ;;  %v2728_v16 = vsub.f32 %v2667_v1, %v2724_v62  ;;  %v2895_v1 = vld [vmem:[%s7109_s4 + $0x23] ss:$0 sm:$0xff] }
0x1d41   :  { %v2518_v11 = vpop.f32.mrb[74].mxu0 }
0x1d42   :  { %v5300_v14 = vpop.f32.mrb[75].mxu0  ;;  %5310 = vmatmul.mubr.msk.bf16.vlgmr.msra.gmra.mrb[76].mxu0 %vm333_vm6, %v2569_v9  ;;  %v2730_v18 = vmul.f32 1.442695, %v2728_v16 }
0x1d43   :  { %5320 = vmatpush3.bf16.xpose.msra.mxu0 %v2680_v59  ;;  %5321 = vmatprep.mubr.msk.bf16.mxu0 %vm5889_vm4, %v5888_v15 }
0x1d44   :  { %5331 = vmatprep.subr.bf16.mxu0 %v5888_v15  ;;  %5667 = vpow2.f32 %v2730_v18 }
0x1d4a   :  { %5322 = vmatmul.mubr.msk.bf16.vlgmr.msra.gmra.mrb[80].mxu0 %vm333_vm6, %v2673_v50 }
0x1d4b   :  { %5333 = vmatprep.mubr.msk.bf16.mxu0 %vm5889_vm4, %v5888_v15 }
0x1d4e   :  { %v5668_v38 = vpop.eup %5667 }
0x1e15   :  { %v2613_v21 = vpop.f32.mrb[76].mxu0 }
0x1e16   :  { %v6565_v22 = vadd.f32 %v2613_v21, %v6515_v20  ;;  %v5311_v24 = vpop.f32.mrb[77].mxu0  ;;  %v2734_v20 = vsel %vm429_vm7, %v5668_v38, 0.0 }
0x1e17   :  { %v2616_v27 = vpop.f32.mrb[78].mxu0 }
0x1e18   :  { %v6568_v25 = vadd.f32 %v2616_v27, %v6517_v23  ;;  %v5312_v30 = vpop.f32.mrb[79].mxu0 }
0x1e19   :  { %v5562_v30 = vld [vmem:[%s7108_s3 + $0x1d0] ss:$8 sps:$4 sm:$0xff]  }
0x1e1d   :  { %v2716_v26 = vpop.f32.mrb[80].mxu0 }
0x1e1e   :  { %v2717_v28 = vadd.f32 %v2716_v26, %v6088_v58  ;;  %v5323_v29 = vpop.f32.mrb[81].mxu0  ;;  %v5563_v26 = vld [vmem:[%s7108_s3 + $0x1e0] ss:$8 sps:$4 sm:$0xff]  }
0x1e1f   :  { %v2719_v31 = vpop.f32.mrb[82].mxu0 }
0x1e20   :  { %v5324_v32 = vpop.f32.mrb[83].mxu0  ;;  %v2725_v34 = vsel %vm429_vm7, %v2717_v28, -inf }
0x1e21   :  { %2726 = vmax.xlane.f32.xlu0 %v2725_v34 }
0x1e25   :  { %2735 = vadd.xlane.f32.xlu0 %v2734_v20 }
0x1e3b   :  { %2746 = vrot.lane.b32.xlu0 %v6403_v7, %s5897_s12  ;;  %v5560_v7 = vld [vmem:[%s7108_s3 + $0x1b0] ss:$8 sps:$4 sm:$0xff]  }
0x1eae   :  { %v2727_v35 = vpop.xlane.xlu0 %2726 }
0x1eaf   :  { %v2729_v23 = vsub.f32 %v2717_v28, %v2727_v35  ;;  %v5564_v28 = vld [vmem:[%s7108_s3 + $0x1f0] ss:$8 sps:$4 sm:$0xff]  }
0x1eb1   :  { %v2732_v36 = vmul.f32 1.442695, %v2729_v23  ;;  %v2900_v23 = vld [vmem:[%s7109_s4 + $0x24] ss:$0 sm:$0xff] }
0x1eb2   :  { %v2736_v33 = vpop.xlane.xlu0 %2735 }
0x1eb3   :  { %5669 = vpow2.f32 %v2732_v36 }
0x1eb4   :  { %5671 = vrcp.f32 %v2736_v33 }
0x1eb6   :  { %v2747_v58 = vpop.permute.xlu0 %2746 }
0x1eb7   :  { %v2752_v37 = vsel %vm457_vm5, %v2747_v58, 0 }
0x1eb8   :  { %5326 = vmatpush3.bf16.msra.mxu1 %v2752_v37 }
0x1eb9   :  { %5337 = vmatprep.subr.bf16.mxu1 %v5888_v15 }
0x1ebd   :  { %v5670_v39 = vpop.eup %5669 }
0x1ebe   :  { %v5672_v40 = vpop.eup %5671  ;;  %v2737_v41 = vsel %vm429_vm7, %v5670_v39, 0.0 }
0x1ebf   :  { %v2742_v42 = vmul.f32 %v5672_v40, %v5668_v38  ;;  %2738 = vadd.xlane.f32.xlu1 %v2737_v41 }
0x1ec1   :  { %v2744_v43 = vpack.c.bf16 %v2742_v42, %v2742_v42 }
0x1ec3   :  { %5328 = vmatmul.mubr.msk.bf16.vlgmr.msra.gmra.mrb[84].mxu1 %vm429_vm7, %v2744_v43 }
0x1ec4   :  { %5339 = vmatprep.mubr.msk.bf16.mxu1 %vm5889_vm4, %v5888_v15  ;;  %5338 = vmatpush3.bf16.msra.mxu1 %v5560_v7  ;;  %v5565_v7 = vld [vmem:[%s7108_s3 + $0x200] ss:$8 sps:$4 sm:$0xff]  }
0x1ec5   :  { %5355 = vmatprep.subr.bf16.mxu1 %v5888_v15 }
0x1ed0   :  { %2794 = vrot.lane.b32.xlu1 %v6406_v8, %s5897_s12 }
0x1f4c   :  { %v2739_v60 = vpop.xlane.xlu1 %2738 }
0x1f4d   :  { %5673 = vrcp.f32 %v2739_v60  ;;  %v5566_v60 = vld [vmem:[%s7108_s3 + $0x210] ss:$8 sps:$4 sm:$0xff]  }
0x1f50   :  { %v2795_v44 = vpop.permute.xlu1 %2794 }
0x1f51   :  { %v2800_v45 = vsel %vm457_vm5, %v2795_v44, 0  ;;  %v5567_v44 = vld [vmem:[%s7108_s3 + $0x220] ss:$8 sps:$4 sm:$0xff]  }
0x1f52   :  { %5332 = vmatpush3.bf16.msra.mxu0 %v2800_v45  ;;  %v5568_v45 = vld [vmem:[%s7108_s3 + $0x230] ss:$8 sps:$4 sm:$0xff]  }
0x1f53   :  { %5343 = vmatprep.subr.bf16.mxu0 %v5888_v15 }
0x1f57   :  { %v5674_v46 = vpop.eup %5673 }
0x1f58   :  { %v2743_v47 = vmul.f32 %v5674_v46, %v5670_v39  ;;  %v2901_v39 = vld [vmem:[%s7109_s4 + $0x25] ss:$0 sm:$0xff]  ;;  %v5569_v46 = vld [vmem:[%s7108_s3 + $0x240] ss:$8 sps:$4 sm:$0xff]  }
0x1f5a   :  { %v2745_v51 = vpack.c.bf16 %v2743_v47, %v2743_v47  ;;  %v5570_v47 = vld [vmem:[%s7108_s3 + $0x250] ss:$8 sps:$4 sm:$0xff]  }
0x1f5c   :  { %5334 = vmatmul.mubr.msk.bf16.vlgmr.msra.gmra.mrb[84].mxu0 %vm429_vm7, %v2745_v51  ;;  %v5571_v51 = vld [vmem:[%s7108_s3 + $0x260] ss:$8 sps:$4 sm:$0xff]  }
0x1f5d   :  { %5351 = vmatprep.mubr.msk.bf16.mxu0 %vm5889_vm4, %v5888_v15 }
0x1f96   :  { %v2788_v8 = vpop.f32.mrb[84].mxu1 }
0x1f97   :  { %v5329_v52 = vpop.f32.mrb[85].mxu1 }
0x1f98   :  { %v2791_v53 = vpop.f32.mrb[86].mxu1  ;;  %v2941_v52 = vld [vmem:[%s7109_s4 + $0x26] ss:$0 sm:$0xff] }
0x1f99   :  { %v5330_v54 = vpop.f32.mrb[87].mxu1 }
0x202f   :  { %v2836_v55 = vpop.f32.mrb[84].mxu0 }
0x2030   :  { %v2842_v0 = vpack.c.bf16 %v2836_v55, %v2788_v8  ;;  %v5335_v56 = vpop.f32.mrb[85].mxu0  ;;  %v5572_v8 = vld [vmem:[%s7108_s3 + $0x270] ss:$8 sps:$4 sm:$0xff]  }
0x2031   :  { %v2839_v57 = vpop.f32.mrb[86].mxu0 }
0x2032   :  { %v5336_v61 = vpop.f32.mrb[87].mxu0  ;;  %5340 = vmatmul.mubr.msk.bf16.vlgmr.msra.gmra.mrb[88].mxu1 %vm333_vm6, %v2842_v0 }
0x2033   :  { %5371 = vmatprep.mubr.msk.bf16.mxu1 %vm5889_vm4, %v5888_v15  ;;  %5356 = vmatpush3.bf16.msra.mxu1 %v5565_v7  ;;  %v5578_v7 = vld [vmem:[%s7108_s3 + $0x290] ss:$8 sps:$4 sm:$0xff]  }
0x2034   :  { %5357 = vmatprep.subr.bf16.mxu1 %v5888_v15 }
0x2037   :  { %5358 = vmatpush3.bf16.msra.mxu1 %v5566_v60  ;;  %v5583_v60 = vld [vmem:[%s7108_s3 + $0x2a4] ss:$8 sps:$4 sm:$0xff]  }
0x2038   :  { %5359 = vmatprep.subr.bf16.mxu1 %v5888_v15 }
0x203b   :  { %5360 = vmatpush3.bf16.msra.mxu1 %v5567_v44  ;;  %v5581_v44 = vld [vmem:[%s7108_s3 + $0x2a0] ss:$8 sps:$4 sm:$0xff]  }
0x203c   :  { %5361 = vmatprep.subr.bf16.mxu1 %v5888_v15 }
0x203f   :  { %5362 = vmatpush3.bf16.msra.mxu1 %v5568_v45  ;;  %v5586_v45 = vld [vmem:[%s7108_s3 + $0x2b4] ss:$8 sps:$4 sm:$0xff]  }
0x2040   :  { %5363 = vmatprep.subr.bf16.mxu1 %v5888_v15 }
0x2043   :  { %5364 = vmatpush3.bf16.msra.mxu1 %v5569_v46  ;;  %v5584_v46 = vld [vmem:[%s7108_s3 + $0x2b0] ss:$8 sps:$4 sm:$0xff]  }
0x2044   :  { %5365 = vmatprep.subr.bf16.mxu1 %v5888_v15 }
0x2047   :  { %5366 = vmatpush3.bf16.msra.mxu1 %v5570_v47  ;;  %v6730_v47 = vld [vmem:[%s7109_s4 + $0x34] ss:$0 sm:$0xff] }
0x2048   :  { %5367 = vmatprep.subr.bf16.mxu1 %v5888_v15 }
0x204b   :  { %5368 = vmatpush3.bf16.msra.mxu1 %v5571_v51 }
0x204c   :  { %5369 = vmatprep.subr.bf16.mxu1 %v5888_v15 }
0x204f   :  { %5370 = vmatpush3.bf16.msra.mxu1 %v5572_v8 }
0x2050   :  { %5383 = vmatprep.subr.bf16.mxu1 %v5888_v15 }
0x2105   :  { %v2886_v63 = vpop.f32.mrb[88].mxu1 }
0x2106   :  { %v2893_v4 = vadd.f32 %v2886_v63, %v6565_v22  ;;  %v5341_v3 = vpop.f32.mrb[89].mxu1 }
0x2107   :  { %v2889_v5 = vpop.f32.mrb[90].mxu1 }
0x2108   :  { %v2896_v12 = vadd.f32 %v2895_v1, %v2893_v4  ;;  %v2894_v13 = vadd.f32 %v2889_v5, %v6568_v25  ;;  %v5342_v6 = vpop.f32.mrb[91].mxu1 }
0x210a   :  { %v2897_v9 = vadd.f32 %v2895_v1, %v2894_v13  ;;  %v2898_v10 = vadd.f32 %v2896_v12, %v6378_v48 }
0x210c   :  { %v2902_v11 = vsel %vm142_vm3, %v2898_v10, 0.0  ;;  %v2899_v59 = vadd.f32 %v2897_v9, %v6380_v49  ;;  %v5561_v49 = vld [vmem:[%s7108_s3 + $0x1c0] ss:$8 sps:$4 sm:$0xff]  }
0x210d   :  { %2903 = vadd.xlane.f32.xlu1 %v2902_v11  ;;  %5344 = vmatpush3.bf16.msra.mxu0 %v5561_v49 }
0x210e   :  { %v2905_v14 = vsel %vm142_vm3, %v2899_v59, 0.0  ;;  %5345 = vmatprep.subr.bf16.mxu0 %v5888_v15 }
0x210f   :  { %2906 = vadd.xlane.f32.xlu0 %v2905_v14 }
0x2111   :  { %5346 = vmatpush3.bf16.msra.mxu0 %v5562_v30 }
0x2112   :  { %5347 = vmatprep.subr.bf16.mxu0 %v5888_v15 }
0x2115   :  { %5348 = vmatpush3.bf16.msra.mxu0 %v5563_v26 }
0x2116   :  { %5349 = vmatprep.subr.bf16.mxu0 %v5888_v15 }
0x2119   :  { %5350 = vmatpush3.bf16.msra.mxu0 %v5564_v28 }
0x219a   :  { %v2904_v50 = vpop.xlane.xlu1 %2903 }
0x219b   :  { %v2908_v62 = vmul.f32 0.015625, %v2904_v50 }
0x219c   :  { %v2907_v16 = vpop.xlane.xlu0 %2906 }
0x219d   :  { %v2910_v18 = vsub.f32 %v2898_v10, %v2908_v62  ;;  %v2909_v21 = vmul.f32 0.015625, %v2907_v16 }
0x219f   :  { %v2911_v22 = vsub.f32 %v2899_v59, %v2909_v21  ;;  %v2912_v24 = vmul.f32 %v2910_v18, %v2910_v18 }
0x21a1   :  { %v2914_v27 = vsel %vm142_vm3, %v2912_v24, 0.0  ;;  %v2913_v25 = vmul.f32 %v2911_v22, %v2911_v22 }
0x21a2   :  { %2915 = vadd.xlane.f32.xlu0 %v2914_v27 }
0x21a3   :  { %v2917_v48 = vsel %vm142_vm3, %v2913_v25, 0.0 }
0x21a4   :  { %2918 = vadd.xlane.f32.xlu1 %v2917_v48 }
0x222f   :  { %v2916_v29 = vpop.xlane.xlu0 %2915 }
0x2230   :  { %v2920_v31 = vmul.f32 0.015625, %v2916_v29 }
0x2231   :  { %v2919_v32 = vpop.xlane.xlu1 %2918 }
0x2232   :  { %v2922_v34 = vadd.f32 1e-12, %v2920_v31  ;;  %v2921_v38 = vmul.f32 0.015625, %v2919_v32  ;;  %v6682_v32 = vld [vmem:[%s7108_s3 + $0x2e0] ss:$8 sps:$4 sm:$0xff]  }
0x2234   :  { %5675 = vrsqrt.f32 %v2922_v34  ;;  %v2923_v20 = vadd.f32 1e-12, %v2921_v38  ;;  %v6688_v34 = vld [vmem:[%s7108_s3 + $0x2f0] ss:$8 sps:$4 sm:$0xff]  }
0x2236   :  { %5677 = vrsqrt.f32 %v2923_v20 }
0x223e   :  { %v5676_v35 = vpop.eup %5675 }
0x223f   :  { %v2926_v36 = vmul.f32 %v5676_v35, %v2910_v18 }
0x2240   :  { %v5678_v33 = vpop.eup %5677 }
0x2241   :  { %v2928_v58 = vmul.f32 %v2926_v36, %v2900_v23  ;;  %v2927_v37 = vmul.f32 %v5678_v33, %v2911_v22  ;;  %v3045_v22 = vld [vmem:[%s7109_s4 + $0x27] ss:$0 sm:$0xff] }
0x2243   :  { %v2929_v40 = vmul.f32 %v2927_v37, %v2900_v23  ;;  %v6627_v41 = vadd.f32 %v2928_v58, %v2901_v39 }
0x2245   :  { %v6629_v42 = vadd.f32 %v2929_v40, %v2901_v39 }
0x2247   :  { %v2932_v43 = vpack.c.bf16 %v6629_v42, %v6627_v41 }
0x2249   :  { %5352 = vmatmul.mubr.msk.bf16.vlgmr.msra.gmra.mrb[88].mxu0 %vm142_vm3, %v2932_v43  ;;  %v5580_v43 = vld [vmem:[%s7108_s3 + $0x294] ss:$8 sps:$4 sm:$0xff]  }
0x224a   :  { %3266 = vmatprep.mubr.bf16.mxu0 %v5886_v2 }
0x231c   :  { %v3003_v53 = vpop.f32.mrb[88].mxu0 }
0x231d   :  { %v3004_v54 = vadd.f32 %v3003_v53, %v2941_v52  ;;  %v5353_v55 = vpop.f32.mrb[89].mxu0 }
0x231e   :  { %v3006_v0 = vpop.f32.mrb[90].mxu0 }
0x231f   :  { %v3010_v56 = vmul.f32 %v3004_v54, %v3004_v54  ;;  %v3007_v57 = vadd.f32 %v3006_v0, %v2941_v52  ;;  %v5354_v61 = vpop.f32.mrb[91].mxu0 }
0x2321   :  { %v3012_v63 = vmul.f32 %v3010_v56, %v3004_v54  ;;  %v3011_v1 = vmul.f32 %v3007_v57, %v3007_v57 }
0x2323   :  { %v3014_v4 = vmul.f32 0.044715, %v3012_v63  ;;  %v3013_v3 = vmul.f32 %v3011_v1, %v3007_v57 }
0x2325   :  { %v3016_v5 = vadd.f32 %v3014_v4, %v3004_v54  ;;  %v3015_v12 = vmul.f32 0.044715, %v3013_v3 }
0x2327   :  { %v3018_v13 = vmul.f32 0.7978846, %v3016_v5  ;;  %v3017_v6 = vadd.f32 %v3015_v12, %v3007_v57  ;;  %v3137_v5 = vld [vmem:[%s7109_s4 + $0x30] ss:$0 sm:$0xff] }
0x2329   :  { %5679 = vtanh.f32 %v3018_v13  ;;  %v3019_v9 = vmul.f32 0.7978846, %v3017_v6 }
0x232b   :  { %5681 = vtanh.f32 %v3019_v9 }
0x2333   :  { %v5680_v10 = vpop.eup %5679 }
0x2334   :  { %v3022_v11 = vadd.f32 1.0, %v5680_v10  ;;  %v3138_v10 = vld [vmem:[%s7109_s4 + $0x31] ss:$0 sm:$0xff] }
0x2335   :  { %v5682_v59 = vpop.eup %5681 }
0x2336   :  { %v3024_v14 = vmul.f32 0.5, %v3022_v11  ;;  %v3023_v50 = vadd.f32 1.0, %v5682_v59 }
0x2338   :  { %v3025_v62 = vmul.f32 0.5, %v3023_v50  ;;  %v3026_v16 = vmul.f32 %v3024_v14, %v3004_v54  ;;  %v5587_v50 = vld [vmem:[%s7108_s3 + $0x2c0] ss:$8 sps:$4 sm:$0xff]  }
0x233a   :  { %v3027_v18 = vmul.f32 %v3025_v62, %v3007_v57 }
0x233c   :  { %v3028_v21 = vpack.c.bf16 %v3027_v18, %v3026_v16  ;;  %v5588_v16 = vld [vmem:[%s7108_s3 + $0x2d0] ss:$8 sps:$4 sm:$0xff]  }
0x233d   :  { %v4810_v18 = vld [vmem:[%s7109_s4 + $0x32] ss:$8 sm:$0x3] }
0x233e   :  { %5372 = vmatmul.mubr.bf16.vlgmr.msra.gmra.mrb[92].mxu1 %v3028_v21  ;;  %v3184_v21 = vrot.slane %v4810_v18, %v6036_v17 }
0x233f   :  { %5387 = vmatprep.mubr.msk.bf16.mxu1 %vm5889_vm4, %v5888_v15  ;;  %5384 = vmatpush3.bf16.msra.mxu1 %v6682_v32 }
0x2340   :  { %5385 = vmatprep.subr.bf16.mxu1 %v5888_v15 }
0x2343   :  { %5386 = vmatpush3.bf16.msra.mxu1 %v6688_v34 }
0x2344   :  { %5399 = vmatprep.subr.bf16.mxu1 %v5888_v15 }
0x2346   :  { %5388 = vmatmul.mubr.bf16.vlgmr.msra.gmra.mrb[96].mxu1 %v5886_v2 }
0x2347   :  { %5400 = vmatpush3.bf16.msra.mxu1 %v6682_v32  ;;  %5403 = vmatprep.mubr.msk.bf16.mxu1 %vm5889_vm4, %v5888_v15 }
0x2348   :  { %5401 = vmatprep.subr.bf16.mxu1 %v5888_v15 }
0x234b   :  { %5402 = vmatpush3.bf16.msra.mxu1 %v6688_v34 }
0x234c   :  { %5415 = vmatprep.subr.bf16.mxu1 %v5888_v15 }
0x2411   :  { %v3128_v24 = vpop.f32.mrb[92].mxu1 }
0x2412   :  { %v3129_v27 = vadd.f32 %v3128_v24, %v3045_v22  ;;  %v5373_v25 = vpop.f32.mrb[93].mxu1 }
0x2413   :  { %v3131_v48 = vpop.f32.mrb[94].mxu1 }
0x2414   :  { %v3132_v49 = vadd.f32 %v3131_v48, %v3045_v22  ;;  %v5374_v30 = vpop.f32.mrb[95].mxu1  ;;  %v3135_v26 = vadd.f32 %v3129_v27, %v6627_v41  ;;  %v5577_v41 = vld [vmem:[%s7108_s3 + $0x284] ss:$8 sps:$4 sm:$0xff]   ;;  %v3188_v22 = vrot.slane %v4810_v18, %v6041_v19 }
0x2415   :  { %3234 = vmatprep.subr.bf16.mxu0 %v5577_v41 }
0x2416   :  { %v3139_v28 = vsel %vm142_vm3, %v3135_v26, 0.0  ;;  %v3136_v29 = vadd.f32 %v3132_v49, %v6629_v42  ;;  %v5575_v42 = vld [vmem:[%s7108_s3 + $0x280] ss:$8 sps:$4 sm:$0xff]  }
0x2417   :  { %3140 = vadd.xlane.f32.xlu0 %v3139_v28  ;;  %3235 = vmatpush1.bf16.msra.mxu0 %v5575_v42 }
0x2418   :  { %v3142_v31 = vsel %vm142_vm3, %v3136_v29, 0.0  ;;  %3236 = vmatprep.subr.bf16.mxu0 %v5580_v43 }
0x2419   :  { %3143 = vadd.xlane.f32.xlu1 %v3142_v31  ;;  %v3443_v51 = vpop.f32.mrb[96].mxu1 }
0x241a   :  { %v3444_v8 = vadd.f32 %v3443_v51, %v6730_v47  ;;  %v5389_v52 = vpop.f32.mrb[97].mxu1 }
0x241b   :  { %3237 = vmatpush1.bf16.msra.mxu0 %v5578_v7  ;;  %v3446_v53 = vpop.f32.mrb[98].mxu1 }
0x241c   :  { %3238 = vmatprep.subr.bf16.mxu0 %v5583_v60  ;;  %v3450_v54 = vrot.slane %v3444_v8, 1  ;;  %v3451_v55 = vrot.slane %v3444_v8, 2  ;;  %v5390_v0 = vpop.f32.mrb[99].mxu1 }
0x241f   :  { %3239 = vmatpush1.bf16.msra.mxu0 %v5581_v44 }
0x2420   :  { %3240 = vmatprep.subr.bf16.mxu0 %v5586_v45 }
0x2423   :  { %3241 = vmatpush1.bf16.msra.mxu0 %v5584_v46 }
0x2424   :  { %5375 = vmatprep.subr.bf16.mxu0 %v5888_v15 }
0x24a4   :  { %v3141_v38 = vpop.xlane.xlu0 %3140 }
0x24a5   :  { %v3145_v20 = vmul.f32 0.015625, %v3141_v38 }
0x24a6   :  { %v3144_v35 = vpop.xlane.xlu1 %3143 }
0x24a7   :  { %v3147_v23 = vsub.f32 %v3135_v26, %v3145_v20  ;;  %v3146_v36 = vmul.f32 0.015625, %v3144_v35 }
0x24a9   :  { %v3148_v33 = vsub.f32 %v3136_v29, %v3146_v36  ;;  %v3149_v58 = vmul.f32 %v3147_v23, %v3147_v23 }
0x24ab   :  { %v3151_v37 = vsel %vm142_vm3, %v3149_v58, 0.0  ;;  %v3150_v39 = vmul.f32 %v3148_v33, %v3148_v33 }
0x24ac   :  { %3152 = vadd.xlane.f32.xlu0 %v3151_v37 }
0x24ad   :  { %v3154_v40 = vsel %vm142_vm3, %v3150_v39, 0.0 }
0x24ae   :  { %3155 = vadd.xlane.f32.xlu1 %v3154_v40 }
0x24bf   :  { %3454 = vrot.lane.b32.xlu1 %v3451_v55, %s5895_s6 }
0x24c2   :  { %3452 = vrot.lane.b32.xlu0 %v3450_v54, %s5895_s6 }
0x24c3   :  { %3486 = vrot.lane.b32.xlu1 %v3450_v54, %s5894_s30 }
0x24c6   :  { %3488 = vrot.lane.b32.xlu0 %v3451_v55, %s5894_s30 }
0x2539   :  { %v3153_v56 = vpop.xlane.xlu0 %3152 }
0x253a   :  { %v3157_v57 = vmul.f32 0.015625, %v3153_v56 }
0x253b   :  { %v3156_v61 = vpop.xlane.xlu1 %3155 }
0x253c   :  { %v3159_v63 = vadd.f32 1e-12, %v3157_v57  ;;  %v3158_v1 = vmul.f32 0.015625, %v3156_v61 }
0x253d   :  { %v3453_v48 = vpop.permute.xlu0 %3452 }
0x253e   :  { %5683 = vrsqrt.f32 %v3159_v63  ;;  %v3160_v4 = vadd.f32 1e-12, %v3158_v1 }
0x253f   :  { %v3455_v29 = vpop.permute.xlu1 %3454 }
0x2540   :  { %5685 = vrsqrt.f32 %v3160_v4 }
0x2541   :  { %v3489_v7 = vpop.permute.xlu0 %3488 }
0x2543   :  { %v3487_v41 = vpop.permute.xlu1 %3486 }
0x2548   :  { %v5684_v3 = vpop.eup %5683 }
0x2549   :  { %v3163_v12 = vmul.f32 %v5684_v3, %v3147_v23 }
0x254a   :  { %v5686_v13 = vpop.eup %5685 }
0x254b   :  { %v3165_v6 = vmul.f32 %v3163_v12, %v3137_v5  ;;  %v3164_v9 = vmul.f32 %v5686_v13, %v3148_v33 }
0x254d   :  { %v3166_v11 = vmul.f32 %v3164_v9, %v3137_v5  ;;  %v3167_v59 = vadd.f32 %v3165_v6, %v3138_v10 }
0x254f   :  { %v3168_v14 = vadd.f32 %v3166_v11, %v3138_v10 }
0x2551   :  { %v3169_v62 = vpack.c.bf16 %v3168_v14, %v3167_v59 }
0x2553   :  { %4819 = vmatmul.mubr.msk.bf16.vlgmr.msra.gmra.mrb[92].mxu0 %vm142_vm3, %v3169_v62 }
0x2554   :  { %5376 = vmatpush3.bf16.msra.mxu0 %v5587_v50  ;;  %5379 = vmatprep.mubr.msk.bf16.mxu0 %vm5889_vm4, %v5888_v15 }
0x2555   :  { %5377 = vmatprep.subr.bf16.mxu0 %v5888_v15 }
0x2558   :  { %5378 = vmatpush3.bf16.msra.mxu0 %v5588_v16 }
0x2559   :  { %5391 = vmatprep.subr.bf16.mxu0 %v5888_v15 }
0x255b   :  { %5380 = vmatmul.mubr.bf16.vlgmr.msra.gmra.mrb[96].mxu0 %v5886_v2 }
0x255c   :  { %5392 = vmatpush3.bf16.msra.mxu0 %v6682_v32  ;;  %5395 = vmatprep.mubr.msk.bf16.mxu0 %vm5889_vm4, %v5888_v15 }
0x255d   :  { %5393 = vmatprep.subr.bf16.mxu0 %v5888_v15 }
0x2560   :  { %5394 = vmatpush3.bf16.msra.mxu0 %v6688_v34 }
0x2561   :  { %5407 = vmatprep.subr.bf16.mxu0 %v5888_v15 }
0x2626   :  { %v3268_v2 = vpop.f32.mrb[92].mxu0 }
0x2627   :  { %v6766_v24 = vadd.f32 %v3268_v2, %v3184_v21  ;;  %v3270_v27 = vpop.f32.mrb[93].mxu0 }
0x2628   :  { %v6768_v25 = vadd.f32 %v3270_v27, %v3188_v22  ;;  %v3272_v49 = vpop.f32.mrb[94].mxu0 }
0x2629   :  { %v3458_v30 = vadd.f32 %v3453_v48, %v6766_v24  ;;  %v6771_v26 = vadd.f32 %v3272_v49, %v3184_v21  ;;  %v3274_v28 = vpop.f32.mrb[95].mxu0 }
0x262a   :  { %v6773_v31 = vadd.f32 %v3274_v28, %v3188_v22  ;;  %v3472_v53 = vadd.f32 %v3453_v48, %v6768_v25 }
0x262b   :  { %v4826_v38 = vmul.f32 -1.442695, %v3458_v30  ;;  %v3459_v17 = vadd.f32 %v3455_v29, %v6771_v26 }
0x262c   :  { %v3473_v54 = vadd.f32 %v3455_v29, %v6773_v31  ;;  %v4828_v55 = vmul.f32 -1.442695, %v3472_v53 }
0x262d   :  { %5687 = vpow2.f32 %v4826_v38  ;;  %v4827_v19 = vmul.f32 -1.442695, %v3459_v17 }
0x262e   :  { %v6776_v20 = vpop.f32.mrb[96].mxu0  ;;  %v4829_v0 = vmul.f32 -1.442695, %v3473_v54 }
0x262f   :  { %5689 = vpow2.f32 %v4827_v19  ;;  %v5381_v35 = vpop.f32.mrb[97].mxu0 }
0x2630   :  { %v3335_v23 = vpop.f32.mrb[98].mxu0 }
0x2631   :  { %v5382_v36 = vpop.f32.mrb[99].mxu0 }
0x2637   :  { %v5688_v33 = vpop.eup %5687 }
0x2638   :  { %v3466_v58 = vadd.f32 1.0, %v5688_v33 }
0x2639   :  { %v5690_v37 = vpop.eup %5689 }
0x263a   :  { %5691 = vrcp.f32 %v3466_v58  ;;  %v3467_v39 = vadd.f32 1.0, %v5690_v37 }
0x263c   :  { %5693 = vrcp.f32 %v3467_v39 }
0x2644   :  { %v5692_v40 = vpop.eup %5691 }
0x2645   :  { %v3492_v42 = vmul.f32 %v5692_v40, %v3487_v41 }
0x2646   :  { %v5694_v43 = vpop.eup %5693 }
0x2647   :  { %v3493_v60 = vmul.f32 %v5694_v43, %v3489_v7  ;;  %3496 = vrot.lane.b32.xlu1 %v3492_v42, %s5890_s27 }
0x2649   :  { %3498 = vrot.lane.b32.xlu0 %v3493_v60, %s5890_s27 }
0x26b9   :  { %v3497_v44 = vpop.permute.xlu1 %3496 }
0x26ba   :  { %v3502_v45 = vadd.f32 %v3497_v44, %v6768_v25 }
0x26bb   :  { %v3499_v46 = vpop.permute.xlu0 %3498 }
0x26bc   :  { %5695 = vtanh.f32 %v3502_v45  ;;  %v3503_v51 = vadd.f32 %v3499_v46, %v6773_v31 }
0x26be   :  { %5697 = vtanh.f32 %v3503_v51 }
0x26bf   :  { %5699 = vpow2.f32 %v4828_v55 }
0x26c0   :  { %5701 = vpow2.f32 %v4829_v0 }
0x26c6   :  { %v5696_v8 = vpop.eup %5695 }
0x26c7   :  { %3510 = vrot.lane.b32.xlu1 %v5696_v8, %s5895_s6 }
0x26c8   :  { %v5698_v52 = vpop.eup %5697 }
0x26c9   :  { %3512 = vrot.lane.b32.xlu0 %v5698_v52, %s5895_s6  ;;  %v5700_v56 = vpop.eup %5699 }
0x26ca   :  { %v5702_v57 = vpop.eup %5701  ;;  %v3480_v61 = vadd.f32 1.0, %v5700_v56 }
0x26cb   :  { %v3481_v63 = vadd.f32 1.0, %v5702_v57 }
0x26cc   :  { %5703 = vrcp.f32 %v3480_v61 }
0x26cd   :  { %5705 = vrcp.f32 %v3481_v63 }
0x26d6   :  { %v5704_v1 = vpop.eup %5703 }
0x26d7   :  { %v5706_v4 = vpop.eup %5705  ;;  %v3506_v3 = vsub.f32 1.0, %v5704_v1  ;;  %v3518_v12 = vmul.f32 0.0, %v5704_v1 }
0x26d8   :  { %v3507_v6 = vsub.f32 1.0, %v5706_v4  ;;  %v3519_v11 = vmul.f32 0.0, %v5706_v4 }
0x2739   :  { %v3511_v5 = vpop.permute.xlu1 %3510 }
0x273a   :  { %v3516_v13 = vmul.f32 %v3511_v5, %v3506_v3 }
0x273b   :  { %v3513_v9 = vpop.permute.xlu0 %3512 }
0x273c   :  { %v6786_v10 = vadd.f32 %v3518_v12, %v3516_v13  ;;  %v3517_v59 = vmul.f32 %v3513_v9, %v3507_v6 }
0x273e   :  { %v3522_v14 = vpack.c.bf16 %v6786_v10, %v6786_v10  ;;  %v3521_v50 = vadd.f32 %v3519_v11, %v3517_v59  ;;  %v3647_v56 = vrot.slane %v6786_v10, 1 }
0x2740   :  { %v3526_v62 = vunpack.c.l.b16 %v3522_v14  ;;  %v3523_v16 = vpack.c.bf16 %v3521_v50, %v3521_v50  ;;  %v3648_v52 = vrot.slane %v3521_v50, 1 }
0x2742   :  { %v3527_v18 = vunpack.c.l.b16 %v3523_v16  ;;  %v3528_v21 = vrot.slane %v3526_v62, 7 }
0x2744   :  { %v3529_v22 = vrot.slane %v3527_v18, 6 }
0x2746   :  { %v3531_v2 = vsel %vm3530_vm8, %v3529_v22, %v3528_v21 }
0x2747   :  { %v3532_v27 = vpack.c.b16 %v3531_v2, %v3531_v2 }
0x2749   :  { %5396 = vmatmul.mubr.msk.bf16.vlgmr.msra.gmra.mrb[100].mxu0 %vm3294_vm9, %v3532_v27 }
0x274a   :  { %5408 = vmatpush3.bf16.msra.mxu0 %v6682_v32  ;;  %5411 = vmatprep.mubr.msk.bf16.mxu0 %vm5889_vm4, %v5888_v15 }
0x274b   :  { %5409 = vmatprep.subr.bf16.mxu0 %v5888_v15 }
0x274e   :  { %5410 = vmatpush3.bf16.msra.mxu0 %v6688_v34 }
0x274f   :  { %5423 = vmatprep.subr.bf16.mxu0 %v5888_v15 }
0x281c   :  { %v3570_v48 = vpop.f32.mrb[100].mxu0 }
0x281d   :  { %v3571_v49 = vadd.f32 %v3570_v48, %v6730_v47  ;;  %v5397_v30 = vpop.f32.mrb[101].mxu0 }
0x281e   :  { %v3573_v28 = vpop.f32.mrb[102].mxu0 }
0x281f   :  { %v3577_v29 = vrot.slane %v3571_v49, 2  ;;  %v3578_v38 = vrot.slane %v3571_v49, 3  ;;  %v5398_v17 = vpop.f32.mrb[103].mxu0 }
0x2821   :  { %3581 = vrot.lane.b32.xlu0 %v3578_v38, %s5895_s6  ;;  %3579 = vrot.lane.b32.xlu1 %v3577_v29, %s5895_s6 }
0x2825   :  { %3615 = vrot.lane.b32.xlu0 %v3578_v38, %s5894_s30  ;;  %3613 = vrot.lane.b32.xlu1 %v3577_v29, %s5894_s30 }
0x2893   :  { %v3582_v19 = vpop.permute.xlu0 %3581  ;;  %v3580_v35 = vpop.permute.xlu1 %3579 }
0x2894   :  { %v3586_v23 = vadd.f32 %v3582_v19, %v6771_v26  ;;  %v3600_v36 = vadd.f32 %v3582_v19, %v6773_v31  ;;  %v3585_v33 = vadd.f32 %v3580_v35, %v6766_v24  ;;  %v3599_v58 = vadd.f32 %v3580_v35, %v6768_v25 }
0x2896   :  { %v4832_v37 = vmul.f32 -1.442695, %v3586_v23  ;;  %v4834_v39 = vmul.f32 -1.442695, %v3600_v36  ;;  %v4831_v40 = vmul.f32 -1.442695, %v3585_v33 }
0x2897   :  { %v4833_v41 = vmul.f32 -1.442695, %v3599_v58  ;;  %v3616_v53 = vpop.permute.xlu0 %3615  ;;  %v3614_v57 = vpop.permute.xlu1 %3613 }
0x2898   :  { %5707 = vpow2.f32 %v4832_v37 }
0x2899   :  { %5709 = vpow2.f32 %v4834_v39 }
0x289a   :  { %5711 = vpow2.f32 %v4831_v40 }
0x289b   :  { %5713 = vpow2.f32 %v4833_v41 }
0x28a2   :  { %v5708_v42 = vpop.eup %5707 }
0x28a3   :  { %v5710_v43 = vpop.eup %5709  ;;  %v3594_v7 = vadd.f32 1.0, %v5708_v42 }
0x28a4   :  { %v5712_v60 = vpop.eup %5711  ;;  %v3608_v44 = vadd.f32 1.0, %v5710_v43 }
0x28a5   :  { %v5714_v45 = vpop.eup %5713  ;;  %5715 = vrcp.f32 %v3594_v7  ;;  %v3593_v46 = vadd.f32 1.0, %v5712_v60 }
0x28a6   :  { %5717 = vrcp.f32 %v3608_v44  ;;  %v3607_v51 = vadd.f32 1.0, %v5714_v45 }
0x28a7   :  { %5719 = vrcp.f32 %v3593_v46 }
0x28a8   :  { %5721 = vrcp.f32 %v3607_v51 }
0x28af   :  { %v5716_v8 = vpop.eup %5715 }
0x28b0   :  { %v5718_v54 = vpop.eup %5717  ;;  %v3620_v55 = vmul.f32 %v5716_v8, %v3616_v53 }
0x28b1   :  { %v5720_v0 = vpop.eup %5719  ;;  %v3652_v61 = vmul.f32 %v5718_v54, %v3648_v52  ;;  %v3634_v10 = vsub.f32 1.0, %v5718_v54 }
0x28b2   :  { %v5722_v63 = vpop.eup %5721  ;;  %v3619_v1 = vmul.f32 %v5720_v0, %v3614_v57  ;;  %3625 = vrot.lane.b32.xlu0 %v3620_v55, %s5890_s27 }
0x28b3   :  { %v3651_v4 = vmul.f32 %v5722_v63, %v3647_v56  ;;  %v3633_v14 = vsub.f32 1.0, %v5722_v63 }
0x28b4   :  { %3623 = vrot.lane.b32.xlu1 %v3619_v1, %s5890_s27 }
0x2924   :  { %v3626_v3 = vpop.permute.xlu0 %3625 }
0x2925   :  { %v3630_v5 = vadd.f32 %v3626_v3, %v6773_v31 }
0x2926   :  { %v3624_v12 = vpop.permute.xlu1 %3623 }
0x2927   :  { %5723 = vtanh.f32 %v3630_v5  ;;  %v3629_v13 = vadd.f32 %v3624_v12, %v6768_v25 }
0x2929   :  { %5725 = vtanh.f32 %v3629_v13 }
0x2931   :  { %v5724_v6 = vpop.eup %5723 }
0x2932   :  { %3639 = vrot.lane.b32.xlu0 %v5724_v6, %s5895_s6 }
0x2933   :  { %v5726_v9 = vpop.eup %5725 }
0x2934   :  { %3637 = vrot.lane.b32.xlu1 %v5726_v9, %s5895_s6 }
0x29a4   :  { %v3640_v11 = vpop.permute.xlu0 %3639 }
0x29a5   :  { %v3644_v59 = vmul.f32 %v3640_v11, %v3634_v10 }
0x29a6   :  { %v3638_v50 = vpop.permute.xlu1 %3637 }
0x29a7   :  { %v6814_v62 = vadd.f32 %v3652_v61, %v3644_v59  ;;  %v3643_v16 = vmul.f32 %v3638_v50, %v3633_v14 }
0x29a9   :  { %v3656_v18 = vpack.c.bf16 %v6814_v62, %v6814_v62  ;;  %v6818_v21 = vadd.f32 %v3651_v4, %v3643_v16  ;;  %v3780_v0 = vrot.slane %v6814_v62, 1 }
0x29ab   :  { %v3660_v22 = vunpack.c.l.b16 %v3656_v18  ;;  %v3655_v2 = vpack.c.bf16 %v6818_v21, %v6818_v21  ;;  %v3779_v1 = vrot.slane %v6818_v21, 1 }
0x29ad   :  { %v3662_v27 = vrot.slane %v3660_v22, 5  ;;  %v3659_v48 = vunpack.c.l.b16 %v3655_v2 }
0x29af   :  { %v3661_v49 = vrot.slane %v3659_v48, 6 }
0x29b1   :  { %v3663_v30 = vsel %vm3530_vm8, %v3662_v27, %v3661_v49 }
0x29b2   :  { %v3664_v28 = vpack.c.b16 %v3663_v30, %v3663_v30 }
0x29b4   :  { %5404 = vmatmul.mubr.msk.bf16.vlgmr.msra.gmra.mrb[100].mxu1 %vm3294_vm9, %v3664_v28 }
0x29b5   :  { %5416 = vmatpush3.bf16.msra.mxu1 %v6682_v32  ;;  %5419 = vmatprep.mubr.msk.bf16.mxu1 %vm5889_vm4, %v5888_v15 }
0x29b6   :  { %5417 = vmatprep.subr.bf16.mxu1 %v5888_v15 }
0x29b9   :  { %5418 = vmatpush3.bf16.msra.mxu1 %v6688_v34 }
0x29ba   :  { %5431 = vmatprep.subr.bf16.mxu1 %v5888_v15 }
0x2a87   :  { %v3702_v29 = vpop.f32.mrb[100].mxu1 }
0x2a88   :  { %v3703_v38 = vadd.f32 %v3702_v29, %v6730_v47  ;;  %v5405_v17 = vpop.f32.mrb[101].mxu1 }
0x2a89   :  { %v3705_v19 = vpop.f32.mrb[102].mxu1 }
0x2a8a   :  { %v3709_v35 = vrot.slane %v3703_v38, 3  ;;  %v3710_v23 = vrot.slane %v3703_v38, 4  ;;  %v5406_v36 = vpop.f32.mrb[103].mxu1 }
0x2a8c   :  { %3713 = vrot.lane.b32.xlu0 %v3710_v23, %s5895_s6  ;;  %3711 = vrot.lane.b32.xlu1 %v3709_v35, %s5895_s6 }
0x2a90   :  { %3747 = vrot.lane.b32.xlu0 %v3710_v23, %s5894_s30  ;;  %3745 = vrot.lane.b32.xlu1 %v3709_v35, %s5894_s30 }
0x2afe   :  { %v3714_v33 = vpop.permute.xlu0 %3713  ;;  %v3712_v58 = vpop.permute.xlu1 %3711 }
0x2aff   :  { %v3718_v37 = vadd.f32 %v3714_v33, %v6771_v26  ;;  %v3732_v39 = vadd.f32 %v3714_v33, %v6773_v31  ;;  %v3717_v40 = vadd.f32 %v3712_v58, %v6766_v24  ;;  %v3731_v41 = vadd.f32 %v3712_v58, %v6768_v25 }
0x2b01   :  { %v4837_v42 = vmul.f32 -1.442695, %v3718_v37  ;;  %v4839_v43 = vmul.f32 -1.442695, %v3732_v39  ;;  %v4836_v7 = vmul.f32 -1.442695, %v3717_v40 }
0x2b02   :  { %v4838_v60 = vmul.f32 -1.442695, %v3731_v41  ;;  %v3748_v56 = vpop.permute.xlu0 %3747  ;;  %v3746_v4 = vpop.permute.xlu1 %3745 }
0x2b03   :  { %5727 = vpow2.f32 %v4837_v42 }
0x2b04   :  { %5729 = vpow2.f32 %v4839_v43 }
0x2b05   :  { %5731 = vpow2.f32 %v4836_v7 }
0x2b06   :  { %5733 = vpow2.f32 %v4838_v60 }
0x2b0d   :  { %v5728_v44 = vpop.eup %5727 }
0x2b0e   :  { %v5730_v45 = vpop.eup %5729  ;;  %v3726_v46 = vadd.f32 1.0, %v5728_v44 }
0x2b0f   :  { %v5732_v51 = vpop.eup %5731  ;;  %v3740_v8 = vadd.f32 1.0, %v5730_v45 }
0x2b10   :  { %v5734_v52 = vpop.eup %5733  ;;  %5735 = vrcp.f32 %v3726_v46  ;;  %v3725_v53 = vadd.f32 1.0, %v5732_v51 }
0x2b11   :  { %5737 = vrcp.f32 %v3740_v8  ;;  %v3739_v54 = vadd.f32 1.0, %v5734_v52 }
0x2b12   :  { %5739 = vrcp.f32 %v3725_v53 }
0x2b13   :  { %5741 = vrcp.f32 %v3739_v54 }
0x2b1a   :  { %v5736_v55 = vpop.eup %5735 }
0x2b1b   :  { %v5738_v57 = vpop.eup %5737  ;;  %v3752_v61 = vmul.f32 %v5736_v55, %v3748_v56 }
0x2b1c   :  { %v5740_v63 = vpop.eup %5739  ;;  %v3784_v3 = vmul.f32 %v5738_v57, %v3780_v0  ;;  %v3766_v50 = vsub.f32 1.0, %v5738_v57 }
0x2b1d   :  { %v5742_v5 = vpop.eup %5741  ;;  %v3751_v12 = vmul.f32 %v5740_v63, %v3746_v4  ;;  %3757 = vrot.lane.b32.xlu0 %v3752_v61, %s5890_s27 }
0x2b1e   :  { %v3783_v13 = vmul.f32 %v5742_v5, %v3779_v1  ;;  %v3765_v18 = vsub.f32 1.0, %v5742_v5 }
0x2b1f   :  { %3755 = vrot.lane.b32.xlu1 %v3751_v12, %s5890_s27 }
0x2b8f   :  { %v3758_v6 = vpop.permute.xlu0 %3757 }
0x2b90   :  { %v3762_v9 = vadd.f32 %v3758_v6, %v6773_v31 }
0x2b91   :  { %v3756_v10 = vpop.permute.xlu1 %3755 }
0x2b92   :  { %5743 = vtanh.f32 %v3762_v9  ;;  %v3761_v11 = vadd.f32 %v3756_v10, %v6768_v25 }
0x2b94   :  { %5745 = vtanh.f32 %v3761_v11 }
0x2b9c   :  { %v5744_v59 = vpop.eup %5743 }
0x2b9d   :  { %3771 = vrot.lane.b32.xlu0 %v5744_v59, %s5895_s6 }
0x2b9e   :  { %v5746_v14 = vpop.eup %5745 }
0x2b9f   :  { %3769 = vrot.lane.b32.xlu1 %v5746_v14, %s5895_s6 }
0x2c0f   :  { %v3772_v62 = vpop.permute.xlu0 %3771 }
0x2c10   :  { %v3776_v16 = vmul.f32 %v3772_v62, %v3766_v50 }
0x2c11   :  { %v3770_v21 = vpop.permute.xlu1 %3769 }
0x2c12   :  { %v6847_v22 = vadd.f32 %v3784_v3, %v3776_v16  ;;  %v3775_v2 = vmul.f32 %v3770_v21, %v3765_v18 }
0x2c14   :  { %v3788_v27 = vpack.c.bf16 %v6847_v22, %v6847_v22  ;;  %v6851_v48 = vadd.f32 %v3783_v13, %v3775_v2  ;;  %v3912_v63 = vrot.slane %v6847_v22, 1 }
0x2c16   :  { %v3792_v49 = vunpack.c.l.b16 %v3788_v27  ;;  %v3787_v30 = vpack.c.bf16 %v6851_v48, %v6851_v48  ;;  %v3911_v12 = vrot.slane %v6851_v48, 1 }
0x2c18   :  { %v3794_v28 = vrot.slane %v3792_v49, 4  ;;  %v3791_v29 = vunpack.c.l.b16 %v3787_v30 }
0x2c1a   :  { %v3793_v38 = vrot.slane %v3791_v29, 5 }
0x2c1c   :  { %v3795_v17 = vsel %vm3530_vm8, %v3794_v28, %v3793_v38 }
0x2c1d   :  { %v3796_v19 = vpack.c.b16 %v3795_v17, %v3795_v17 }
0x2c1f   :  { %5412 = vmatmul.mubr.msk.bf16.vlgmr.msra.gmra.mrb[104].mxu0 %vm3294_vm9, %v3796_v19 }
0x2c20   :  { %5424 = vmatpush3.bf16.msra.mxu0 %v6682_v32  ;;  %5427 = vmatprep.mubr.msk.bf16.mxu0 %vm5889_vm4, %v5888_v15 }
0x2c21   :  { %5425 = vmatprep.subr.bf16.mxu0 %v5888_v15 }
0x2c24   :  { %5426 = vmatpush3.bf16.msra.mxu0 %v6688_v34 }
0x2c25   :  { %5439 = vmatprep.subr.bf16.mxu0 %v5888_v15 }
0x2cf2   :  { %v3834_v35 = vpop.f32.mrb[104].mxu0 }
0x2cf3   :  { %v3835_v23 = vadd.f32 %v3834_v35, %v6730_v47  ;;  %v5413_v36 = vpop.f32.mrb[105].mxu0 }
0x2cf4   :  { %v3837_v33 = vpop.f32.mrb[106].mxu0 }
0x2cf5   :  { %v3841_v58 = vrot.slane %v3835_v23, 4  ;;  %v3842_v37 = vrot.slane %v3835_v23, 5  ;;  %v5414_v39 = vpop.f32.mrb[107].mxu0 }
0x2cf7   :  { %3845 = vrot.lane.b32.xlu0 %v3842_v37, %s5895_s6  ;;  %3843 = vrot.lane.b32.xlu1 %v3841_v58, %s5895_s6 }
0x2cfb   :  { %3879 = vrot.lane.b32.xlu0 %v3842_v37, %s5894_s30  ;;  %3877 = vrot.lane.b32.xlu1 %v3841_v58, %s5894_s30 }
0x2d69   :  { %v3846_v40 = vpop.permute.xlu0 %3845  ;;  %v3844_v41 = vpop.permute.xlu1 %3843 }
0x2d6a   :  { %v3850_v42 = vadd.f32 %v3846_v40, %v6771_v26  ;;  %v3864_v43 = vadd.f32 %v3846_v40, %v6773_v31  ;;  %v3849_v7 = vadd.f32 %v3844_v41, %v6766_v24  ;;  %v3863_v60 = vadd.f32 %v3844_v41, %v6768_v25 }
0x2d6c   :  { %v4842_v44 = vmul.f32 -1.442695, %v3850_v42  ;;  %v4844_v45 = vmul.f32 -1.442695, %v3864_v43  ;;  %v4841_v46 = vmul.f32 -1.442695, %v3849_v7 }
0x2d6d   :  { %v4843_v51 = vmul.f32 -1.442695, %v3863_v60  ;;  %v3880_v1 = vpop.permute.xlu0 %3879  ;;  %v3878_v13 = vpop.permute.xlu1 %3877 }
0x2d6e   :  { %5747 = vpow2.f32 %v4842_v44 }
0x2d6f   :  { %5749 = vpow2.f32 %v4844_v45 }
0x2d70   :  { %5751 = vpow2.f32 %v4841_v46 }
0x2d71   :  { %5753 = vpow2.f32 %v4843_v51 }
0x2d78   :  { %v5748_v8 = vpop.eup %5747 }
0x2d79   :  { %v5750_v52 = vpop.eup %5749  ;;  %v3858_v53 = vadd.f32 1.0, %v5748_v8 }
0x2d7a   :  { %v5752_v54 = vpop.eup %5751  ;;  %v3872_v55 = vadd.f32 1.0, %v5750_v52 }
0x2d7b   :  { %v5754_v0 = vpop.eup %5753  ;;  %5755 = vrcp.f32 %v3858_v53  ;;  %v3857_v56 = vadd.f32 1.0, %v5752_v54 }
0x2d7c   :  { %5757 = vrcp.f32 %v3872_v55  ;;  %v3871_v57 = vadd.f32 1.0, %v5754_v0 }
0x2d7d   :  { %5759 = vrcp.f32 %v3857_v56 }
0x2d7e   :  { %5761 = vrcp.f32 %v3871_v57 }
0x2d85   :  { %v5756_v61 = vpop.eup %5755 }
0x2d86   :  { %v5758_v4 = vpop.eup %5757  ;;  %v3884_v3 = vmul.f32 %v5756_v61, %v3880_v1 }
0x2d87   :  { %v5760_v5 = vpop.eup %5759  ;;  %v3916_v6 = vmul.f32 %v5758_v4, %v3912_v63  ;;  %v3898_v21 = vsub.f32 1.0, %v5758_v4 }
0x2d88   :  { %v5762_v9 = vpop.eup %5761  ;;  %v3883_v10 = vmul.f32 %v5760_v5, %v3878_v13  ;;  %3889 = vrot.lane.b32.xlu0 %v3884_v3, %s5890_s27 }
0x2d89   :  { %v3915_v11 = vmul.f32 %v5762_v9, %v3911_v12  ;;  %v3897_v27 = vsub.f32 1.0, %v5762_v9 }
0x2d8a   :  { %3887 = vrot.lane.b32.xlu1 %v3883_v10, %s5890_s27 }
0x2dfa   :  { %v3890_v59 = vpop.permute.xlu0 %3889 }
0x2dfb   :  { %v3894_v14 = vadd.f32 %v3890_v59, %v6773_v31 }
0x2dfc   :  { %v3888_v50 = vpop.permute.xlu1 %3887 }
0x2dfd   :  { %5763 = vtanh.f32 %v3894_v14  ;;  %v3893_v62 = vadd.f32 %v3888_v50, %v6768_v25 }
0x2dff   :  { %5765 = vtanh.f32 %v3893_v62 }
0x2e07   :  { %v5764_v16 = vpop.eup %5763 }
0x2e08   :  { %3903 = vrot.lane.b32.xlu0 %v5764_v16, %s5895_s6 }
0x2e09   :  { %v5766_v18 = vpop.eup %5765 }
0x2e0a   :  { %3901 = vrot.lane.b32.xlu1 %v5766_v18, %s5895_s6 }
0x2e7a   :  { %v3904_v22 = vpop.permute.xlu0 %3903 }
0x2e7b   :  { %v3908_v2 = vmul.f32 %v3904_v22, %v3898_v21 }
0x2e7c   :  { %v3902_v48 = vpop.permute.xlu1 %3901 }
0x2e7d   :  { %v6880_v49 = vadd.f32 %v3916_v6, %v3908_v2  ;;  %v3907_v30 = vmul.f32 %v3902_v48, %v3897_v27 }
0x2e7f   :  { %v3920_v28 = vpack.c.bf16 %v6880_v49, %v6880_v49  ;;  %v6884_v29 = vadd.f32 %v3915_v11, %v3907_v30  ;;  %v4044_v5 = vrot.slane %v6880_v49, 1 }
0x2e81   :  { %v3924_v38 = vunpack.c.l.b16 %v3920_v28  ;;  %v3919_v17 = vpack.c.bf16 %v6884_v29, %v6884_v29  ;;  %v4043_v10 = vrot.slane %v6884_v29, 1 }
0x2e83   :  { %v3926_v19 = vrot.slane %v3924_v38, 3  ;;  %v3923_v35 = vunpack.c.l.b16 %v3919_v17 }
0x2e85   :  { %v3925_v23 = vrot.slane %v3923_v35, 4 }
0x2e87   :  { %v3927_v36 = vsel %vm3530_vm8, %v3926_v19, %v3925_v23 }
0x2e88   :  { %v3928_v33 = vpack.c.b16 %v3927_v36, %v3927_v36 }
0x2e8a   :  { %5420 = vmatmul.mubr.msk.bf16.vlgmr.msra.gmra.mrb[104].mxu1 %vm3294_vm9, %v3928_v33 }
0x2e8b   :  { %5432 = vmatpush3.bf16.msra.mxu1 %v6682_v32  ;;  %5435 = vmatprep.mubr.msk.bf16.mxu1 %vm5889_vm4, %v5888_v15 }
0x2e8c   :  { %5433 = vmatprep.subr.bf16.mxu1 %v5888_v15 }
0x2e8f   :  { %5434 = vmatpush3.bf16.msra.mxu1 %v6688_v34 }
0x2e90   :  { %5447 = vmatprep.subr.bf16.mxu1 %v5888_v15 }
0x2f5d   :  { %v3966_v58 = vpop.f32.mrb[104].mxu1 }
0x2f5e   :  { %v3967_v37 = vadd.f32 %v3966_v58, %v6730_v47  ;;  %v5421_v39 = vpop.f32.mrb[105].mxu1 }
0x2f5f   :  { %v3969_v40 = vpop.f32.mrb[106].mxu1 }
0x2f60   :  { %v3973_v41 = vrot.slane %v3967_v37, 5  ;;  %v3974_v42 = vrot.slane %v3967_v37, 6  ;;  %v5422_v43 = vpop.f32.mrb[107].mxu1 }
0x2f62   :  { %3977 = vrot.lane.b32.xlu0 %v3974_v42, %s5895_s6  ;;  %3975 = vrot.lane.b32.xlu1 %v3973_v41, %s5895_s6 }
0x2f66   :  { %4011 = vrot.lane.b32.xlu0 %v3974_v42, %s5894_s30  ;;  %4009 = vrot.lane.b32.xlu1 %v3973_v41, %s5894_s30 }
0x2fd4   :  { %v3978_v7 = vpop.permute.xlu0 %3977  ;;  %v3976_v60 = vpop.permute.xlu1 %3975 }
0x2fd5   :  { %v3982_v44 = vadd.f32 %v3978_v7, %v6771_v26  ;;  %v3996_v45 = vadd.f32 %v3978_v7, %v6773_v31  ;;  %v3981_v46 = vadd.f32 %v3976_v60, %v6766_v24  ;;  %v3995_v51 = vadd.f32 %v3976_v60, %v6768_v25 }
0x2fd7   :  { %v4847_v8 = vmul.f32 -1.442695, %v3982_v44  ;;  %v4849_v52 = vmul.f32 -1.442695, %v3996_v45  ;;  %v4846_v53 = vmul.f32 -1.442695, %v3981_v46 }
0x2fd8   :  { %v4848_v54 = vmul.f32 -1.442695, %v3995_v51  ;;  %v4012_v12 = vpop.permute.xlu0 %4011  ;;  %v4010_v11 = vpop.permute.xlu1 %4009 }
0x2fd9   :  { %5767 = vpow2.f32 %v4847_v8 }
0x2fda   :  { %5769 = vpow2.f32 %v4849_v52 }
0x2fdb   :  { %5771 = vpow2.f32 %v4846_v53 }
0x2fdc   :  { %5773 = vpow2.f32 %v4848_v54 }
0x2fe3   :  { %v5768_v55 = vpop.eup %5767 }
0x2fe4   :  { %v5770_v0 = vpop.eup %5769  ;;  %v3990_v56 = vadd.f32 1.0, %v5768_v55 }
0x2fe5   :  { %v5772_v57 = vpop.eup %5771  ;;  %v4004_v61 = vadd.f32 1.0, %v5770_v0 }
0x2fe6   :  { %v5774_v63 = vpop.eup %5773  ;;  %5775 = vrcp.f32 %v3990_v56  ;;  %v3989_v1 = vadd.f32 1.0, %v5772_v57 }
0x2fe7   :  { %5777 = vrcp.f32 %v4004_v61  ;;  %v4003_v4 = vadd.f32 1.0, %v5774_v63 }
0x2fe8   :  { %5779 = vrcp.f32 %v3989_v1 }
0x2fe9   :  { %5781 = vrcp.f32 %v4003_v4 }
0x2ff0   :  { %v5776_v3 = vpop.eup %5775 }
0x2ff1   :  { %v5778_v13 = vpop.eup %5777  ;;  %v4016_v6 = vmul.f32 %v5776_v3, %v4012_v12 }
0x2ff2   :  { %v5780_v9 = vpop.eup %5779  ;;  %v4048_v59 = vmul.f32 %v5778_v13, %v4044_v5  ;;  %v4030_v48 = vsub.f32 1.0, %v5778_v13 }
0x2ff3   :  { %v5782_v14 = vpop.eup %5781  ;;  %v4015_v50 = vmul.f32 %v5780_v9, %v4010_v11  ;;  %4021 = vrot.lane.b32.xlu0 %v4016_v6, %s5890_s27 }
0x2ff4   :  { %v4047_v62 = vmul.f32 %v5782_v14, %v4043_v10  ;;  %v4029_v28 = vsub.f32 1.0, %v5782_v14 }
0x2ff5   :  { %4019 = vrot.lane.b32.xlu1 %v4015_v50, %s5890_s27 }
0x3065   :  { %v4022_v16 = vpop.permute.xlu0 %4021 }
0x3066   :  { %v4026_v18 = vadd.f32 %v4022_v16, %v6773_v31 }
0x3067   :  { %v4020_v21 = vpop.permute.xlu1 %4019 }
0x3068   :  { %5783 = vtanh.f32 %v4026_v18  ;;  %v4025_v22 = vadd.f32 %v4020_v21, %v6768_v25 }
0x306a   :  { %5785 = vtanh.f32 %v4025_v22 }
0x3072   :  { %v5784_v2 = vpop.eup %5783 }
0x3073   :  { %4035 = vrot.lane.b32.xlu0 %v5784_v2, %s5895_s6 }
0x3074   :  { %v5786_v27 = vpop.eup %5785 }
0x3075   :  { %4033 = vrot.lane.b32.xlu1 %v5786_v27, %s5895_s6 }
0x30e5   :  { %v4036_v49 = vpop.permute.xlu0 %4035 }
0x30e6   :  { %v4040_v30 = vmul.f32 %v4036_v49, %v4030_v48 }
0x30e7   :  { %v4034_v29 = vpop.permute.xlu1 %4033 }
0x30e8   :  { %v6913_v38 = vadd.f32 %v4048_v59, %v4040_v30  ;;  %v4039_v17 = vmul.f32 %v4034_v29, %v4029_v28 }
0x30ea   :  { %v4052_v19 = vpack.c.bf16 %v6913_v38, %v6913_v38  ;;  %v6917_v35 = vadd.f32 %v4047_v62, %v4039_v17  ;;  %v4176_v12 = vrot.slane %v6913_v38, 1 }
0x30ec   :  { %v4056_v23 = vunpack.c.l.b16 %v4052_v19  ;;  %v4051_v36 = vpack.c.bf16 %v6917_v35, %v6917_v35  ;;  %v4175_v11 = vrot.slane %v6917_v35, 1 }
0x30ee   :  { %v4058_v33 = vrot.slane %v4056_v23, 2  ;;  %v4055_v58 = vunpack.c.l.b16 %v4051_v36 }
0x30f0   :  { %v4057_v37 = vrot.slane %v4055_v58, 3 }
0x30f2   :  { %v4059_v39 = vsel %vm3530_vm8, %v4058_v33, %v4057_v37 }
0x30f3   :  { %v4060_v40 = vpack.c.b16 %v4059_v39, %v4059_v39 }
0x30f5   :  { %5428 = vmatmul.mubr.msk.bf16.vlgmr.msra.gmra.mrb[108].mxu0 %vm3294_vm9, %v4060_v40 }
0x30f6   :  { %5440 = vmatpush3.bf16.msra.mxu0 %v6682_v32  ;;  %5443 = vmatprep.mubr.msk.bf16.mxu0 %vm5889_vm4, %v5888_v15 }
0x30f7   :  { %5441 = vmatprep.subr.bf16.mxu0 %v5888_v15 }
0x30fa   :  { %5442 = vmatpush3.bf16.msra.mxu0 %v6688_v34 }
0x30fb   :  { %5455 = vmatprep.subr.bf16.mxu0 %v5888_v15 }
0x31c8   :  { %v4098_v41 = vpop.f32.mrb[108].mxu0 }
0x31c9   :  { %v4099_v42 = vadd.f32 %v4098_v41, %v6730_v47  ;;  %v5429_v43 = vpop.f32.mrb[109].mxu0 }
0x31ca   :  { %v4101_v7 = vpop.f32.mrb[110].mxu0  ;;  %v6953_v43 = vld [vmem:[%s7109_s4 + $0x34] ss:$0 sm:$0xff] }
0x31cb   :  { %v4105_v60 = vrot.slane %v4099_v42, 6  ;;  %v4106_v44 = vrot.slane %v4099_v42, 7  ;;  %v5430_v45 = vpop.f32.mrb[111].mxu0 }
0x31cd   :  { %4109 = vrot.lane.b32.xlu0 %v4106_v44, %s5895_s6  ;;  %4107 = vrot.lane.b32.xlu1 %v4105_v60, %s5895_s6 }
0x31d1   :  { %4143 = vrot.lane.b32.xlu0 %v4106_v44, %s5894_s30  ;;  %4141 = vrot.lane.b32.xlu1 %v4105_v60, %s5894_s30 }
0x323f   :  { %v4110_v32 = vpop.permute.xlu0 %4109  ;;  %v4108_v34 = vpop.permute.xlu1 %4107 }
0x3240   :  { %v4114_v46 = vadd.f32 %v4110_v32, %v6771_v26  ;;  %v4128_v51 = vadd.f32 %v4110_v32, %v6773_v31  ;;  %v4113_v47 = vadd.f32 %v4108_v34, %v6766_v24  ;;  %v4127_v8 = vadd.f32 %v4108_v34, %v6768_v25 }
0x3242   :  { %v4852_v52 = vmul.f32 -1.442695, %v4114_v46  ;;  %v4854_v53 = vmul.f32 -1.442695, %v4128_v51  ;;  %v4851_v54 = vmul.f32 -1.442695, %v4113_v47 }
0x3243   :  { %v4853_v55 = vmul.f32 -1.442695, %v4127_v8  ;;  %v4144_v13 = vpop.permute.xlu0 %4143  ;;  %v4142_v59 = vpop.permute.xlu1 %4141 }
0x3244   :  { %5787 = vpow2.f32 %v4852_v52 }
0x3245   :  { %5789 = vpow2.f32 %v4854_v53 }
0x3246   :  { %5791 = vpow2.f32 %v4851_v54 }
0x3247   :  { %5793 = vpow2.f32 %v4853_v55 }
0x324e   :  { %v5788_v0 = vpop.eup %5787 }
0x324f   :  { %v5790_v56 = vpop.eup %5789  ;;  %v4122_v57 = vadd.f32 1.0, %v5788_v0 }
0x3250   :  { %v5792_v61 = vpop.eup %5791  ;;  %v4136_v63 = vadd.f32 1.0, %v5790_v56 }
0x3251   :  { %v5794_v1 = vpop.eup %5793  ;;  %5795 = vrcp.f32 %v4122_v57  ;;  %v4121_v4 = vadd.f32 1.0, %v5792_v61 }
0x3252   :  { %5797 = vrcp.f32 %v4136_v63  ;;  %v4135_v3 = vadd.f32 1.0, %v5794_v1 }
0x3253   :  { %5799 = vrcp.f32 %v4121_v4 }
0x3254   :  { %5801 = vrcp.f32 %v4135_v3 }
0x325b   :  { %v5796_v5 = vpop.eup %5795 }
0x325c   :  { %v5798_v6 = vpop.eup %5797  ;;  %v4148_v9 = vmul.f32 %v5796_v5, %v4144_v13 }
0x325d   :  { %v5800_v10 = vpop.eup %5799  ;;  %v4180_v14 = vmul.f32 %v5798_v6, %v4176_v12  ;;  %v4162_v49 = vsub.f32 1.0, %v5798_v6 }
0x325e   :  { %v5802_v50 = vpop.eup %5801  ;;  %v4147_v62 = vmul.f32 %v5800_v10, %v4142_v59  ;;  %4153 = vrot.lane.b32.xlu0 %v4148_v9, %s5890_s27 }
0x325f   :  { %v4179_v16 = vmul.f32 %v5802_v50, %v4175_v11  ;;  %v4161_v29 = vsub.f32 1.0, %v5802_v50 }
0x3260   :  { %4151 = vrot.lane.b32.xlu1 %v4147_v62, %s5890_s27 }
0x32d0   :  { %v4154_v18 = vpop.permute.xlu0 %4153 }
0x32d1   :  { %v4158_v21 = vadd.f32 %v4154_v18, %v6773_v31 }
0x32d2   :  { %v4152_v22 = vpop.permute.xlu1 %4151 }
0x32d3   :  { %5803 = vtanh.f32 %v4158_v21  ;;  %v4157_v2 = vadd.f32 %v4152_v22, %v6768_v25 }
0x32d5   :  { %5805 = vtanh.f32 %v4157_v2 }
0x32dd   :  { %v5804_v27 = vpop.eup %5803 }
0x32de   :  { %4167 = vrot.lane.b32.xlu0 %v5804_v27, %s5895_s6 }
0x32df   :  { %v5806_v48 = vpop.eup %5805 }
0x32e0   :  { %4165 = vrot.lane.b32.xlu1 %v5806_v48, %s5895_s6  ;;  %v3281_v48 = vld [vmem:[%s7109_s4 + $0x33] ss:$0 sm:$0xff] }
0x3350   :  { %v4168_v30 = vpop.permute.xlu0 %4167 }
0x3351   :  { %v4172_v28 = vmul.f32 %v4168_v30, %v4162_v49  ;;  %v3333_v30 = vadd.f32 %v6776_v20, %v3281_v48  ;;  %v4447_v48 = vld [vmem:[%s7109_s4 + $0x40] ss:$0 sm:$0xff] }
0x3352   :  { %v4166_v38 = vpop.permute.xlu1 %4165 }
0x3353   :  { %v4182_v17 = vadd.f32 %v4180_v14, %v4172_v28  ;;  %v4171_v19 = vmul.f32 %v4166_v38, %v4161_v29  ;;  %v3339_v29 = vrot.slane %v3333_v30, 1 }
0x3355   :  { %v4184_v35 = vpack.c.bf16 %v4182_v17, %v4182_v17  ;;  %v4181_v23 = vadd.f32 %v4179_v16, %v4171_v19  ;;  %v4307_v13 = vrot.slane %v4182_v17, 1 }
0x3357   :  { %v4188_v36 = vunpack.c.l.b16 %v4184_v35  ;;  %v4183_v33 = vpack.c.bf16 %v4181_v23, %v4181_v23  ;;  %v4306_v59 = vrot.slane %v4181_v23, 1 }
0x3359   :  { %v4190_v58 = vrot.slane %v4188_v36, 1  ;;  %v4187_v37 = vunpack.c.l.b16 %v4183_v33 }
0x335b   :  { %v4189_v39 = vrot.slane %v4187_v37, 2 }
0x335d   :  { %v4191_v40 = vsel %vm3530_vm8, %v4190_v58, %v4189_v39 }
0x335e   :  { %v4192_v41 = vpack.c.b16 %v4191_v40, %v4191_v40 }
0x3360   :  { %5436 = vmatmul.mubr.msk.bf16.vlgmr.msra.gmra.mrb[108].mxu1 %vm3294_vm9, %v4192_v41 }
0x3361   :  { %5451 = vmatprep.mubr.msk.bf16.mxu1 %vm5889_vm4, %v5888_v15 }
0x3433   :  { %v4230_v42 = vpop.f32.mrb[108].mxu1 }
0x3434   :  { %v4231_v7 = vadd.f32 %v6953_v43, %v4230_v42  ;;  %v5437_v60 = vpop.f32.mrb[109].mxu1 }
0x3435   :  { %v4233_v44 = vpop.f32.mrb[110].mxu1  ;;  %v3343_v60 = vadd.f32 %v3339_v29, %v6771_v26 }
0x3436   :  { %v4237_v45 = vrot.slane %v4231_v7, 7  ;;  %4240 = vrot.lane.b32.xlu0 %v4231_v7, %s5895_s6  ;;  %v5438_v32 = vpop.f32.mrb[111].mxu1  ;;  %v3342_v44 = vadd.f32 %v3333_v30, %v6766_v24 }
0x3438   :  { %4238 = vrot.lane.b32.xlu1 %v4237_v45, %s5895_s6  ;;  %v4822_v32 = vmul.f32 -1.442695, %v3342_v44 }
0x343a   :  { %4274 = vrot.lane.b32.xlu0 %v4231_v7, %s5894_s30 }
0x343c   :  { %4272 = vrot.lane.b32.xlu1 %v4237_v45, %s5894_s30  ;;  %v4823_v45 = vmul.f32 -1.442695, %v3343_v60  ;;  %v4444_v60 = vld [vmem:[%s7109_s4 + $0x35] ss:$0 sm:$0xff] }
0x34a8   :  { %v4241_v34 = vpop.permute.xlu0 %4240 }
0x34a9   :  { %v4245_v46 = vadd.f32 %v4241_v34, %v6771_v26  ;;  %v4259_v51 = vadd.f32 %v4241_v34, %v6773_v31 }
0x34aa   :  { %v4239_v47 = vpop.permute.xlu1 %4238 }
0x34ab   :  { %v4857_v8 = vmul.f32 -1.442695, %v4245_v46  ;;  %v4859_v52 = vmul.f32 -1.442695, %v4259_v51  ;;  %v4244_v53 = vadd.f32 %v4239_v47, %v6766_v24  ;;  %v4258_v54 = vadd.f32 %v4239_v47, %v6768_v25 }
0x34ac   :  { %v4275_v6 = vpop.permute.xlu0 %4274 }
0x34ad   :  { %5807 = vpow2.f32 %v4857_v8  ;;  %v4856_v55 = vmul.f32 -1.442695, %v4244_v53  ;;  %v4858_v0 = vmul.f32 -1.442695, %v4258_v54 }
0x34ae   :  { %5809 = vpow2.f32 %v4859_v52  ;;  %v4273_v14 = vpop.permute.xlu1 %4272 }
0x34af   :  { %5811 = vpow2.f32 %v4856_v55 }
0x34b0   :  { %5813 = vpow2.f32 %v4858_v0 }
0x34b7   :  { %v5808_v56 = vpop.eup %5807 }
0x34b8   :  { %v5810_v57 = vpop.eup %5809  ;;  %v4253_v61 = vadd.f32 1.0, %v5808_v56 }
0x34b9   :  { %v5812_v63 = vpop.eup %5811  ;;  %v4267_v1 = vadd.f32 1.0, %v5810_v57 }
0x34ba   :  { %v5814_v4 = vpop.eup %5813  ;;  %5815 = vrcp.f32 %v4253_v61  ;;  %v4252_v3 = vadd.f32 1.0, %v5812_v63 }
0x34bb   :  { %5817 = vrcp.f32 %v4267_v1  ;;  %v4266_v5 = vadd.f32 1.0, %v5814_v4 }
0x34bc   :  { %5819 = vrcp.f32 %v4252_v3 }
0x34bd   :  { %5821 = vrcp.f32 %v4266_v5 }
0x34c4   :  { %v5816_v12 = vpop.eup %5815 }
0x34c5   :  { %v5818_v9 = vpop.eup %5817  ;;  %v4279_v10 = vmul.f32 %v5816_v12, %v4275_v6 }
0x34c6   :  { %v5820_v11 = vpop.eup %5819  ;;  %v4311_v50 = vmul.f32 %v5818_v9, %v4307_v13  ;;  %v4293_v38 = vsub.f32 1.0, %v5818_v9 }
0x34c7   :  { %v5822_v62 = vpop.eup %5821  ;;  %v4278_v16 = vmul.f32 %v5820_v11, %v4273_v14  ;;  %4284 = vrot.lane.b32.xlu0 %v4279_v10, %s5890_s27 }
0x34c8   :  { %v4310_v18 = vmul.f32 %v5822_v62, %v4306_v59  ;;  %v4292_v35 = vsub.f32 1.0, %v5822_v62 }
0x34c9   :  { %4282 = vrot.lane.b32.xlu1 %v4278_v16, %s5890_s27 }
0x3539   :  { %v4285_v21 = vpop.permute.xlu0 %4284 }
0x353a   :  { %v4289_v22 = vadd.f32 %v4285_v21, %v6773_v31 }
0x353b   :  { %v4283_v2 = vpop.permute.xlu1 %4282 }
0x353c   :  { %5823 = vtanh.f32 %v4289_v22  ;;  %v4288_v27 = vadd.f32 %v4283_v2, %v6768_v25 }
0x353e   :  { %5825 = vtanh.f32 %v4288_v27 }
0x353f   :  { %5827 = vpow2.f32 %v4823_v45 }
0x3540   :  { %5829 = vpow2.f32 %v4822_v32 }
0x3546   :  { %v5824_v49 = vpop.eup %5823 }
0x3547   :  { %4298 = vrot.lane.b32.xlu0 %v5824_v49, %s5895_s6 }
0x3548   :  { %v5826_v28 = vpop.eup %5825 }
0x3549   :  { %4296 = vrot.lane.b32.xlu1 %v5826_v28, %s5895_s6  ;;  %v5828_v34 = vpop.eup %5827  ;;  %v4448_v28 = vadd.f32 1e-05, %v4447_v48 }
0x354a   :  { %v3351_v46 = vadd.f32 1.0, %v5828_v34  ;;  %v5830_v51 = vpop.eup %5829 }
0x354b   :  { %3356 = vrot.lane.b32.xlu0 %v3333_v30, %s5890_s27  ;;  %v3350_v47 = vadd.f32 1.0, %v5830_v51 }
0x354c   :  { %5831 = vrcp.f32 %v3351_v46 }
0x354d   :  { %3358 = vrot.lane.b32.xlu1 %v3339_v29, %s5890_s27  ;;  %5833 = vrcp.f32 %v3350_v47 }
0x3556   :  { %v6992_v57 = vpop.eup %5831 }
0x3557   :  { %v6997_v1 = vpop.eup %5833 }
0x3558   :  { %v3376_v46 = vsub.f32 1.0, %v6997_v1 }
0x35b9   :  { %v4299_v17 = vpop.permute.xlu0 %4298 }
0x35ba   :  { %v4303_v19 = vmul.f32 %v4299_v17, %v4293_v38 }
0x35bb   :  { %v4297_v23 = vpop.permute.xlu1 %4296 }
0x35bc   :  { %v6976_v36 = vadd.f32 %v4311_v50, %v4303_v19  ;;  %v4302_v33 = vmul.f32 %v4297_v23, %v4292_v35 }
0x35bd   :  { %v3357_v63 = vpop.permute.xlu0 %3356 }
0x35be   :  { %v6978_v58 = vadd.f32 %v4310_v18, %v4302_v33  ;;  %v4315_v20 = vpack.c.bf16 %v6976_v36, %v6976_v36 }
0x35bf   :  { %v3359_v54 = vpop.permute.xlu1 %3358 }
0x35c0   :  { %v4314_v37 = vpack.c.bf16 %v6978_v58, %v6978_v58  ;;  %v4319_v40 = vunpack.c.l.b16 %v4315_v20  ;;  %v3363_v61 = vmul.f32 %v6992_v57, %v3359_v54  ;;  %v4436_v19 = vrot.slane %v6978_v58, 1 }
0x35c1   :  { %v3389_v54 = vmul.f32 0.0, %v6992_v57 }
0x35c2   :  { %v4318_v39 = vunpack.c.l.b16 %v4314_v37  ;;  %v4437_v37 = vrot.slane %v6976_v36, 1  ;;  %v4446_v36 = vld [vmem:[%s7109_s4 + $0x37] ss:$0 sm:$0xff] }
0x35c4   :  { %v4320_v41 = vrot.slane %v4318_v39, 1 }
0x35c6   :  { %v4321_v42 = vsel %vm3530_vm8, %v4319_v40, %v4320_v41 }
0x35c7   :  { %v4322_v7 = vpack.c.b16 %v4321_v42, %v4321_v42 }
0x35c9   :  { %5444 = vmatmul.mubr.msk.bf16.vlgmr.msra.gmra.mrb[112].mxu0 %vm3294_vm9, %v4322_v7  ;;  %v4445_v7 = vld [vmem:[%s7109_s4 + $0x36] ss:$0 sm:$0xff] }
0x35ca   :  { %5459 = vmatprep.mubr.msk.bf16.mxu0 %vm5889_vm4, %v5888_v15 }
0x369c   :  { %v4360_v8 = vpop.f32.mrb[112].mxu0 }
0x369d   :  { %v4361_v52 = vadd.f32 %v6953_v43, %v4360_v8  ;;  %v5445_v53 = vpop.f32.mrb[113].mxu0  ;;  %v3362_v43 = vmul.f32 %v6997_v1, %v3357_v63  ;;  %v3377_v8 = vsub.f32 1.0, %v6992_v57 }
0x369e   :  { %v4363_v55 = vpop.f32.mrb[114].mxu0  ;;  %v3388_v53 = vmul.f32 0.0, %v6997_v1  ;;  %v5590_v1 = vld [vmem:[%s7108_s3 + $0x310] ss:$8 sps:$4 sm:$0xff]  }
0x369f   :  { %v4367_v0 = vrot.slane %v4361_v52, 1  ;;  %4368 = vrot.lane.b32.xlu0 %v4361_v52, %s5895_s6  ;;  %v5446_v56 = vpop.f32.mrb[115].mxu0 }
0x36a1   :  { %4370 = vrot.lane.b32.xlu1 %v4367_v0, %s5895_s6 }
0x36a3   :  { %3368 = vrot.lane.b32.xlu0 %v3363_v61, %s5890_s27 }
0x36a5   :  { %4404 = vrot.lane.b32.xlu1 %v4367_v0, %s5894_s30 }
0x36a7   :  { %3366 = vrot.lane.b32.xlu0 %v3362_v43, %s5890_s27 }
0x36a9   :  { %4402 = vrot.lane.b32.xlu1 %v4361_v52, %s5894_s30 }
0x3711   :  { %v4369_v4 = vpop.permute.xlu0 %4368 }
0x3712   :  { %v4374_v3 = vadd.f32 %v4369_v4, %v6766_v24  ;;  %v4388_v5 = vadd.f32 %v4369_v4, %v6768_v25 }
0x3713   :  { %v4371_v12 = vpop.permute.xlu1 %4370 }
0x3714   :  { %v4861_v13 = vmul.f32 -1.442695, %v4374_v3  ;;  %v4863_v6 = vmul.f32 -1.442695, %v4388_v5  ;;  %v4375_v9 = vadd.f32 %v4371_v12, %v6771_v26  ;;  %v4389_v10 = vadd.f32 %v4371_v12, %v6773_v31 }
0x3715   :  { %v3369_v14 = vpop.permute.xlu0 %3368 }
0x3716   :  { %5835 = vpow2.f32 %v4861_v13  ;;  %v4862_v11 = vmul.f32 -1.442695, %v4375_v9  ;;  %v4864_v59 = vmul.f32 -1.442695, %v4389_v10  ;;  %v3373_v29 = vadd.f32 %v3369_v14, %v6771_v26 }
0x3717   :  { %5837 = vpow2.f32 %v4863_v6  ;;  %v4405_v38 = vpop.permute.xlu1 %4404 }
0x3718   :  { %5839 = vpow2.f32 %v4862_v11 }
0x3719   :  { %5841 = vpow2.f32 %v4864_v59  ;;  %v3367_v22 = vpop.permute.xlu0 %3366  ;;  %v5591_v59 = vld [vmem:[%s7108_s3 + $0x320] ss:$8 sps:$4 sm:$0xff]  }
0x371a   :  { %v3372_v30 = vadd.f32 %v3367_v22, %v6766_v24  ;;  %5448 = vmatpush3.bf16.msra.mxu1 %v5591_v59 }
0x371b   :  { %v4403_v35 = vpop.permute.xlu1 %4402  ;;  %5449 = vmatprep.subr.bf16.mxu1 %v5888_v15 }
0x3720   :  { %v5836_v50 = vpop.eup %5835 }
0x3721   :  { %v5838_v62 = vpop.eup %5837  ;;  %v4382_v16 = vadd.f32 1.0, %v5836_v50 }
0x3722   :  { %v5840_v18 = vpop.eup %5839  ;;  %v4396_v21 = vadd.f32 1.0, %v5838_v62 }
0x3723   :  { %v5842_v2 = vpop.eup %5841  ;;  %5843 = vrcp.f32 %v4382_v16  ;;  %v4383_v27 = vadd.f32 1.0, %v5840_v18  ;;  %v5592_v16 = vld [vmem:[%s7108_s3 + $0x330] ss:$8 sps:$4 sm:$0xff]  }
0x3724   :  { %5845 = vrcp.f32 %v4396_v21  ;;  %v4397_v49 = vadd.f32 1.0, %v5842_v2  ;;  %5450 = vmatpush3.bf16.msra.mxu1 %v5592_v16 }
0x3725   :  { %5847 = vrcp.f32 %v4383_v27  ;;  %5463 = vmatprep.subr.bf16.mxu1 %v5888_v15 }
0x3726   :  { %5849 = vrcp.f32 %v4397_v49 }
0x3727   :  { %5851 = vtanh.f32 %v3372_v30 }
0x3728   :  { %5853 = vrsqrt.f32 %v4448_v28 }
0x3729   :  { %5855 = vtanh.f32 %v3373_v29 }
0x372d   :  { %v5844_v17 = vpop.eup %5843 }
0x372e   :  { %v7013_v23 = vpop.eup %5845  ;;  %v4408_v33 = vmul.f32 %v5844_v17, %v4403_v35 }
0x372f   :  { %v5848_v20 = vpop.eup %5847  ;;  %v7017_v24 = vmul.f32 %v7013_v23, %v4436_v19  ;;  %v4422_v27 = vsub.f32 1.0, %v7013_v23 }
0x3730   :  { %v7019_v39 = vpop.eup %5849  ;;  %v4409_v26 = vmul.f32 %v5848_v20, %v4405_v38  ;;  %4412 = vrot.lane.b32.xlu0 %v4408_v33, %s5890_s27 }
0x3731   :  { %v7023_v40 = vmul.f32 %v7019_v39, %v4437_v37  ;;  %v5852_v58 = vpop.eup %5851  ;;  %v4423_v30 = vsub.f32 1.0, %v7019_v39 }
0x3732   :  { %4414 = vrot.lane.b32.xlu1 %v4409_v26, %s5890_s27  ;;  %v5854_v41 = vpop.eup %5853 }
0x3733   :  { %v5856_v42 = vpop.eup %5855 }
0x3734   :  { %3380 = vrot.lane.b32.xlu0 %v5852_v58, %s5895_s6 }
0x3736   :  { %3382 = vrot.lane.b32.xlu1 %v5856_v42, %s5895_s6 }
0x3738   :  { %4457 = vrot.lane.b32.xlu0 %v5854_v41, %s5894_s30 }
0x373a   :  { %4451 = vrot.lane.b32.xlu1 %v4446_v36, %s5894_s30 }
0x373c   :  { %4469 = vrot.lane.b32.xlu0 %v4445_v7, %s5894_s30 }
0x373e   :  { %4463 = vrot.lane.b32.xlu1 %v4444_v60, %s5894_s30 }
0x37a2   :  { %v4413_v44 = vpop.permute.xlu0 %4412 }
0x37a3   :  { %v4418_v45 = vadd.f32 %v4413_v44, %v6768_v25  ;;  %v5589_v25 = vld [vmem:[%s7108_s3 + $0x300] ss:$8 sps:$4 sm:$0xff]  }
0x37a4   :  { %v4415_v32 = vpop.permute.xlu1 %4414  ;;  %5456 = vmatpush3.bf16.msra.mxu0 %v5589_v25 }
0x37a5   :  { %5857 = vtanh.f32 %v4418_v45  ;;  %v4419_v34 = vadd.f32 %v4415_v32, %v6773_v31  ;;  %5457 = vmatprep.subr.bf16.mxu0 %v5888_v15 }
0x37a6   :  { %v3381_v51 = vpop.permute.xlu0 %3380 }
0x37a7   :  { %5859 = vtanh.f32 %v4419_v34  ;;  %v3386_v47 = vmul.f32 %v3381_v51, %v3376_v46  ;;  %v5593_v46 = vld [vmem:[%s7108_s3 + $0x340] ss:$8 sps:$4 sm:$0xff]   ;;  %v5594_v51 = vld [vmem:[%s7108_s3 + $0x350] ss:$8 sps:$4 sm:$0xff]  }
0x37a8   :  { %v3383_v52 = vpop.permute.xlu1 %3382  ;;  %5458 = vmatpush3.bf16.msra.mxu0 %v5590_v1 }
0x37a9   :  { %v3387_v55 = vmul.f32 %v3383_v52, %v3377_v8  ;;  %v3390_v56 = vadd.f32 %v3388_v53, %v3386_v47 }
0x37aa   :  { %v4458_v0 = vpop.permute.xlu0 %4457 }
0x37ab   :  { %v3391_v31 = vadd.f32 %v3389_v54, %v3387_v55  ;;  %v4632_v55 = vld [vmem:[%s7109_s4 + $0x41] ss:$0 sm:$0xff] }
0x37ac   :  { %v4452_v61 = vpop.permute.xlu1 %4451 }
0x37ad   :  { %v4454_v63 = vsub.f32 %v3390_v56, %v4452_v61  ;;  %v4455_v43 = vsub.f32 %v3391_v31, %v4452_v61 }
0x37ae   :  { %v4470_v12 = vpop.permute.xlu0 %4469 }
0x37af   :  { %v5858_v4 = vpop.eup %5857  ;;  %v4460_v57 = vmul.f32 %v4458_v0, %v4454_v63  ;;  %v4461_v3 = vmul.f32 %v4458_v0, %v4455_v43  ;;  %v4640_v43 = vld [vmem:[%s7109_s4 + $0x42] ss:$0 sm:$0xff] }
0x37b0   :  { %4426 = vrot.lane.b32.xlu0 %v5858_v4, %s5895_s6  ;;  %v4464_v5 = vpop.permute.xlu1 %4463 }
0x37b1   :  { %v5860_v13 = vpop.eup %5859  ;;  %v4466_v6 = vmul.f32 %v4464_v5, %v4460_v57  ;;  %v4467_v9 = vmul.f32 %v4464_v5, %v4461_v3 }
0x37b2   :  { %4428 = vrot.lane.b32.xlu1 %v5860_v13, %s5895_s6 }
0x37b3   :  { %v4472_v10 = vadd.f32 %v4470_v12, %v4466_v6  ;;  %v4473_v11 = vadd.f32 %v4470_v12, %v4467_v9 }
0x37b4   :  { %4479 = vrot.lane.b32.xlu0 %v5854_v41, %s5895_s6 }
0x37b5   :  { %v4502_v14 = vpack.c.bf16 %v4472_v10, %v4472_v10  ;;  %v4503_v50 = vpack.c.bf16 %v4473_v11, %v4473_v11 }
0x37b6   :  { %4474 = vrot.lane.b32.xlu1 %v4446_v36, %s5895_s6 }
0x37b7   :  { %v4571_v62 = vunpack.c.l.b16 %v4503_v50  ;;  %v4570_v18 = vunpack.c.l.b16 %v4502_v14 }
0x37b8   :  { %4489 = vrot.lane.b32.xlu0 %v4445_v7, %s5895_s6 }
0x37b9   :  { %v4572_v21 = vrot.slane %v4571_v62, 7 }
0x37ba   :  { %4484 = vrot.lane.b32.xlu1 %v4444_v60, %s5895_s6 }
0x37bb   :  { %v4573_v22 = vsel %vm3530_vm8, %v4572_v21, %v4570_v18 }
0x37bc   :  { %v4574_v2 = vpack.c.b16 %v4573_v22, %v4573_v22 }
0x37be   :  { %4575 = vrot.lane.b32.xlu1 %v4574_v2, %s5895_s6 }
0x3822   :  { %v4427_v48 = vpop.permute.xlu0 %4426 }
0x3823   :  { %v4432_v49 = vmul.f32 %v4427_v48, %v4422_v27 }
0x3824   :  { %v4429_v28 = vpop.permute.xlu1 %4428 }
0x3825   :  { %v4442_v29 = vadd.f32 %v7017_v24, %v4432_v49  ;;  %v4433_v38 = vmul.f32 %v4429_v28, %v4423_v30 }
0x3826   :  { %v4480_v17 = vpop.permute.xlu0 %4479 }
0x3827   :  { %v4443_v19 = vadd.f32 %v7023_v40, %v4433_v38 }
0x3828   :  { %v4475_v35 = vpop.permute.xlu1 %4474 }
0x3829   :  { %v4477_v33 = vsub.f32 %v4442_v29, %v4475_v35  ;;  %v4478_v20 = vsub.f32 %v4443_v19, %v4475_v35 }
0x382a   :  { %v4490_v41 = vpop.permute.xlu0 %4489 }
0x382b   :  { %v4482_v37 = vmul.f32 %v4480_v17, %v4477_v33  ;;  %v4483_v26 = vmul.f32 %v4480_v17, %v4478_v20 }
0x382c   :  { %v4485_v58 = vpop.permute.xlu1 %4484 }
0x382d   :  { %v4487_v42 = vmul.f32 %v4485_v58, %v4482_v37  ;;  %v4488_v23 = vmul.f32 %v4485_v58, %v4483_v26 }
0x382f   :  { %v4492_v36 = vadd.f32 %v4490_v41, %v4487_v42  ;;  %v4493_v7 = vadd.f32 %v4490_v41, %v4488_v23 }
0x3830   :  { %v4576_v60 = vpop.permute.xlu1 %4575 }
0x3831   :  { %v4504_v39 = vpack.c.bf16 %v4492_v36, %v4492_v36  ;;  %v4505_v44 = vpack.c.bf16 %v4493_v7, %v4493_v7  ;;  %5460 = vmatmul.mubr.msk.bf16.vlgmr.msra.gmra.mrb[116].mxu0 %vm3294_vm9, %v4576_v60 }
0x3833   :  { %v4509_v24 = vunpack.c.l.b16 %v4505_v44  ;;  %v4508_v45 = vunpack.c.l.b16 %v4504_v39 }
0x3835   :  { %v4510_v32 = vrot.slane %v4509_v24, 7 }
0x3837   :  { %v4511_v40 = vsel %vm3530_vm8, %v4510_v32, %v4508_v45 }
0x3838   :  { %v4512_v34 = vpack.c.b16 %v4511_v40, %v4511_v40 }
0x383a   :  { %5452 = vmatmul.mubr.msk.bf16.vlgmr.msra.gmra.mrb[112].mxu1 %vm3294_vm9, %v4512_v34 }
0x383b   :  { %5467 = vmatprep.mubr.msk.bf16.mxu1 %vm5889_vm4, %v5888_v15  ;;  %5464 = vmatpush3.bf16.msra.mxu1 %v5593_v46 }
0x383c   :  { %5465 = vmatprep.subr.bf16.mxu1 %v5888_v15 }
0x383f   :  { %5466 = vmatpush3.bf16.msra.mxu1 %v5594_v51 }
0x3904   :  { %v4626_v47 = vpop.f32.mrb[116].mxu0 }
0x3905   :  { %v5461_v8 = vpop.f32.mrb[117].mxu0 }
0x3906   :  { %v4629_v52 = vpop.f32.mrb[118].mxu0 }
0x3907   :  { %v5462_v53 = vpop.f32.mrb[119].mxu0 }
0x390d   :  { %v4562_v54 = vpop.f32.mrb[112].mxu1 }
0x390e   :  { %v4627_v25 = vadd.f32 %v4626_v47, %v4562_v54  ;;  %v5453_v0 = vpop.f32.mrb[113].mxu1 }
0x390f   :  { %v4565_v56 = vpop.f32.mrb[114].mxu1 }
0x3910   :  { %v4633_v31 = vadd.f32 %v4632_v55, %v4627_v25  ;;  %v5454_v61 = vpop.f32.mrb[115].mxu1 }
0x3912   :  { %v4634_v15 = vmax.f32 %v4633_v31, 0.0 }
0x3914   :  { %v4639_v63 = vpack.c.bf16 %v4634_v15, %v4634_v15 }
0x3916   :  { %5468 = vmatmul.mubr.msk.bf16.vlgmr.msra.gmra.mrb[116].mxu1 %vm3294_vm9, %v4639_v63 }
0x39e9   :  { %v4690_v1 = vpop.f32.mrb[116].mxu1 }
0x39ea   :  { %v4691_v4 = vadd.f32 %v4690_v1, %v4640_v43  ;;  %v5469_v57 = vpop.f32.mrb[117].mxu1 }
0x39eb   :  { %v4693_v3 = vpop.f32.mrb[118].mxu1 }
0x39ec   :  { %v5470_v5 = vpop.f32.mrb[119].mxu1  ;;  %4697 = vst.msk [vmem:[#allocation2] sm:$0x3] %vm4696_vm10, %v4691_v4 }
0x39ed   :  { %5873 = shalt.err (!%p5870_p4)
}
0x39ee   :  { %s5874_s4 = scalar_lea.hbm %s7110_s5, 32 }
0x39ef   :  { %p5875_p5 = scmp.ne.s32.totalorder %s7110_s5, %s5874_s4  ;;  %p5878_p6 = scmp.lt.u32.totalorder %s5874_s4, %s7110_s5 }
0x39f1   :  { %p5880_p7 = pnand %p5878_p6, %p5875_p5 }
0x39f3   :  { %5883 = shalt.err (!%p5880_p7)
}
0x39f4   :  { %4707 = dma.vmem_to_hbm [thread:$0]  %s4705_s7, 32, %s7110_s5, [#allocation3]  }
0x39f5   :  { %5884 = dma.done.wait [#allocation3], 32  }
0x39f6   :  { %5885 = vsyncadd [#allocation3], 4294967264 }
0x39f7   :  { %4711 = vsyncpa [#allocation3], 1 }

</bundles_post_ra>
